<compile_context>
chip_gen: v5e
topology: v5e:2x2
jax: 0.10.0
libtpu: 0.0.40
codegen_flags: <defaults>
</compile_context>

<pallas_src>
import jax
import jax.numpy as jnp
from jax import lax
from jax.experimental import pallas as pl
from jax.experimental.pallas import tpu as pltpu

# ---------------- config (small synthetic CLIP text model) ----------------
B = 4                       # batch (number of prompts)
MAX_LENGTH = 6              # tokens per chunk (real module uses 75)
S = MAX_LENGTH + 2          # BOS + tokens + EOS -> 8 (sublane aligned)
D = 128                     # hidden size (lane-dense: multiple of 128)
H = 4                       # attention heads
DH = D // H                 # 32
MLP = 4 * D                 # 512
N_LAYERS = 2
VOCAB = 512
BOS = VOCAB - 2
EOS = VOCAB - 1
EPS = 1e-5
NEG_INF = -1e9

B_TILE = 2                  # prompts folded into one compute block
assert B % B_TILE == 0
GRID_B = B // B_TILE        # =2 -> one block per v7x TensorCore ("parallel" axis)
M = B_TILE * S              # MXU LHS rows per block


# ---------------- in-kernel helpers ----------------
def _layernorm(x, g, b):
    """f32 layernorm over last axis; g/b broadcast from (1, D)."""
    mu = jnp.mean(x, axis=-1, keepdims=True)
    var = jnp.mean((x - mu) ** 2, axis=-1, keepdims=True)
    return (x - mu) * lax.rsqrt(var + EPS) * g + b


# ---------------- fused encoder-stack kernel ----------------
def _clip_stack_kernel(x_ref, mask_ref, pvec_ref,
                       wqkv_ref, wo_ref, w1_ref, w2_ref,
                       lnfg_ref, lnfb_ref,
                       o_ref, h_scr):
    layer = pl.program_id(1)
    n_layers = pl.num_programs(1)

    # Load embedded tokens into the resident VMEM hidden state once per batch block.
    @pl.when(layer == 0)
    def _():
        h_scr[...] = x_ref[...].reshape(M, D).astype(jnp.float32)

    # Unpack the single packed per-layer small-parameter tensor (lane-aligned slices).
    pv = pvec_ref[0]                       # (8, MLP) f32
    ln1_g = pv[0:1, :D]
    ln1_b = pv[1:2, :D]
    b_qkv = pv[2:3, :3 * D]                # q-part already pre-scaled by 1/sqrt(DH)
    b_o = pv[3:4, :D]
    ln2_g = pv[4:5, :D]
    ln2_b = pv[5:6, :D]
    b_1 = pv[6:7, :]                       # (1, MLP)
    b_2 = pv[7:8, :D]

    x = h_scr[...]                         # (M, D) f32  (M = B_TILE*S folded rows)

    # ---- causal self-attention (pre-LN) ----
    h = _layernorm(x, ln1_g, ln1_b)
    qkv = jnp.dot(h.astype(jnp.bfloat16), wqkv_ref[0],
                  preferred_element_type=jnp.float32) + b_qkv        # (M, 3D)

    # Head split via reshape/transpose (no list-of-slices stack): (M, D) -> (H, M, DH).
    q = jnp.swapaxes(qkv[:, 0 * D:1 * D].reshape(M, H, DH), 0, 1).astype(jnp.bfloat16)
    k = jnp.swapaxes(qkv[:, 1 * D:2 * D].reshape(M, H, DH), 0, 1).astype(jnp.bfloat16)
    v = jnp.swapaxes(qkv[:, 2 * D:3 * D].reshape(M, H, DH), 0, 1).astype(jnp.bfloat16)

    # One batched score matmul + one batched context matmul for ALL heads.
    sc = jnp.einsum('hqd,hkd->hqk', q, k,
                    preferred_element_type=jnp.float32)              # (H, M, M)
    sc = sc + mask_ref[...][None, :, :]    # block-diagonal causal mask (f32 add)
    sc = sc - jnp.max(sc, axis=-1, keepdims=True)
    p = jnp.exp(sc)
    p = p * pl.reciprocal(jnp.sum(p, axis=-1, keepdims=True), approx=True)

    ctx = jnp.einsum('hqk,hkd->hqd', p.astype(jnp.bfloat16), v,
                     preferred_element_type=jnp.float32)             # (H, M, DH)
    # Head merge via one relayout (swapaxes+reshape) feeding the out-projection.
    ctx2d = jnp.swapaxes(ctx, 0, 1).reshape(M, D)
    attn = jnp.dot(ctx2d.astype(jnp.bfloat16), wo_ref[0],
                   preferred_element_type=jnp.float32) + b_o
    x = x + attn

    # ---- MLP with quick_gelu (CLIP activation) ----
    h2 = _layernorm(x, ln2_g, ln2_b)
    m = jnp.dot(h2.astype(jnp.bfloat16), w1_ref[0],
                preferred_element_type=jnp.float32) + b_1
    m = m * jax.nn.sigmoid(1.702 * m)
    m = jnp.dot(m.astype(jnp.bfloat16), w2_ref[0],
                preferred_element_type=jnp.float32) + b_2
    x = x + m

    h_scr[...] = x                         # carry residual to next layer

    # ---- epilogue: final LayerNorm, write last_hidden_state ----
    @pl.when(layer == n_layers - 1)
    def _():
        z = _layernorm(x, lnfg_ref[...], lnfb_ref[...])              # (M, D)
        o_ref[...] = z.reshape(B_TILE, S, D).astype(o_ref.dtype)


# ------------- prompt-weight rescale kernel (whole-tensor mean, as reference) -------------
def _rescale_kernel(z_ref, m_ref, o_ref):
    z = z_ref[...].astype(jnp.float32)                     # (B, S, D)
    mult = m_ref[...].astype(jnp.float32)                  # (B, S, 1)
    orig_mean = jnp.mean(z, keepdims=True)                 # (1, 1, 1)
    zw = z * mult
    new_mean = jnp.mean(zw, keepdims=True)
    ratio = orig_mean / new_mean                           # exact division (parity)
    o_ref[...] = (zw * ratio).astype(o_ref.dtype)


# ---------------- pallas_call wrappers ----------------
def clip_text_last_hidden(x_emb, mask, p):
    per_batch = lambda b, l: (b, 0, 0)
    per_layer = lambda b, l: (l, 0, 0)
    shared2 = lambda b, l: (0, 0)

    grid_spec = pltpu.PrefetchScalarGridSpec(
        num_scalar_prefetch=0,
        grid=(GRID_B, N_LAYERS),
        in_specs=[
            pl.BlockSpec((B_TILE, S, D), per_batch),    # embedded tokens (batch-folded block)
            pl.BlockSpec((M, M), shared2),              # block-diag causal additive mask
            pl.BlockSpec((1, 8, MLP), per_layer),       # packed per-layer LN params + biases
            pl.BlockSpec((1, D, 3 * D), per_layer),     # w_qkv (bf16, Q pre-scaled)
            pl.BlockSpec((1, D, D), per_layer),         # w_o   (bf16)
            pl.BlockSpec((1, D, MLP), per_layer),       # w_1   (bf16)
            pl.BlockSpec((1, MLP, D), per_layer),       # w_2   (bf16)
            pl.BlockSpec((1, D), shared2),              # ln_f_g
            pl.BlockSpec((1, D), shared2),              # ln_f_b
        ],
        out_specs=pl.BlockSpec((B_TILE, S, D), per_batch),
        scratch_shapes=[pltpu.VMEM((M, D), jnp.float32)],   # resident residual stream
    )
    return pl.pallas_call(
        _clip_stack_kernel,
        out_shape=jax.ShapeDtypeStruct((B, S, D), jnp.float32),
        grid_spec=grid_spec,
        compiler_params=pltpu.CompilerParams(
            dimension_semantics=("parallel", "arbitrary"),
            # 40 MiB leaves compiler-scratch headroom on v7x (64 MiB/TC).  At real
            # CLIP size: v5e/v6e (128 MiB) can keep whole-layer weights buffered
            # (optionally pl.Buffered(3) on w_1/w_2); on v7x tile the MLP weights.
            vmem_limit_bytes=40 * 1024 * 1024,
        ),
    )(x_emb, mask,
      p['layer_vec'], p['w_qkv'], p['w_o'], p['w_1'], p['w_2'],
      p['ln_f_g'], p['ln_f_b'])


def weight_rescale(z, multipliers):
    # TODO(synk): at larger chunk counts fuse this into the stack-kernel epilogue
    # (emit per-block sums, apply scalar ratio) to avoid the extra HBM round-trip.
    return pl.pallas_call(
        _rescale_kernel,
        out_shape=jax.ShapeDtypeStruct(z.shape, z.dtype),
        in_specs=[pl.BlockSpec(memory_space=pltpu.MemorySpace.VMEM)] * 2,
        out_specs=pl.BlockSpec(memory_space=pltpu.MemorySpace.VMEM),
    )(z, multipliers)


@jax.jit
def frozen_clip_embedder_forward(tokens, multipliers, params):
    # embedding gather + positional add are glue (data-dependent gather)
    x = params['tok_emb'][tokens].astype(jnp.float32) + params['pos_emb'][None]
    # Block-diagonal causal mask over the B_TILE*S folded rows: a row (b, s) may only
    # attend to (b, s') with s' <= s in the SAME prompt.  Built once, shared by all blocks.
    r = jnp.arange(M)
    same_prompt = (r[:, None] // S) == (r[None, :] // S)
    causal = (r[None, :] % S) <= (r[:, None] % S)
    mask = jnp.where(same_prompt & causal, 0.0, NEG_INF).astype(jnp.float32)
    z = clip_text_last_hidden(x, mask, params)     # last_hidden_state (B, S, D)
    z = weight_rescale(z, multipliers)             # mean-preserving prompt-weight rescale
    zs = [z]                                       # single chunk in this synthetic setup
    return jnp.concatenate(zs, axis=1)             # torch.hstack over chunks


# ---------------- deterministic parameter init ----------------
def init_params(key):
    ks = jax.random.split(key, 20)

    def nrm(k, shape, scale=0.02):
        return scale * jax.random.normal(k, shape, jnp.float32)

    # QKV projection; the 1/sqrt(DH) attention scale is folded into the Q columns
    # (weights AND bias) at build time so the kernel never multiplies by it.
    scale_q = DH ** -0.5
    wq = nrm(ks[2], (N_LAYERS, D, D)) * scale_q
    wk = nrm(ks[3], (N_LAYERS, D, D))
    wv = nrm(ks[4], (N_LAYERS, D, D))

    ln1_g = jnp.ones((N_LAYERS, D), jnp.float32)
    ln1_b = nrm(ks[8], (N_LAYERS, D), 0.01)
    ln2_g = jnp.ones((N_LAYERS, D), jnp.float32)
    ln2_b = nrm(ks[9], (N_LAYERS, D), 0.01)
    b_q = nrm(ks[10], (N_LAYERS, D), 0.01) * scale_q
    b_k = nrm(ks[11], (N_LAYERS, D), 0.01)
    b_v = nrm(ks[12], (N_LAYERS, D), 0.01)
    b_qkv = jnp.concatenate([b_q, b_k, b_v], axis=-1)
    b_o = nrm(ks[13], (N_LAYERS, D), 0.01)
    b_1 = nrm(ks[14], (N_LAYERS, MLP), 0.01)
    b_2 = nrm(ks[15], (N_LAYERS, D), 0.01)

    # Pack all small per-layer params into ONE lane-dense (N_LAYERS, 8, MLP) tensor:
    # row 0: ln1_g  row 1: ln1_b  row 2: b_qkv(3D)  row 3: b_o
    # row 4: ln2_g  row 5: ln2_b  row 6: b_1(MLP)   row 7: b_2
    layer_vec = jnp.zeros((N_LAYERS, 8, MLP), jnp.float32)
    layer_vec = layer_vec.at[:, 0, :D].set(ln1_g)
    layer_vec = layer_vec.at[:, 1, :D].set(ln1_b)
    layer_vec = layer_vec.at[:, 2, :3 * D].set(b_qkv)
    layer_vec = layer_vec.at[:, 3, :D].set(b_o)
    layer_vec = layer_vec.at[:, 4, :D].set(ln2_g)
    layer_vec = layer_vec.at[:, 5, :D].set(ln2_b)
    layer_vec = layer_vec.at[:, 6, :MLP].set(b_1)
    layer_vec = layer_vec.at[:, 7, :D].set(b_2)

    return {
        'tok_emb': nrm(ks[0], (VOCAB, D)),
        'pos_emb': nrm(ks[1], (S, D), 0.01),
        'layer_vec': layer_vec,
        # per-layer matmul weights stacked on a leading layer axis, bf16 (MXU-native)
        'w_qkv': jnp.concatenate([wq, wk, wv], axis=-1).astype(jnp.bfloat16),
        'w_o': nrm(ks[5], (N_LAYERS, D, D)).astype(jnp.bfloat16),
        'w_1': nrm(ks[6], (N_LAYERS, D, MLP)).astype(jnp.bfloat16),
        'w_2': nrm(ks[7], (N_LAYERS, MLP, D)).astype(jnp.bfloat16),
        # final layernorm (small nonzero beta keeps the mean-preserving rescale
        # well conditioned, like real pretrained CLIP weights)
        'ln_f_g': 1.0 + nrm(ks[16], (1, D), 0.05),
        'ln_f_b': 0.05 + nrm(ks[17], (1, D), 0.02),
    }


# ---------------- chunk building (mirrors make_weighted_chunks, single chunk) ----------------
def make_chunk(token_list, weight):
    toks = list(token_list)[:MAX_LENGTH]
    mults = [float(weight)] * len(toks)
    pad = MAX_LENGTH - len(toks)
    toks = toks + [EOS] * pad
    mults = mults + [1.0] * pad
    toks = [BOS] + toks + [EOS]
    mults = [1.0] + mults + [1.0]
    return toks, mults


if __name__ == "__main__":
    key = jax.random.PRNGKey(0)
    pkey, tkey = jax.random.split(key)
    params = init_params(pkey)

    # TODO(synk): CLIPTokenizer / parse_prompt_weights are host-side text processing with
    # no Pallas equivalent; synthetic token ids + weights stand in for tokenizer output.
    lengths = [4, 6, 3, 5]
    weights = [1.1, 0.8, 1.0, 1.3]
    tokens_list, mults_list = [], []
    for i, (ln, w) in enumerate(zip(lengths, weights)):
        t = jax.random.randint(jax.random.fold_in(tkey, i), (ln,), 0, VOCAB - 2)
        tk, mm = make_chunk([int(x) for x in t], w)
        tokens_list.append(tk)
        mults_list.append(mm)

    tokens = jnp.asarray(tokens_list, dtype=jnp.int32)                    # (B, S)
    multipliers = jnp.asarray(mults_list, dtype=jnp.float32)[..., None]   # (B, S, 1)

    out = frozen_clip_embedder_forward(tokens, multipliers, params)
    out = jax.block_until_ready(out)
    assert out.shape == (B, S, D), out.shape
    assert bool(jnp.all(jnp.isfinite(out)))
    print("KERNEL_OK")
</pallas_src>

<mosaic_0001>
module attributes {stable_mosaic.version = 11 : i64} {
  func.func @_rescale_kernel(%arg0: memref<4x8x128xf32, #tpu.memory_space<vmem>>, %arg1: memref<4x8x1xf32, #tpu.memory_space<vmem>>, %arg2: memref<4x8x128xf32, #tpu.memory_space<vmem>>) attributes {dimension_semantics = [], scalar_prefetch = 0 : i64, scratch_operands = 0 : i64, tpu.core_type = #tpu.core_type<tc>} {
    %c0 = arith.constant 0 : index
    %c0_0 = arith.constant 0 : index
    %c0_1 = arith.constant 0 : index
    %0 = vector.load %arg0[%c0, %c0_0, %c0_1] : memref<4x8x128xf32, #tpu.memory_space<vmem>>, vector<4x8x128xf32>
    %c0_2 = arith.constant 0 : index
    %c0_3 = arith.constant 0 : index
    %c0_4 = arith.constant 0 : index
    %1 = vector.load %arg1[%c0_2, %c0_3, %c0_4] : memref<4x8x1xf32, #tpu.memory_space<vmem>>, vector<4x8x1xf32>
    %2 = vector.shape_cast %0 : vector<4x8x128xf32> to vector<1x4x8x128xf32>
    %cst = arith.constant dense<0.000000e+00> : vector<1xf32>
    %3 = vector.multi_reduction <add>, %2, %cst [1, 2, 3] : vector<1x4x8x128xf32> to vector<1xf32>
    %4 = vector.shape_cast %3 : vector<1xf32> to vector<1x1x1x1xf32>
    %5 = vector.extract %4[0, 0, 0, 0] : f32 from vector<1x1x1x1xf32>
    %6 = vector.broadcast %5 : f32 to vector<1x1x1xf32>
    %cst_5 = arith.constant 4.096000e+03 : f32
    %7 = vector.broadcast %cst_5 : f32 to vector<1x1x1xf32>
    %8 = arith.divf %6, %7 : vector<1x1x1xf32>
    %9 = vector.broadcast %1 : vector<4x8x1xf32> to vector<4x8x128xf32>
    %10 = arith.mulf %0, %9 : vector<4x8x128xf32>
    %11 = vector.shape_cast %10 : vector<4x8x128xf32> to vector<1x4x8x128xf32>
    %cst_6 = arith.constant dense<0.000000e+00> : vector<1xf32>
    %12 = vector.multi_reduction <add>, %11, %cst_6 [1, 2, 3] : vector<1x4x8x128xf32> to vector<1xf32>
    %13 = vector.shape_cast %12 : vector<1xf32> to vector<1x1x1x1xf32>
    %14 = vector.extract %13[0, 0, 0, 0] : f32 from vector<1x1x1x1xf32>
    %15 = vector.broadcast %14 : f32 to vector<1x1x1xf32>
    %cst_7 = arith.constant 4.096000e+03 : f32
    %16 = vector.broadcast %cst_7 : f32 to vector<1x1x1xf32>
    %17 = arith.divf %15, %16 : vector<1x1x1xf32>
    %18 = arith.divf %8, %17 : vector<1x1x1xf32>
    %19 = vector.broadcast %18 : vector<1x1x1xf32> to vector<4x8x128xf32>
    %20 = arith.mulf %10, %19 : vector<4x8x128xf32>
    %c0_8 = arith.constant 0 : index
    %c0_9 = arith.constant 0 : index
    %c0_10 = arith.constant 0 : index
    %21 = vector.load %arg2[%c0_8, %c0_9, %c0_10] : memref<4x8x128xf32, #tpu.memory_space<vmem>>, vector<4x8x128xf32>
    tpu.vector_store %arg2[%c0_8, %c0_9, %c0_10], %20 {strides = array<i32>} : memref<4x8x128xf32, #tpu.memory_space<vmem>>, vector<4x8x128xf32>,
    return
  }
}

module attributes {stable_mosaic.version = 11 : i64} {
  func.func @_clip_stack_kernel(%arg0: i32, %arg1: i32, %arg2: memref<2x8x128xf32, #tpu.memory_space<vmem>>, %arg3: memref<16x16xf32, #tpu.memory_space<vmem>>, %arg4: memref<1x8x512xf32, #tpu.memory_space<vmem>>, %arg5: memref<1x128x384xbf16, #tpu.memory_space<vmem>>, %arg6: memref<1x128x128xbf16, #tpu.memory_space<vmem>>, %arg7: memref<1x128x512xbf16, #tpu.memory_space<vmem>>, %arg8: memref<1x512x128xbf16, #tpu.memory_space<vmem>>, %arg9: memref<1x128xf32, #tpu.memory_space<vmem>>, %arg10: memref<1x128xf32, #tpu.memory_space<vmem>>, %arg11: memref<2x8x128xf32, #tpu.memory_space<vmem>>, %arg12: memref<16x128xf32, #tpu.memory_space<vmem>>) attributes {dimension_semantics = [#tpu.dimension_semantics<parallel>, #tpu.dimension_semantics<arbitrary>], iteration_bounds = array<i64: 2, 2>, scalar_prefetch = 0 : i64, scratch_operands = 1 : i64, tpu.core_type = #tpu.core_type<tc>, window_params = [{transform_indices = @transform_0, window_bounds = array<i64: 2, 8, 128>}, {pipeline_mode = #tpu.pipeline_mode<synchronous>, transform_indices = @transform_1, window_bounds = array<i64: 16, 16>}, {transform_indices = @transform_2, window_bounds = array<i64: 1, 8, 512>}, {transform_indices = @transform_3, window_bounds = array<i64: 1, 128, 384>}, {transform_indices = @transform_4, window_bounds = array<i64: 1, 128, 128>}, {transform_indices = @transform_5, window_bounds = array<i64: 1, 128, 512>}, {transform_indices = @transform_6, window_bounds = array<i64: 1, 512, 128>}, {pipeline_mode = #tpu.pipeline_mode<synchronous>, transform_indices = @transform_7, window_bounds = array<i64: 1, 128>}, {pipeline_mode = #tpu.pipeline_mode<synchronous>, transform_indices = @transform_8, window_bounds = array<i64: 1, 128>}, {transform_indices = @transform_9, window_bounds = array<i64: 2, 8, 128>}]} {
    %c0_i32 = arith.constant 0 : i32
    %0 = arith.cmpi eq, %arg1, %c0_i32 : i32
    %1 = arith.extui %0 : i1 to i32
    %c0_i32_0 = arith.constant 0 : i32
    %2 = arith.cmpi ne, %1, %c0_i32_0 : i32
    scf.if %2 {
      %c0_41 = arith.constant 0 : index
      %c0_42 = arith.constant 0 : index
      %c0_43 = arith.constant 0 : index
      %127 = vector.load %arg2[%c0_41, %c0_42, %c0_43] : memref<2x8x128xf32, #tpu.memory_space<vmem>>, vector<2x8x128xf32>
      %128 = vector.shape_cast %127 : vector<2x8x128xf32> to vector<16x128xf32>
      %c0_44 = arith.constant 0 : index
      %c0_45 = arith.constant 0 : index
      %129 = vector.load %arg12[%c0_44, %c0_45] : memref<16x128xf32, #tpu.memory_space<vmem>>, vector<16x128xf32>
      tpu.vector_store %arg12[%c0_44, %c0_45], %128 {strides = array<i32>} : memref<16x128xf32, #tpu.memory_space<vmem>>, vector<16x128xf32>,
    } else {
    }
    %c0 = arith.constant 0 : index
    %c0_1 = arith.constant 0 : index
    %c0_2 = arith.constant 0 : index
    %3 = vector.load %arg4[%c0, %c0_1, %c0_2] : memref<1x8x512xf32, #tpu.memory_space<vmem>>, vector<1x8x512xf32>
    %4 = vector.shape_cast %3 : vector<1x8x512xf32> to vector<8x512xf32>
    %5 = vector.extract_strided_slice %4 {offsets = [0, 0], sizes = [1, 128], strides = [1, 1]} : vector<8x512xf32> to vector<1x128xf32>
    %6 = vector.extract_strided_slice %4 {offsets = [1, 0], sizes = [1, 128], strides = [1, 1]} : vector<8x512xf32> to vector<1x128xf32>
    %7 = vector.extract_strided_slice %4 {offsets = [2, 0], sizes = [1, 384], strides = [1, 1]} : vector<8x512xf32> to vector<1x384xf32>
    %8 = vector.extract_strided_slice %4 {offsets = [3, 0], sizes = [1, 128], strides = [1, 1]} : vector<8x512xf32> to vector<1x128xf32>
    %9 = vector.extract_strided_slice %4 {offsets = [4, 0], sizes = [1, 128], strides = [1, 1]} : vector<8x512xf32> to vector<1x128xf32>
    %10 = vector.extract_strided_slice %4 {offsets = [5, 0], sizes = [1, 128], strides = [1, 1]} : vector<8x512xf32> to vector<1x128xf32>
    %11 = vector.extract_strided_slice %4 {offsets = [6, 0], sizes = [1, 512], strides = [1, 1]} : vector<8x512xf32> to vector<1x512xf32>
    %12 = vector.extract_strided_slice %4 {offsets = [7, 0], sizes = [1, 128], strides = [1, 1]} : vector<8x512xf32> to vector<1x128xf32>
    %c0_3 = arith.constant 0 : index
    %c0_4 = arith.constant 0 : index
    %13 = vector.load %arg12[%c0_3, %c0_4] : memref<16x128xf32, #tpu.memory_space<vmem>>, vector<16x128xf32>
    %cst = arith.constant dense<0.000000e+00> : vector<16xf32>
    %14 = vector.multi_reduction <add>, %13, %cst [1] : vector<16x128xf32> to vector<16xf32>
    %15 = vector.shape_cast %14 : vector<16xf32> to vector<16x1xf32>
    %cst_5 = arith.constant 1.280000e+02 : f32
    %16 = vector.broadcast %cst_5 : f32 to vector<16x1xf32>
    %17 = arith.divf %15, %16 : vector<16x1xf32>
    %18 = vector.broadcast %17 : vector<16x1xf32> to vector<16x128xf32>
    %19 = arith.subf %13, %18 : vector<16x128xf32>
    %20 = arith.mulf %19, %19 : vector<16x128xf32>
    %cst_6 = arith.constant dense<0.000000e+00> : vector<16xf32>
    %21 = vector.multi_reduction <add>, %20, %cst_6 [1] : vector<16x128xf32> to vector<16xf32>
    %22 = vector.shape_cast %21 : vector<16xf32> to vector<16x1xf32>
    %cst_7 = arith.constant 1.280000e+02 : f32
    %23 = vector.broadcast %cst_7 : f32 to vector<16x1xf32>
    %24 = arith.divf %22, %23 : vector<16x1xf32>
    %25 = vector.broadcast %17 : vector<16x1xf32> to vector<16x128xf32>
    %26 = arith.subf %13, %25 : vector<16x128xf32>
    %cst_8 = arith.constant 9.99999974E-6 : f32
    %27 = vector.broadcast %cst_8 : f32 to vector<16x1xf32>
    %28 = arith.addf %24, %27 : vector<16x1xf32>
    %29 = math.rsqrt %28 : vector<16x1xf32>
    %30 = vector.broadcast %29 : vector<16x1xf32> to vector<16x128xf32>
    %31 = arith.mulf %26, %30 : vector<16x128xf32>
    %32 = vector.broadcast %5 : vector<1x128xf32> to vector<16x128xf32>
    %33 = arith.mulf %31, %32 : vector<16x128xf32>
    %34 = vector.broadcast %6 : vector<1x128xf32> to vector<16x128xf32>
    %35 = arith.addf %33, %34 : vector<16x128xf32>
    %36 = arith.truncf %35 : vector<16x128xf32> to vector<16x128xbf16>
    %c0_9 = arith.constant 0 : index
    %c0_10 = arith.constant 0 : index
    %c0_11 = arith.constant 0 : index
    %37 = vector.load %arg5[%c0_9, %c0_10, %c0_11] : memref<1x128x384xbf16, #tpu.memory_space<vmem>>, vector<1x128x384xbf16>
    %38 = vector.shape_cast %37 : vector<1x128x384xbf16> to vector<128x384xbf16>
    %cst_12 = arith.constant dense<0.000000e+00> : vector<16x384xf32>
    %39 = tpu.matmul %36, %38, %cst_12 {dimension_numbers = #tpu.dot_dimension_numbers<[1], [0], [0], [1], [0, 0, 1, 1], [], []>} : vector<16x128xbf16>, vector<128x384xbf16>, vector<16x384xf32> -> vector<16x384xf32>
    %40 = vector.broadcast %7 : vector<1x384xf32> to vector<16x384xf32>
    %41 = arith.addf %39, %40 : vector<16x384xf32>
    %42 = vector.extract_strided_slice %41 {offsets = [0, 0], sizes = [16, 128], strides = [1, 1]} : vector<16x384xf32> to vector<16x128xf32>
    %43 = vector.shape_cast %42 : vector<16x128xf32> to vector<16x4x32xf32>
    %44 = tpu.transpose %43, [1, 0, 2] : vector<16x4x32xf32> -> vector<4x16x32xf32>
    %45 = arith.truncf %44 : vector<4x16x32xf32> to vector<4x16x32xbf16>
    %46 = vector.extract_strided_slice %41 {offsets = [0, 128], sizes = [16, 128], strides = [1, 1]} : vector<16x384xf32> to vector<16x128xf32>
    %47 = vector.shape_cast %46 : vector<16x128xf32> to vector<16x4x32xf32>
    %48 = tpu.transpose %47, [1, 0, 2] : vector<16x4x32xf32> -> vector<4x16x32xf32>
    %49 = arith.truncf %48 : vector<4x16x32xf32> to vector<4x16x32xbf16>
    %50 = vector.extract_strided_slice %41 {offsets = [0, 256], sizes = [16, 128], strides = [1, 1]} : vector<16x384xf32> to vector<16x128xf32>
    %51 = vector.shape_cast %50 : vector<16x128xf32> to vector<16x4x32xf32>
    %52 = tpu.transpose %51, [1, 0, 2] : vector<16x4x32xf32> -> vector<4x16x32xf32>
    %53 = arith.truncf %52 : vector<4x16x32xf32> to vector<4x16x32xbf16>
    "tpu.trace_start"() <{level = 10 : i32, message = "hqd,hkd->hqk"}> : () -> ()
    %cst_13 = arith.constant dense<0.000000e+00> : vector<4x16x16xf32>
    %54 = tpu.matmul %45, %49, %cst_13 {dimension_numbers = #tpu.dot_dimension_numbers<[2], [2], [1], [1], [0, 0, 0, 1, 1, 1], [0], [0]>} : vector<4x16x32xbf16>, vector<4x16x32xbf16>, vector<4x16x16xf32> -> vector<4x16x16xf32>
    "tpu.trace_stop"() : () -> ()
    %c0_14 = arith.constant 0 : index
    %c0_15 = arith.constant 0 : index
    %55 = vector.load %arg3[%c0_14, %c0_15] : memref<16x16xf32, #tpu.memory_space<vmem>>, vector<16x16xf32>
    %56 = vector.shape_cast %55 : vector<16x16xf32> to vector<1x16x16xf32>
    %57 = vector.broadcast %56 : vector<1x16x16xf32> to vector<4x16x16xf32>
    %58 = arith.addf %54, %57 : vector<4x16x16xf32>
    %cst_16 = arith.constant dense<0xFF800000> : vector<4x16xf32>
    %59 = vector.multi_reduction <maximumf>, %58, %cst_16 [2] : vector<4x16x16xf32> to vector<4x16xf32>
    %60 = vector.shape_cast %59 : vector<4x16xf32> to vector<4x16x1xf32>
    %61 = vector.broadcast %60 : vector<4x16x1xf32> to vector<4x16x16xf32>
    %62 = arith.subf %58, %61 : vector<4x16x16xf32>
    %63 = math.exp %62 : vector<4x16x16xf32>
    %cst_17 = arith.constant dense<0.000000e+00> : vector<4x16xf32>
    %64 = vector.multi_reduction <add>, %63, %cst_17 [2] : vector<4x16x16xf32> to vector<4x16xf32>
    %65 = vector.shape_cast %64 : vector<4x16xf32> to vector<4x16x1xf32>
    %66 = tpu.reciprocal %65 {approx = true} : vector<4x16x1xf32> -> vector<4x16x1xf32>
    %67 = vector.broadcast %66 : vector<4x16x1xf32> to vector<4x16x16xf32>
    %68 = arith.mulf %63, %67 : vector<4x16x16xf32>
    %69 = arith.truncf %68 : vector<4x16x16xf32> to vector<4x16x16xbf16>
    "tpu.trace_start"() <{level = 10 : i32, message = "hqk,hkd->hqd"}> : () -> ()
    %cst_18 = arith.constant dense<0.000000e+00> : vector<4x16x32xf32>
    %70 = tpu.matmul %69, %53, %cst_18 {dimension_numbers = #tpu.dot_dimension_numbers<[2], [1], [1], [2], [0, 0, 0, 1, 1, 2], [0], [0]>} : vector<4x16x16xbf16>, vector<4x16x32xbf16>, vector<4x16x32xf32> -> vector<4x16x32xf32>
    "tpu.trace_stop"() : () -> ()
    %71 = tpu.transpose %70, [1, 0, 2] : vector<4x16x32xf32> -> vector<16x4x32xf32>
    %72 = vector.shape_cast %71 : vector<16x4x32xf32> to vector<16x128xf32>
    %73 = arith.truncf %72 : vector<16x128xf32> to vector<16x128xbf16>
    %c0_19 = arith.constant 0 : index
    %c0_20 = arith.constant 0 : index
    %c0_21 = arith.constant 0 : index
    %74 = vector.load %arg6[%c0_19, %c0_20, %c0_21] : memref<1x128x128xbf16, #tpu.memory_space<vmem>>, vector<1x128x128xbf16>
    %75 = vector.shape_cast %74 : vector<1x128x128xbf16> to vector<128x128xbf16>
    %cst_22 = arith.constant dense<0.000000e+00> : vector<16x128xf32>
    %76 = tpu.matmul %73, %75, %cst_22 {dimension_numbers = #tpu.dot_dimension_numbers<[1], [0], [0], [1], [0, 0, 1, 1], [], []>} : vector<16x128xbf16>, vector<128x128xbf16>, vector<16x128xf32> -> vector<16x128xf32>
    %77 = vector.broadcast %8 : vector<1x128xf32> to vector<16x128xf32>
    %78 = arith.addf %76, %77 : vector<16x128xf32>
    %79 = arith.addf %13, %78 : vector<16x128xf32>
    %cst_23 = arith.constant dense<0.000000e+00> : vector<16xf32>
    %80 = vector.multi_reduction <add>, %79, %cst_23 [1] : vector<16x128xf32> to vector<16xf32>
    %81 = vector.shape_cast %80 : vector<16xf32> to vector<16x1xf32>
    %cst_24 = arith.constant 1.280000e+02 : f32
    %82 = vector.broadcast %cst_24 : f32 to vector<16x1xf32>
    %83 = arith.divf %81, %82 : vector<16x1xf32>
    %84 = vector.broadcast %83 : vector<16x1xf32> to vector<16x128xf32>
    %85 = arith.subf %79, %84 : vector<16x128xf32>
    %86 = arith.mulf %85, %85 : vector<16x128xf32>
    %cst_25 = arith.constant dense<0.000000e+00> : vector<16xf32>
    %87 = vector.multi_reduction <add>, %86, %cst_25 [1] : vector<16x128xf32> to vector<16xf32>
    %88 = vector.shape_cast %87 : vector<16xf32> to vector<16x1xf32>
    %cst_26 = arith.constant 1.280000e+02 : f32
    %89 = vector.broadcast %cst_26 : f32 to vector<16x1xf32>
    %90 = arith.divf %88, %89 : vector<16x1xf32>
    %91 = vector.broadcast %83 : vector<16x1xf32> to vector<16x128xf32>
    %92 = arith.subf %79, %91 : vector<16x128xf32>
    %cst_27 = arith.constant 9.99999974E-6 : f32
    %93 = vector.broadcast %cst_27 : f32 to vector<16x1xf32>
    %94 = arith.addf %90, %93 : vector<16x1xf32>
    %95 = math.rsqrt %94 : vector<16x1xf32>
    %96 = vector.broadcast %95 : vector<16x1xf32> to vector<16x128xf32>
    %97 = arith.mulf %92, %96 : vector<16x128xf32>
    %98 = vector.broadcast %9 : vector<1x128xf32> to vector<16x128xf32>
    %99 = arith.mulf %97, %98 : vector<16x128xf32>
    %100 = vector.broadcast %10 : vector<1x128xf32> to vector<16x128xf32>
    %101 = arith.addf %99, %100 : vector<16x128xf32>
    %102 = arith.truncf %101 : vector<16x128xf32> to vector<16x128xbf16>
    %c0_28 = arith.constant 0 : index
    %c0_29 = arith.constant 0 : index
    %c0_30 = arith.constant 0 : index
    %103 = vector.load %arg7[%c0_28, %c0_29, %c0_30] : memref<1x128x512xbf16, #tpu.memory_space<vmem>>, vector<1x128x512xbf16>
    %104 = vector.shape_cast %103 : vector<1x128x512xbf16> to vector<128x512xbf16>
    %cst_31 = arith.constant dense<0.000000e+00> : vector<16x512xf32>
    %105 = tpu.matmul %102, %104, %cst_31 {dimension_numbers = #tpu.dot_dimension_numbers<[1], [0], [0], [1], [0, 0, 1, 1], [], []>} : vector<16x128xbf16>, vector<128x512xbf16>, vector<16x512xf32> -> vector<16x512xf32>
    %106 = vector.broadcast %11 : vector<1x512xf32> to vector<16x512xf32>
    %107 = arith.addf %105, %106 : vector<16x512xf32>
    %cst_32 = arith.constant 1.702000e+00 : f32
    %108 = vector.broadcast %cst_32 : f32 to vector<16x512xf32>
    %109 = arith.mulf %108, %107 : vector<16x512xf32>
    %110 = arith.negf %109 : vector<16x512xf32>
    %111 = math.exp %110 : vector<16x512xf32>
    %cst_33 = arith.constant 1.000000e+00 : f32
    %112 = vector.broadcast %cst_33 : f32 to vector<16x512xf32>
    %113 = arith.addf %112, %111 : vector<16x512xf32>
    %114 = arith.divf %112, %113 : vector<16x512xf32>
    %115 = arith.mulf %107, %114 : vector<16x512xf32>
    %116 = arith.truncf %115 : vector<16x512xf32> to vector<16x512xbf16>
    %c0_34 = arith.constant 0 : index
    %c0_35 = arith.constant 0 : index
    %c0_36 = arith.constant 0 : index
    %117 = vector.load %arg8[%c0_34, %c0_35, %c0_36] : memref<1x512x128xbf16, #tpu.memory_space<vmem>>, vector<1x512x128xbf16>
    %118 = vector.shape_cast %117 : vector<1x512x128xbf16> to vector<512x128xbf16>
    %cst_37 = arith.constant dense<0.000000e+00> : vector<16x128xf32>
    %119 = tpu.matmul %116, %118, %cst_37 {dimension_numbers = #tpu.dot_dimension_numbers<[1], [0], [0], [1], [0, 0, 1, 1], [], []>} : vector<16x512xbf16>, vector<512x128xbf16>, vector<16x128xf32> -> vector<16x128xf32>
    %120 = vector.broadcast %12 : vector<1x128xf32> to vector<16x128xf32>
    %121 = arith.addf %119, %120 : vector<16x128xf32>
    %122 = arith.addf %79, %121 : vector<16x128xf32>
    %c0_38 = arith.constant 0 : index
    %c0_39 = arith.constant 0 : index
    %123 = vector.load %arg12[%c0_38, %c0_39] : memref<16x128xf32, #tpu.memory_space<vmem>>, vector<16x128xf32>
    tpu.vector_store %arg12[%c0_38, %c0_39], %122 {strides = array<i32>} : memref<16x128xf32, #tpu.memory_space<vmem>>, vector<16x128xf32>,
    %c1_i32 = arith.constant 1 : i32
    %124 = arith.cmpi eq, %arg1, %c1_i32 : i32
    %125 = arith.extui %124 : i1 to i32
    %c0_i32_40 = arith.constant 0 : i32
    %126 = arith.cmpi ne, %125, %c0_i32_40 : i32
    scf.if %126 {
      %c0_41 = arith.constant 0 : index
      %c0_42 = arith.constant 0 : index
      %127 = vector.load %arg9[%c0_41, %c0_42] : memref<1x128xf32, #tpu.memory_space<vmem>>, vector<1x128xf32>
      %c0_43 = arith.constant 0 : index
      %c0_44 = arith.constant 0 : index
      %128 = vector.load %arg10[%c0_43, %c0_44] : memref<1x128xf32, #tpu.memory_space<vmem>>, vector<1x128xf32>
      %cst_45 = arith.constant dense<0.000000e+00> : vector<16xf32>
      %129 = vector.multi_reduction <add>, %122, %cst_45 [1] : vector<16x128xf32> to vector<16xf32>
      %130 = vector.shape_cast %129 : vector<16xf32> to vector<16x1xf32>
      %cst_46 = arith.constant 1.280000e+02 : f32
      %131 = vector.broadcast %cst_46 : f32 to vector<16x1xf32>
      %132 = arith.divf %130, %131 : vector<16x1xf32>
      %133 = vector.broadcast %132 : vector<16x1xf32> to vector<16x128xf32>
      %134 = arith.subf %122, %133 : vector<16x128xf32>
      %135 = arith.mulf %134, %134 : vector<16x128xf32>
      %cst_47 = arith.constant dense<0.000000e+00> : vector<16xf32>
      %136 = vector.multi_reduction <add>, %135, %cst_47 [1] : vector<16x128xf32> to vector<16xf32>
      %137 = vector.shape_cast %136 : vector<16xf32> to vector<16x1xf32>
      %cst_48 = arith.constant 1.280000e+02 : f32
      %138 = vector.broadcast %cst_48 : f32 to vector<16x1xf32>
      %139 = arith.divf %137, %138 : vector<16x1xf32>
      %140 = vector.broadcast %132 : vector<16x1xf32> to vector<16x128xf32>
      %141 = arith.subf %122, %140 : vector<16x128xf32>
      %cst_49 = arith.constant 9.99999974E-6 : f32
      %142 = vector.broadcast %cst_49 : f32 to vector<16x1xf32>
      %143 = arith.addf %139, %142 : vector<16x1xf32>
      %144 = math.rsqrt %143 : vector<16x1xf32>
      %145 = vector.broadcast %144 : vector<16x1xf32> to vector<16x128xf32>
      %146 = arith.mulf %141, %145 : vector<16x128xf32>
      %147 = vector.broadcast %127 : vector<1x128xf32> to vector<16x128xf32>
      %148 = arith.mulf %146, %147 : vector<16x128xf32>
      %149 = vector.broadcast %128 : vector<1x128xf32> to vector<16x128xf32>
      %150 = arith.addf %148, %149 : vector<16x128xf32>
      %151 = vector.shape_cast %150 : vector<16x128xf32> to vector<2x8x128xf32>
      %c0_50 = arith.constant 0 : index
      %c0_51 = arith.constant 0 : index
      %c0_52 = arith.constant 0 : index
      %152 = vector.load %arg11[%c0_50, %c0_51, %c0_52] : memref<2x8x128xf32, #tpu.memory_space<vmem>>, vector<2x8x128xf32>
      tpu.vector_store %arg11[%c0_50, %c0_51, %c0_52], %151 {strides = array<i32>} : memref<2x8x128xf32, #tpu.memory_space<vmem>>, vector<2x8x128xf32>,
    } else {
    }
    return
  }
  func.func @transform_0(%arg0: i32, %arg1: i32) -> (i32, i32, i32) {
    %c0_i32 = arith.constant 0 : i32
    %c0_i32_0 = arith.constant 0 : i32
    %c0_i32_1 = arith.constant 0 : i32
    return %arg0, %c0_i32, %c0_i32_0 : i32, i32, i32
  }
  func.func @transform_1(%arg0: i32, %arg1: i32) -> (i32, i32) {
    %c0_i32 = arith.constant 0 : i32
    %c0_i32_0 = arith.constant 0 : i32
    %c0_i32_1 = arith.constant 0 : i32
    return %c0_i32, %c0_i32_0 : i32, i32
  }
  func.func @transform_2(%arg0: i32, %arg1: i32) -> (i32, i32, i32) {
    %c0_i32 = arith.constant 0 : i32
    %c0_i32_0 = arith.constant 0 : i32
    %c0_i32_1 = arith.constant 0 : i32
    return %arg1, %c0_i32, %c0_i32_0 : i32, i32, i32
  }
  func.func @transform_3(%arg0: i32, %arg1: i32) -> (i32, i32, i32) {
    %c0_i32 = arith.constant 0 : i32
    %c0_i32_0 = arith.constant 0 : i32
    %c0_i32_1 = arith.constant 0 : i32
    return %arg1, %c0_i32, %c0_i32_0 : i32, i32, i32
  }
  func.func @transform_4(%arg0: i32, %arg1: i32) -> (i32, i32, i32) {
    %c0_i32 = arith.constant 0 : i32
    %c0_i32_0 = arith.constant 0 : i32
    %c0_i32_1 = arith.constant 0 : i32
    return %arg1, %c0_i32, %c0_i32_0 : i32, i32, i32
  }
  func.func @transform_5(%arg0: i32, %arg1: i32) -> (i32, i32, i32) {
    %c0_i32 = arith.constant 0 : i32
    %c0_i32_0 = arith.constant 0 : i32
    %c0_i32_1 = arith.constant 0 : i32
    return %arg1, %c0_i32, %c0_i32_0 : i32, i32, i32
  }
  func.func @transform_6(%arg0: i32, %arg1: i32) -> (i32, i32, i32) {
    %c0_i32 = arith.constant 0 : i32
    %c0_i32_0 = arith.constant 0 : i32
    %c0_i32_1 = arith.constant 0 : i32
    return %arg1, %c0_i32, %c0_i32_0 : i32, i32, i32
  }
  func.func @transform_7(%arg0: i32, %arg1: i32) -> (i32, i32) {
    %c0_i32 = arith.constant 0 : i32
    %c0_i32_0 = arith.constant 0 : i32
    %c0_i32_1 = arith.constant 0 : i32
    return %c0_i32, %c0_i32_0 : i32, i32
  }
  func.func @transform_8(%arg0: i32, %arg1: i32) -> (i32, i32) {
    %c0_i32 = arith.constant 0 : i32
    %c0_i32_0 = arith.constant 0 : i32
    %c0_i32_1 = arith.constant 0 : i32
    return %c0_i32, %c0_i32_0 : i32, i32
  }
  func.func @transform_9(%arg0: i32, %arg1: i32) -> (i32, i32, i32) {
    %c0_i32 = arith.constant 0 : i32
    %c0_i32_0 = arith.constant 0 : i32
    %c0_i32_1 = arith.constant 0 : i32
    return %arg0, %c0_i32, %c0_i32_0 : i32, i32, i32
  }
}

</mosaic_0001>

<bundles_post_ra>
// kernel: frozen_clip_embedder_forward.3
= control target key start
LH: loop header
LB: loop body
LE: loop exit
PB: predicated region body
PF: predicated region fallthrough
CT: control target
= control target key end

     0   :  { %v161_v2 = vmov 0   ;;  %s208_s0 = inlined_call_operand.vmem [shape: f32[4,8,128], index: 0, kind: input, shape index: {}]   ;;  %s209_s1 = inlined_call_operand.vmem [shape: f32[4,8,1], index: 1, kind: input, shape index: {}]   ;;  %s210_s2 = inlined_call_operand.hbm [shape: f32[4,8,128], index: 2, kind: output, shape index: {}]  }
   0x1   :  { %v18_v0 = vld [vmem:[%s209_s1 + $0x10] sm:$0xff]  ;;  %v16_v1 = vld [vmem:[%s209_s1] sm:$0xff]  ;;  %130 = vset.pattern.permute.xlu1 %v161_v2  ;;  %129 = vset.pattern.permute.xlu0 %v161_v2 }
   0x2   :  { %7 = vsyncpa [#allocation3], 0  ;;  %53 = vperm.xlu1 %130, %v18_v0   ;;  %43 = vperm.xlu0 %129, %v16_v1   ;;  %v19_v3 = vld [vmem:[%s209_s1 + $0x18] sm:$0xff]  ;;  %v17_v4 = vld [vmem:[%s209_s1 + $0x8] sm:$0xff]  ;;  %v162_v37 = vmov 4096.0   ;;  %s163_s25 = smov [#allocation2]  }
   0x3   :  { %v12_v5 = vld [vmem:[%s208_s0] sm:$0xff]  ;;  %v13_v6 = vld [vmem:[%s208_s0 + $0x8] sm:$0xff]  ;;  %v14_v8 = vld [vmem:[%s208_s0 + $0x10] sm:$0xff]  ;;  %131 = vrcp.f32 %v162_v37  ;;  %s106_s26 = sshll.u32 %s163_s25, 4  ;;  %s108_s29 = sshll.u32 %s210_s2, 4  ;;  %s107_s26 = int_to_ptr.vmem [resolvable:$true] %s106_s26  ;;  %s109_s29 = int_to_ptr.hbm [resolvable:$true] %s108_s29 }
   0x4   :  { %v20_v7 = vadd.f32 %v13_v6, %v12_v5  ;;  %v15_v10 = vld [vmem:[%s208_s0 + $0x18] sm:$0xff]  ;;  %s164_s30 = smov 128   ;;  %s165_s3 = smov 8  }
   0x6   :  { %v21_v9 = vadd.f32 %v20_v7, %v14_v8 }
   0x8   :  { %v22_v11 = vadd.f32 %v21_v9, %v15_v10 }
   0x9   :  { %v132_v38 = vpop.eup %131 }
   0xa   :  { %58 = vperm.xlu1 %130, %v19_v3   ;;  %48 = vperm.xlu0 %129, %v17_v4   ;;  %v34_v39 = vmul.f32 4096.0, %v132_v38  ;;  %vm38_vm0 = vweird.f32 %v132_v38 }
   0xb   :  { %23 = vadd.xlane.f32.xlu2 %v22_v11 }
   0xc   :  { %v35_v40 = vsub.f32 1.0, %v34_v39 }
   0xe   :  { %v36_v41 = vmul.f32 %v132_v38, %v35_v40 }
  0x10   :  { %v37_v42 = vadd.f32 %v132_v38, %v36_v41 }
  0x12   :  { %v39_v43 = vsel %vm38_vm0, %v132_v38, %v37_v42 }
  0x74   :  { %v54_v12 = vpop.permute.xlu1 %53  ;;  %v44_v13 = vpop.permute.xlu0 %43 }
  0x75   :  { %v61_v15 = vmul.f32 %v44_v13, %v12_v5  ;;  %v63_v18 = vmul.f32 %v54_v12, %v14_v8 }
  0x7c   :  { %v49_v14 = vpop.permute.xlu0 %48  ;;  %v59_v17 = vpop.permute.xlu1 %58 }
  0x7d   :  { %v62_v16 = vmul.f32 %v49_v14, %v13_v6  ;;  %v64_v20 = vmul.f32 %v59_v17, %v15_v10 }
  0x7e   :  { %v24_v23 = vpop.xlane.xlu2 %23 }
  0x7f   :  { %v65_v19 = vadd.f32 %v62_v16, %v61_v15  ;;  %v25_v24 = vrot.slane %v24_v23, 4 }
  0x81   :  { %v66_v21 = vadd.f32 %v65_v19, %v63_v18  ;;  %v26_v25 = vadd.f32 %v25_v24, %v24_v23 }
  0x83   :  { %v67_v22 = vadd.f32 %v66_v21, %v64_v20  ;;  %v27_v26 = vrot.slane %v26_v25, 2 }
  0x85   :  { %68 = vadd.xlane.f32.xlu2 %v67_v22  ;;  %v28_v27 = vadd.f32 %v27_v26, %v26_v25 }
  0x87   :  { %v29_v28 = vrot.slane %v28_v27, 1 }
  0x89   :  { %v30_v29 = vadd.f32 %v29_v28, %v28_v27 }
  0x8b   :  { %120 = vpush %v30_v29 }
  0xbc   :  { %s121_s0 = spop %120 }
  0xbd   :  { %v32_v52 = vstv %s121_s0 }
  0xbe   :  { %v40_v55 = vmul.f32 %v39_v43, %v32_v52 }
  0xf8   :  { %v69_v30 = vpop.xlane.xlu2 %68 }
  0xf9   :  { %v70_v31 = vrot.slane %v69_v30, 4 }
  0xfb   :  { %v71_v32 = vadd.f32 %v70_v31, %v69_v30 }
  0xfd   :  { %v72_v33 = vrot.slane %v71_v32, 2 }
  0xff   :  { %v73_v34 = vadd.f32 %v72_v33, %v71_v32 }
 0x101   :  { %v74_v35 = vrot.slane %v73_v34, 1 }
 0x103   :  { %v75_v36 = vadd.f32 %v74_v35, %v73_v34 }
 0x105   :  { %122 = vpush %v75_v36 }
 0x136   :  { %s123_s1 = spop %122 }
 0x137   :  { %v77_v44 = vstv %s123_s1 }
 0x138   :  { %v78_v45 = vmul.f32 %v77_v44, %v39_v43 }
 0x13a   :  { %133 = vrcp.f32 %v78_v45  ;;  %v90_v49 = vand.u32 2147483648, %v78_v45  ;;  %v88_v51 = vand.u32 2147483647, %v78_v45  ;;  %vm84_vm2 = vweird.f32 %v78_v45 }
 0x13c   :  { %v91_v54 = vor.u32 1.1754944e-38, %v90_v49  ;;  %vm89_vm4 = vcmp.eq.f32.partialorder %v88_v51, 8.507059e+37 }
 0x140   :  { %v134_v46 = vpop.eup %133 }
 0x141   :  { %v80_v47 = vmul.f32 %v134_v46, %v78_v45  ;;  %vm85_vm1 = vweird.f32 %v134_v46 }
 0x142   :  { %vm86_vm3 = vmor %vm84_vm2, %vm85_vm1 }
 0x143   :  { %v81_v48 = vsub.f32 1.0, %v80_v47 }
 0x145   :  { %v82_v50 = vmul.f32 %v134_v46, %v81_v48 }
 0x147   :  { %v83_v53 = vadd.f32 %v134_v46, %v82_v50 }
 0x149   :  { %v87_v56 = vsel %vm86_vm3, %v134_v46, %v83_v53 }
 0x14a   :  { %v92_v57 = vsel %vm89_vm4, %v91_v54, %v87_v56 }
 0x14b   :  { %v93_v58 = vmul.f32 %v92_v57, %v40_v55 }
 0x14d   :  { %v94_v59 = vmul.f32 %v93_v58, %v61_v15  ;;  %v95_v60 = vmul.f32 %v93_v58, %v62_v16  ;;  %v96_v61 = vmul.f32 %v93_v58, %v63_v18  ;;  %v97_v62 = vmul.f32 %v93_v58, %v64_v20 }
 0x14f   :  { %98 = vst [vmem:[#allocation2] sm:$0xff] %v94_v59 }
 0x150   :  { %99 = vst [vmem:[#allocation2 + $0x8] sm:$0xff] %v95_v60 }
 0x151   :  { %100 = vst [vmem:[#allocation2 + $0x10] sm:$0xff] %v96_v61 }
 0x152   :  { %101 = vst [vmem:[#allocation2 + $0x18] sm:$0xff] %v97_v62 }
 0x153   :  { %114 = dma.vmem_to_hbm [thread:$0]  %s107_s26, 512, %s109_s29, [#allocation3], %s164_s30, %s164_s30, %s165_s3  }
 0x154   :  { %159 = dma.done.wait [#allocation3], 512  }
 0x155   :  { %160 = vsyncadd [#allocation3], 4294966784 }
 0x156   :  { %119 = vsyncpa [#allocation3], 1 }

// kernel: frozen_clip_embedder_forward.2
= control target key start
LH: loop header
LB: loop body
LE: loop exit
PB: predicated region body
PF: predicated region fallthrough
CT: control target
= control target key end

     0   :  { %s5315_s0 = inlined_call_operand.vmem [shape: f32[4,8,128], index: 0, kind: input, shape index: {}]   ;;  %s5316_s1 = inlined_call_operand.vmem [shape: f32[16,16], index: 1, kind: input, shape index: {}]   ;;  %s5317_s2 = inlined_call_operand.vmem [shape: f32[2,8,512], index: 2, kind: input, shape index: {}]   ;;  %s5318_s3 = inlined_call_operand.hbm [shape: bf16[2,128,384], index: 3, kind: input, shape index: {}]   ;;  %s5319_s4 = inlined_call_operand.vmem [shape: bf16[2,128,128], index: 4, kind: input, shape index: {}]   ;;  %s5320_s5 = inlined_call_operand.hbm [shape: bf16[2,128,512], index: 5, kind: input, shape index: {}]   ;;  %s5321_s6 = inlined_call_operand.hbm [shape: bf16[2,512,128], index: 6, kind: input, shape index: {}]   ;;  %s5322_s7 = inlined_call_operand.vmem [shape: f32[1,128], index: 7, kind: input, shape index: {}]   ;;  %s5323_s8 = inlined_call_operand.vmem [shape: f32[1,128], index: 8, kind: input, shape index: {}]   ;;  %s5324_s9 = inlined_call_operand.vmem [shape: f32[4,8,128], index: 9, kind: output, shape index: {}]  }
   0x1   :  { %5329 = sst [smem:[#allocation15_spill]] %s5320_s5 }
   0x2   :  { %5330 = sst [smem:[#allocation16_spill]] %s5321_s6 }
   0x3   :  { %5331 = sst [smem:[#allocation17_spill]] %s5322_s7 }
   0x4   :  { %5332 = sst [smem:[#allocation18_spill]] %s5323_s8 }
   0x5   :  { %14 = vsyncpa [#allocation4], 0 }
   0x6   :  { %16 = vsyncpa [#allocation4 + $0x1], 0 }
   0x7   :  { %17 = vsyncpa [#allocation6], 0 }
   0x8   :  { %19 = vsyncpa [#allocation6 + $0x1], 0  ;;  %s4191_s30 = smov 0   ;;  %s4193_s10 = smov 0  }
   0x9   :  { %s4195_s11 = smov 0   ;;  %s4197_s12 = smov 0  }
   0xa   :  { %s4199_s13 = smov 0   ;;  %s4201_s14 = smov 0  }
   0xb   :  { %s4203_s15 = smov 0   ;;  %s4205_s16 = smov 0  }
   0xc LB: > { %5333 = sst [smem:[#allocation10_spill]] %s4107_s11  ;;  %s5325_s17 = sadd.s32 4294967295, %s4127_s16   ;;  %s4127_s16 = sphi %s4205_s16, %s25_s16   ;;  %s4123_s15 = sphi %s4203_s15, %s5364_s15   ;;  %s4119_s14 = sphi %s4201_s14, %s5368_s14   ;;  %s4115_s13 = sphi %s4199_s13, %s5362_s13   ;;  %s4111_s12 = sphi %s4197_s12, %s5367_s12   ;;  %s4107_s11 = sphi %s4195_s11, %s5361_s11   ;;  %s4103_s10 = sphi %s4193_s10, %s5366_s10   ;;  %s4099_s30 = sphi %s4191_s30, %s5365_s30  }
   0xd   : > { %5334 = sst [smem:[#allocation11_spill]] %s4123_s15  ;;  %s34_s18 = sadd.s32 1, %s4119_s14 }
   0xe   : > { %p35_p0 = scmp.ge.s32.totalorder %s34_s18, 2  ;;  %s37_s19 = sadd.s32 1, %s4123_s15 }
   0xf   : > { %s117_s20 = sadd.s32 1, %s4107_s11  ;;  %p124_p1 = scmp.ne.s32.totalorder %s4107_s11, %s4103_s10 }
  0x10   : > { %s5370_s18 = smov (%p35_p0, %s34_s18), 0  ;;  %s5372_s19 = smov (!%p35_p0, %s37_s19), %s4123_s15 }
  0x11   : > { %5335 = sst [smem:[#allocation12_spill]] %s5370_s18  ;;  %s114_s21 = ssub.s32 %s4119_s14, %s5370_s18 }
  0x12   : > { %p125_p2 = scmp.eq.s32.totalorder %s4127_s16, 0  ;;  %p39_p3 = scmp.ge.s32.totalorder %s5372_s19, 2 }
  0x13   : > { %p115_p4 = scmp.eq.s32.totalorder %s114_s21, 0  ;;  %p130_p6 = scmp.ne.s32.totalorder %s4103_s10, %s4099_s30 }
  0x14   : > { %p126_p5 = por %p125_p2, %p124_p1  ;;  %s5374_s19 = smov (%p39_p3, %s5372_s19), 0 }
  0x15   : > { %5336 = sst [smem:[#allocation13_spill]] %s5374_s19  ;;  %p131_p7 = scmp.eq.s32.totalorder %s5325_s17, 0 }
  0x16   : > { %s4245_s22 = scalar_select %p115_p4, %s4107_s11, %s117_s20  }
  0x17   : > { %p3745_p8 = scmp.lt.s32.totalorder %s4127_s16, 4  ;;  %s4251_s23 = sand.u32 1, %s4107_s11  }
  0x18   : > { %5337 = sst [smem:[#allocation14_spill]] %s4245_s22  ;;  %p4253_p9 = por %p131_p7, %p130_p6 }
  0x19   : > { %s356_s25 = sand.u32 1, %s4127_s16   ;;  %p4258_p10 = pnand %p3745_p8, %p126_p5 }
  0x1a   : > { %s3205_s27 = sshll.u32 %s4251_s23, 8  ;;  %s3626_s28 = sshll.u32 %s4119_s14, 8 }
  0x1b   : > { %s5340_s5 = sld [smem:[#allocation15_spill]]  ;;  %s360_s21 = scalar_lea.vmem [#allocation5], %s3205_s27 }
  0x1c   : > { %s368_s17 = sshll.u32 %s360_s21, 4  ;;  %s4267_s18 = scalar_lea.sflag [#allocation6], %s356_s25  ;;  %s369_s17 = int_to_ptr.vmem [resolvable:$true] %s368_s17 }
  0x1d   : > { %s4129_s15 = smov 256   ;;  %s4130_s22 = smov 16  }
  0x1e   : > { %s5341_s6 = sld [smem:[#allocation16_spill]]  ;;  %s382_s30 = scalar_lea.vmem [#allocation7], %s3205_s27 }
  0x1f   : > { %p3211_p11 = scmp.ge.s32.totalorder %s4127_s16, 1  ;;  %p398_p12 = scmp.lt.s32.totalorder %s4127_s16, 5 }
  0x20   : > { %s4134_s7 = smov 4  }
  0x21   : > { %s365_s20 = scalar_lea.hbm %s5340_s5, %s3626_s28  ;;  %s390_s5 = sshll.u32 %s382_s30, 4  ;;  %s391_s5 = int_to_ptr.vmem [resolvable:$true] %s390_s5 }
  0x22   : > { %s366_s19 = sshll.u32 %s365_s20, 4  ;;  %p4277_p13 = pnand %p3211_p11, %p398_p12  ;;  %s367_s19 = int_to_ptr.hbm [resolvable:$true] %s366_s19 }
  0x23   : > { %3741 = dma.hbm_to_vmem [thread:$0]  (!%p4258_p10), %s367_s19, 4096, %s369_s17, %s4267_s18, %s4129_s15, %s4129_s15, %s4130_s22  }
  0x24   : > { %s387_s29 = scalar_lea.hbm %s5341_s6, %s3626_s28  ;;  %s3726_s15 = smul.u32 192, %s4251_s23 }
  0x25   : > { %s388_s21 = sshll.u32 %s387_s29, 4  ;;  %s3727_s17 = smul.u32 192, %s4119_s14  ;;  %s389_s21 = int_to_ptr.hbm [resolvable:$true] %s388_s21 }
  0x26   : > { %s330_s22 = scalar_lea.vmem [#allocation3], %s3726_s15  ;;  %s327_s20 = scalar_lea.sflag [#allocation4], %s4251_s23 }
  0x27   : > { %s335_s11 = scalar_lea.hbm %s5318_s3, %s3727_s17  ;;  %s338_s27 = sshll.u32 %s330_s22, 4  ;;  %s339_s27 = int_to_ptr.vmem [resolvable:$true] %s338_s27 }
  0x28   : > { %s336_s28 = sshll.u32 %s335_s11, 4  ;;  %s4131_s29 = smov 192   ;;  %s337_s28 = int_to_ptr.hbm [resolvable:$true] %s336_s28 }
  0x29   : > { %s4132_s30 = smov 12   ;;  %s4133_s6 = smov 64  }
  0x2a   : > { %3738 = dma.hbm_to_vmem [thread:$0]  (!%p4258_p10), %s337_s28, 3072, %s339_s27, %s327_s20, %s4131_s29, %s4131_s29, %s4132_s30  }
  0x2b   : > { %3744 = dma.hbm_to_vmem [thread:$0]  (!%p4258_p10), %s389_s21, 4096, %s391_s5, %s4267_s18, %s4133_s6, %s4133_s6, %s4134_s7  }
  0x2c   : > { %402 = sbr.rel (%p4277_p13) target bundleno = 2412 (0x96c), region = 56  ;;  %s404_s17 = sand.u32 (!%p4277_p13), 1, %s4103_s10  }
  0x2d   : > { %s3728_s15 = smul.u32 (!%p4277_p13), 192, %s404_s17  ;;  %s405_s19 = scalar_lea.sflag (!%p4277_p13), [#allocation4], %s404_s17 }
  0x2f   : > { %s4295_s8 = scalar_lea.vmem (!%p4277_p13), [#allocation3], %s3728_s15 }
  0x31   : > { %4090 = dma.done.wait (%p4253_p9), %s405_s19, 3072  }
  0x32   : > { %4092 = vsyncadd (%p4253_p9), %s405_s19, 4294964224  ;;  %s5343_s23 = sadd.s32 4294967295, %s4127_s16   ;;  %s3212_s5 = sshll.u32 %s404_s17, 8 }
  0x33   : > { %s414_s26 = sand.u32 1, %s5343_s23   ;;  %s4303_s7 = scalar_lea.vmem [#allocation5], %s3212_s5 }
  0x34   : > { %s415_s6 = scalar_lea.sflag [#allocation6], %s414_s26 }
  0x35   : > { %4094 = dma.done.wait (%p4253_p9), %s415_s6, 8192  }
  0x36   : > { %4096 = vsyncadd (%p4253_p9), %s415_s6, 4294959104  ;;  %s3214_s18 = sshll.u32 %s4115_s13, 1  ;;  %p495_p1 = scmp.lt.s32.totalorder %s4111_s12, 1 }
  0x37   : > { %p490_p0 = scmp.lt.s32.totalorder %s3214_s18, 3  ;;  %s4330_s6 = scalar_lea.vmem [#allocation7], %s3212_s5 }
  0x38   : > { %s496_s21 = scalar_select %p495_p1, %s4111_s12, 1 }
  0x39   : > { %s5376_s18 = smov (!%p490_p0, %s3214_s18), 3  ;;  %p3222_p2 = scmp.ne.s32.totalorder %s4111_s12, 0 }
  0x3a   : > { %s3215_s25 = sshll.u32 %s5376_s18, 3  ;;  %s3628_s28 = sshll.u32 %s496_s21, 5 }
  0x3b   : > { %s493_s27 = scalar_lea.vmem %s5315_s0, %s3215_s25  ;;  %s4318_s30 = scalar_lea.vmem %s5317_s2, %s3628_s28 }
  0x3c   : > { %s3629_s24 = sshll.u32 %s496_s21, 6  ;;  %s4328_s26 = scalar_lea.vmem %s5324_s9, %s3215_s25 }
  0x3d   : > { %s4323_s13 = scalar_lea.vmem %s5319_s4, %s3629_s24  ;;  %515 = sbr.rel (%p3222_p2) target bundleno = 69 (0x45), region = 72 }
  0x42   : > { %v516_v0 = vld [vmem:[%s493_s27] sm:$0xff]  ;;  %v517_v1 = vld [vmem:[%s493_s27 + $0x8] sm:$0xff] }
  0x43   : > { %518 = vst [vmem:[#allocation2] sm:$0xff] %v516_v0 }
  0x44   : > { %519 = vst [vmem:[#allocation2 + $0x8] sm:$0xff] %v517_v1 }
  0x45 PF: > { %v4135_v4 = vmov 128.0   ;;  %v3309_v19 = vld [vmem:[%s4295_s8 + $0xa8] sm:$0xf]  ;;  %v3652_v20 = vld [vmem:[%s4295_s8 + $0xb0] sm:$0xf0]  ;;  %s4137_s5 = smov 96  }
  0x46   : > { %3882 = vrcp.f32 %v4135_v4  ;;  %v3651_v21 = vld [vmem:[%s4295_s8 + $0xac] sm:$0xf]  ;;  %v3310_v22 = vor.u32 %v3652_v20, %v3309_v19  ;;  %v3311_v23 = vld [vmem:[%s4295_s8 + $0xb4] sm:$0xf0]  ;;  %v3317_v24 = vld [vmem:[%s4295_s8 + $0xb0] sm:$0xf] }
  0x47   : > { %v3653_v25 = vld [vmem:[%s4295_s8 + $0xb8] sm:$0xf0]  ;;  %v3314_v26 = vor.u32 %v3651_v21, %v3311_v23  ;;  %v3297_v28 = vld [vmem:[%s4295_s8 + $0x90] sm:$0xf]  ;;  %v3648_v30 = vld [vmem:[%s4295_s8 + $0x94] sm:$0xf] }
  0x48   : > { %v3318_v27 = vor.u32 %v3653_v25, %v3317_v24  ;;  %743 = vmatpush.bf16.msra.mxu0 %v3310_v22  ;;  %v3649_v29 = vld [vmem:[%s4295_s8 + $0x98] sm:$0xf0]  ;;  %v3299_v32 = vld [vmem:[%s4295_s8 + $0x9c] sm:$0xf0]  ;;  %v3305_v33 = vld [vmem:[%s4295_s8 + $0x98] sm:$0xf] }
  0x49   : > { %757 = vmatpush.bf16.msra.mxu1 %v3314_v26  ;;  %v3298_v31 = vor.u32 %v3649_v29, %v3297_v28  ;;  %v3650_v34 = vld [vmem:[%s4295_s8 + $0xa0] sm:$0xf0]  ;;  %v3302_v35 = vor.u32 %v3648_v30, %v3299_v32  ;;  %v3285_v37 = vld [vmem:[%s4295_s8 + $0x78] sm:$0xf]  ;;  %v3645_v39 = vld [vmem:[%s4295_s8 + $0x7c] sm:$0xf] }
  0x4a   : > { %v524_v2 = vld [vmem:[#allocation2] sm:$0xff]  ;;  %771 = vmatpush.bf16.msra.mxu2 %v3318_v27  ;;  %v3306_v36 = vor.u32 %v3650_v34, %v3305_v33  ;;  %v3646_v38 = vld [vmem:[%s4295_s8 + $0x80] sm:$0xf0]  ;;  %v3287_v41 = vld [vmem:[%s4295_s8 + $0x84] sm:$0xf0]  ;;  %s4138_s18 = smov 64  }
  0x4b   : > { %526 = vadd.xlane.f32.xlu0 %v524_v2  ;;  %v525_v3 = vld [vmem:[#allocation2 + $0x8] sm:$0xff]  ;;  %v3286_v40 = vor.u32 %v3646_v38, %v3285_v37  ;;  %v3293_v42 = vld [vmem:[%s4295_s8 + $0x80] sm:$0xf]  ;;  %v3647_v43 = vld [vmem:[%s4295_s8 + $0x88] sm:$0xf0]  ;;  %v3290_v44 = vor.u32 %v3645_v39, %v3287_v41  ;;  %vm806_vm7 = vcmask 1047556  }
  0x4c   : > { %v3883_v5 = vpop.eup %3882  ;;  %744 = vmatpush.bf16.msra.mxu0 %v3298_v31  ;;  %v3294_v45 = vor.u32 %v3647_v43, %v3293_v42  ;;  %v3273_v46 = vld [vmem:[%s4295_s8 + $0x60] sm:$0xf]  ;;  %v3643_v47 = vld [vmem:[%s4295_s8 + $0x68] sm:$0xf0]  ;;  %v3642_v48 = vld [vmem:[%s4295_s8 + $0x64] sm:$0xf] }
  0x4d   : > { %v531_v6 = vmul.f32 128.0, %v3883_v5  ;;  %vm535_vm0 = vweird.f32 %v3883_v5  ;;  %758 = vmatpush.bf16.msra.mxu1 %v3302_v35  ;;  %v3274_v49 = vor.u32 %v3643_v47, %v3273_v46  ;;  %v3275_v50 = vld [vmem:[%s4295_s8 + $0x6c] sm:$0xf0]  ;;  %v3281_v51 = vld [vmem:[%s4295_s8 + $0x68] sm:$0xf]  ;;  %vm1542_vm8 = vcmask 261120  }
  0x4e   : > { %772 = vmatpush.bf16.msra.mxu2 %v3306_v36  ;;  %v3644_v52 = vld [vmem:[%s4295_s8 + $0x70] sm:$0xf0]  ;;  %v3278_v53 = vor.u32 %v3642_v48, %v3275_v50  ;;  %v3261_v55 = vld [vmem:[%s4295_s8 + $0x48] sm:$0xf]  ;;  %v3639_v57 = vld [vmem:[%s4295_s8 + $0x4c] sm:$0xf] }
  0x4f   : > { %v532_v7 = vsub.f32 1.0, %v531_v6  ;;  %v3282_v54 = vor.u32 %v3644_v52, %v3281_v51  ;;  %v3640_v56 = vld [vmem:[%s4295_s8 + $0x50] sm:$0xf0]  ;;  %v3263_v59 = vld [vmem:[%s4295_s8 + $0x54] sm:$0xf0]  ;;  %vm1653_vm9 = vcmask 130048  }
  0x50   : > { %745 = vmatpush.bf16.msra.mxu0 %v3286_v40  ;;  %v3262_v58 = vor.u32 %v3640_v56, %v3261_v55  ;;  %v3269_v60 = vld [vmem:[%s4295_s8 + $0x50] sm:$0xf]  ;;  %v3641_v61 = vld [vmem:[%s4295_s8 + $0x58] sm:$0xf0]  ;;  %v3266_v62 = vor.u32 %v3639_v57, %v3263_v59  ;;  %v3251_v4 = vld [vmem:[%s4295_s8 + $0x3c] sm:$0xf0] }
  0x51   : > { %v533_v8 = vmul.f32 %v3883_v5, %v532_v7  ;;  %759 = vmatpush.bf16.msra.mxu1 %v3290_v44  ;;  %v3270_v63 = vor.u32 %v3641_v61, %v3269_v60  ;;  %v3249_v0 = vld [vmem:[%s4295_s8 + $0x30] sm:$0xf]  ;;  %v3637_v1 = vld [vmem:[%s4295_s8 + $0x38] sm:$0xf0]  ;;  %v3638_v6 = vld [vmem:[%s4295_s8 + $0x40] sm:$0xf0] }
  0x52   : > { %773 = vmatpush.bf16.msra.mxu2 %v3294_v45  ;;  %v3225_v21 = vld [vmem:[%s4295_s8] sm:$0xf]  ;;  %v3631_v22 = vld [vmem:[%s4295_s8 + $0x8] sm:$0xf0]  ;;  %v3630_v23 = vld [vmem:[%s4295_s8 + $0x4] sm:$0xf] }
  0x53   : > { %528 = vadd.xlane.f32.xlu0 %v525_v3  ;;  %v534_v9 = vadd.f32 %v3883_v5, %v533_v8  ;;  %v3226_v25 = vor.u32 %v3631_v22, %v3225_v21  ;;  %v3227_v26 = vld [vmem:[%s4295_s8 + $0xc] sm:$0xf0]  ;;  %v3233_v27 = vld [vmem:[%s4295_s8 + $0x8] sm:$0xf]  ;;  %v3632_v28 = vld [vmem:[%s4295_s8 + $0x10] sm:$0xf0] }
  0x54   : > { %746 = vmatpush.bf16.msra.mxu0 %v3274_v49  ;;  %v3230_v30 = vor.u32 %v3630_v23, %v3227_v26  ;;  %v3234_v31 = vor.u32 %v3632_v28, %v3233_v27  ;;  %v520_v47 = vld [vmem:[%s4318_s30] sm:$0xff]  ;;  %vm2108_vm10 = vcmask 523264   ;;  %vm2111_vm11 = vcmask 785408   ;;  %p3623_p3 = scmp.ne.s32.totalorder %s4111_s12, 1 }
  0x55   : > { %v4333_v10 = vsel %vm535_vm0, %v3883_v5, %v534_v9  ;;  %760 = vmatpush.bf16.msra.mxu1 %v3278_v53  ;;  %v3257_v5 = vld [vmem:[%s4295_s8 + $0x38] sm:$0xf]  ;;  %v573_v50 = vperm.slane %v520_v47, 0  ;;  %v576_v55 = vperm.slane %v520_v47, 1  ;;  %s5358_s27 = sld [smem:[#allocation17_spill]] (!%p3623_p3) }
  0x56   : > { %774 = vmatpush.bf16.msra.mxu2 %v3282_v54  ;;  %v3258_v8 = vor.u32 %v3638_v6, %v3257_v5  ;;  %v3237_v9 = vld [vmem:[%s4295_s8 + $0x18] sm:$0xf]  ;;  %s5359_s29 = sld [smem:[#allocation18_spill]] (!%p3623_p3) }
  0x58   : > { %747 = vmatpush.bf16.msra.mxu0 %v3262_v58 }
  0x59   : > { %761 = vmatpush.bf16.msra.mxu1 %v3266_v62  ;;  %v612_v62 = vperm.slane %v520_v47, 2 }
  0x5a   : > { %775 = vmatpush.bf16.msra.mxu2 %v3270_v63 }
  0x5e   : > { %776 = vmatpush.bf16.msra.mxu2 %v3258_v8 }
  0xbe   : > { %v527_v11 = vpop.xlane.xlu0 %526 }
  0xbf   : > { %v537_v12 = vmul.f32 %v4333_v10, %v527_v11  ;;  %v3634_v11 = vld [vmem:[%s4295_s8 + $0x20] sm:$0xf0] }
  0xc1   : > { %v4336_v13 = vsub.f32 %v524_v2, %v537_v12  ;;  %v3636_v2 = vld [vmem:[%s4295_s8 + $0x34] sm:$0xf]  ;;  %v3633_v12 = vld [vmem:[%s4295_s8 + $0x1c] sm:$0xf] }
  0xc2   : > { %v3254_v7 = vor.u32 %v3636_v2, %v3251_v4 }
  0xc3   : > { %v541_v14 = vmul.f32 %v4336_v13, %v4336_v13 }
  0xc4   : > { %762 = vmatpush.bf16.msra.mxu1 %v3254_v7 }
  0xc5   : > { %543 = vadd.xlane.f32.xlu1 %v541_v14  ;;  %v3238_v14 = vor.u32 %v3634_v11, %v3237_v9 }
  0xc6   : > { %v529_v15 = vpop.xlane.xlu0 %528 }
  0xc7   : > { %v538_v16 = vmul.f32 %v4333_v10, %v529_v15  ;;  %v3239_v15 = vld [vmem:[%s4295_s8 + $0x24] sm:$0xf0] }
  0xc8   : > { %v3242_v19 = vor.u32 %v3633_v12, %v3239_v15  ;;  %v4139_v12 = vmov 1983009808  }
  0xc9   : > { %v4341_v17 = vsub.f32 %v525_v3, %v538_v16  ;;  %v3250_v3 = vor.u32 %v3637_v1, %v3249_v0  ;;  %v3245_v16 = vld [vmem:[%s4295_s8 + $0x20] sm:$0xf] }
  0xca   : > { %763 = vmatpush.bf16.msra.mxu1 %v3242_v19 }
  0xcb   : > { %v542_v18 = vmul.f32 %v4341_v17, %v4341_v17  ;;  %748 = vmatpush.bf16.msra.mxu0 %v3250_v3 }
  0xcd   : > { %545 = vadd.xlane.f32.xlu1 %v542_v18  ;;  %v3635_v18 = vld [vmem:[%s4295_s8 + $0x28] sm:$0xf0]  ;;  %s4136_s8 = smov 32  }
  0xce   : > { %v3246_v20 = vor.u32 %v3635_v18, %v3245_v16  ;;  %764 = vmatpush.bf16.msra.mxu1 %v3230_v30 }
  0xcf   : > { %749 = vmatpush.bf16.msra.mxu0 %v3238_v14  ;;  %v811_v14 = vunpack.c.l.s4 %v4139_v12 }
  0xd0   : > { %777 = vmatpush.bf16.msra.mxu2 %v3246_v20 }
  0xd1   : > { %v4407_v19 = vunpack.c.0.s8 %v811_v14 }
  0xd3   : > { %750 = vmatpush.bf16.msra.mxu0 %v3226_v25 }
  0xd4   : > { %778 = vmatpush.bf16.msra.mxu2 %v3234_v31 }
 0x138   : > { %v544_v24 = vpop.xlane.xlu1 %543 }
 0x139   : > { %v547_v29 = vmul.f32 %v544_v24, %v4333_v10 }
 0x13b   : > { %v549_v32 = vadd.f32 1e-05, %v547_v29 }
 0x13d   : > { %3884 = vrsqrt.f32 %v549_v32  ;;  %vm557_vm2 = vweird.f32 %v549_v32 }
 0x140   : > { %v546_v33 = vpop.xlane.xlu1 %545 }
 0x141   : > { %v548_v34 = vmul.f32 %v546_v33, %v4333_v10  ;;  %v4140_v33 = vmov 1934713408  }
 0x143   : > { %v3885_v35 = vpop.eup %3884  ;;  %v550_v36 = vadd.f32 1e-05, %v548_v34  ;;  %v835_v34 = vunpack.c.l.s4 %v4140_v33 }
 0x144   : > { %v552_v37 = vmul.f32 %v3885_v35, %v549_v32  ;;  %vm558_vm1 = vweird.f32 %v3885_v35 }
 0x145   : > { %3886 = vrsqrt.f32 %v550_v36  ;;  %vm559_vm3 = vmor %vm557_vm2, %vm558_vm1  ;;  %vm567_vm5 = vweird.f32 %v550_v36 }
 0x146   : > { %v553_v38 = vmul.f32 %v3885_v35, %v552_v37 }
 0x148   : > { %v554_v39 = vmul.f32 0.5, %v553_v38 }
 0x14a   : > { %v555_v40 = vsub.f32 1.5, %v554_v39 }
 0x14b   : > { %v3887_v41 = vpop.eup %3886 }
 0x14c   : > { %v556_v42 = vmul.f32 %v3885_v35, %v555_v40  ;;  %v562_v43 = vmul.f32 %v3887_v41, %v550_v36  ;;  %vm568_vm4 = vweird.f32 %v3887_v41 }
 0x14d   : > { %vm569_vm6 = vmor %vm567_vm5, %vm568_vm4 }
 0x14e   : > { %v563_v44 = vmul.f32 %v3887_v41, %v562_v43  ;;  %v560_v45 = vsel %vm559_vm3, %v3885_v35, %v556_v42 }
 0x14f   : > { %v571_v49 = vmul.f32 %v560_v45, %v4336_v13  ;;  %v521_v13 = vld [vmem:[%s4318_s30 + $0x8] sm:$0xff] }
 0x150   : > { %v564_v46 = vmul.f32 0.5, %v563_v44  ;;  %v613_v63 = vperm.slane %v521_v13, 2 }
 0x151   : > { %v574_v54 = vmul.f32 %v573_v50, %v571_v49 }
 0x152   : > { %v565_v48 = vsub.f32 1.5, %v564_v46  ;;  %v4433_v46 = vunpack.c.0.s8 %v835_v34 }
 0x153   : > { %v577_v57 = vadd.f32 %v576_v55, %v574_v54 }
 0x154   : > { %v566_v51 = vmul.f32 %v3887_v41, %v565_v48 }
 0x156   : > { %v570_v52 = vsel %vm569_vm6, %v3887_v41, %v566_v51 }
 0x157   : > { %v572_v53 = vmul.f32 %v570_v52, %v4341_v17 }
 0x159   : > { %v575_v56 = vmul.f32 %v573_v50, %v572_v53 }
 0x15b   : > { %v578_v58 = vadd.f32 %v576_v55, %v575_v56 }
 0x15d   : > { %v579_v59 = vpack.c.bf16 %v578_v58, %v577_v57 }
 0x15f   : > { %751 = vmatmul.bf16.vlgmr.msra.gmra.mxu0 %v579_v59  ;;  %765 = vmatmul.bf16.vlgmr.msra.gmra.mxu1 %v579_v59 }
 0x160   : > { %779 = vmatmul.bf16.vlgmr.msra.gmra.mxu2 %v579_v59 }
 0x1dc   : > { %v752_v60 = vpop.f32.mrf.mxu0  ;;  %v766_v61 = vpop.f32.mrf.mxu1 }
 0x1dd   : > { %v753_v2 = vadd.f32 %v752_v60, %v612_v62  ;;  %v767_v3 = vadd.f32 %v766_v61, %v613_v63 }
 0x1df   : > { %v1056_v20 = vrot.slane %v767_v3, 4  ;;  %v808_v25 = vrot.slane %v753_v2, 4 }
 0x1e4   : > { %v754_v0 = vpop.f32.mrf.mxu0  ;;  %v768_v1 = vpop.f32.mrf.mxu1 }
 0x1e5   : > { %v755_v4 = vadd.f32 %v754_v0, %v612_v62  ;;  %v769_v17 = vadd.f32 %v768_v1, %v613_v63 }
 0x1e7   : > { %v3832_v5 = vpack.i.bf16 %v769_v17, %v767_v3  ;;  %v3837_v6 = vpack.i.bf16 %v755_v4, %v753_v2  ;;  %v1112_v15 = vrot.slane %v769_v17, 4  ;;  %v864_v23 = vrot.slane %v755_v4, 4 }
 0x1e9   : > { %3833 = vrot.lane.b32.xlu0 %v3832_v5, %s4136_s8  ;;  %3823 = vrot.lane.b32.xlu2 %v3832_v5, %s4137_s5 }
 0x1ea   : > { %3838 = vrot.lane.b32.xlu1 %v3837_v6, %s4137_s5 }
 0x1f1   : > { %3828 = vrot.lane.b32.xlu2 %v3832_v5, %s4138_s18 }
 0x1f9   : > { %3843 = vrot.lane.b32.xlu2 %v3837_v6, %s4138_s18 }
 0x201   : > { %3848 = vrot.lane.b32.xlu2 %v3837_v6, %s4136_s8 }
 0x243   : > { %v4405_v7 = vpop.permute.xlu2 %3823 }
 0x244   : > { %v3826_v30 = vunpack.i.h.bf16 %v4405_v7  ;;  %v3825_v31 = vunpack.i.l.bf16 %v4405_v7 }
 0x246   : > { %v1124_v47 = vrot.slane %v3826_v30, 4  ;;  %v1068_v48 = vrot.slane %v3825_v31, 4 }
 0x24b   : > { %v3829_v8 = vpop.permute.xlu2 %3828 }
 0x24c   : > { %v3831_v9 = vunpack.i.h.bf16 %v3829_v8  ;;  %v3830_v11 = vunpack.i.l.bf16 %v3829_v8 }
 0x24e   : > { %v1110_v16 = vrot.slane %v3831_v9, 4  ;;  %v1054_v18 = vrot.slane %v3830_v11, 4  ;;  %v1113_v21 = vsel %vm806_vm7, %v3831_v9, %v1112_v15  ;;  %v1057_v22 = vsel %vm806_vm7, %v3830_v11, %v1056_v20 }
 0x24f   : > { %v4416_v32 = vperm.slane %v1113_v21, %v4407_v19  ;;  %v1065_v41 = vperm.slane %v1057_v22, %v4407_v19 }
 0x250   : > { %v1111_v26 = vsel %vm806_vm7, %v1110_v16, %v769_v17  ;;  %v1055_v27 = vsel %vm806_vm7, %v1054_v18, %v767_v3 }
 0x251   : > { %v1117_v39 = vperm.slane %v1111_v26, %v4407_v19  ;;  %v1061_v40 = vperm.slane %v1055_v27, %v4407_v19  ;;  %v1148_v49 = vrot.slane %v4416_v32, 4  ;;  %v1092_v53 = vrot.slane %v1065_v41, 4 }
 0x253   : > { %v3844_v24 = vpop.permute.xlu2 %3843  ;;  %v1136_v51 = vrot.slane %v1117_v39, 4  ;;  %v1080_v52 = vrot.slane %v1061_v40, 4 }
 0x254   : > { %v3846_v28 = vunpack.i.h.bf16 %v3844_v24  ;;  %v3845_v29 = vunpack.i.l.bf16 %v3844_v24 }
 0x256   : > { %v862_v35 = vrot.slane %v3846_v28, 4  ;;  %v865_v36 = vsel %vm806_vm7, %v3846_v28, %v864_v23  ;;  %v805_v37 = vrot.slane %v3845_v29, 4  ;;  %v809_v38 = vsel %vm806_vm7, %v3845_v29, %v808_v25 }
 0x257   : > { %v4424_v42 = vperm.slane %v865_v36, %v4407_v19  ;;  %v4431_v45 = vperm.slane %v809_v38, %v4407_v19 }
 0x258   : > { %v863_v43 = vsel %vm806_vm7, %v862_v35, %v755_v4  ;;  %v807_v50 = vsel %vm806_vm7, %v805_v37, %v753_v2 }
 0x259   : > { %v4428_v44 = vperm.slane %v863_v43, %v4407_v19  ;;  %v900_v54 = vrot.slane %v4424_v42, 4  ;;  %v4444_v62 = vperm.slane %v807_v50, %v4407_v19  ;;  %v844_v63 = vrot.slane %v4431_v45, 4 }
 0x25b   : > { %v3834_v55 = vpop.permute.xlu0 %3833  ;;  %v4438_v56 = vpop.permute.xlu2 %3848  ;;  %v888_v13 = vrot.slane %v4428_v44, 4 }
 0x25c   : > { %v3836_v57 = vunpack.i.h.bf16 %v3834_v55  ;;  %v3835_v58 = vunpack.i.l.bf16 %v3834_v55  ;;  %v3851_v59 = vunpack.i.h.bf16 %v4438_v56  ;;  %v3850_v60 = vunpack.i.l.bf16 %v4438_v56  ;;  %v3839_v61 = vpop.permute.xlu1 %3838 }
 0x25d   : > { %v3841_v0 = vunpack.i.h.bf16 %v3839_v61  ;;  %v3840_v7 = vunpack.i.l.bf16 %v3839_v61 }
 0x25e   : > { %v1122_v1 = vrot.slane %v3836_v57, 4  ;;  %v1066_v2 = vrot.slane %v3835_v58, 4  ;;  %v1069_v3 = vsel %vm806_vm7, %v3835_v58, %v1068_v48  ;;  %v1125_v4 = vsel %vm806_vm7, %v3836_v57, %v1124_v47 }
 0x25f   : > { %v1077_v17 = vperm.slane %v1069_v3, %v4407_v19  ;;  %v1133_v5 = vperm.slane %v1125_v4, %v4407_v19  ;;  %v874_v6 = vrot.slane %v3851_v59, 4  ;;  %v818_v11 = vrot.slane %v3850_v60, 4 }
 0x260   : > { %v1067_v8 = vsel %vm806_vm7, %v1066_v2, %v3825_v31  ;;  %v1123_v9 = vsel %vm806_vm7, %v1122_v1, %v3826_v30  ;;  %v876_v12 = vrot.slane %v3841_v0, 4 }
 0x261   : > { %v1073_v14 = vperm.slane %v1067_v8, %v4407_v19  ;;  %v1090_v15 = vrot.slane %v1077_v17, 4  ;;  %v1093_v16 = vsel %vm806_vm7, %v1077_v17, %v1092_v53  ;;  %v1129_v18 = vperm.slane %v1123_v9, %v4407_v19 }
 0x262   : > { %v1101_v20 = vperm.slane %v1093_v16, %v4433_v46  ;;  %v1146_v21 = vrot.slane %v1133_v5, 4  ;;  %v1149_v22 = vsel %vm806_vm7, %v1133_v5, %v1148_v49  ;;  %v875_v23 = vsel %vm806_vm7, %v874_v6, %v3841_v0 }
 0x263   : > { %v1078_v24 = vrot.slane %v1073_v14, 4  ;;  %v1081_v25 = vsel %vm806_vm7, %v1073_v14, %v1080_v52  ;;  %v1091_v26 = vsel %vm806_vm7, %v1090_v15, %v1065_v41  ;;  %v1134_v27 = vrot.slane %v1129_v18, 4 }
 0x264   : > { %v1089_v28 = vperm.slane %v1081_v25, %v4433_v46  ;;  %v4465_v29 = vperm.slane %v1091_v26, %v4433_v46  ;;  %v4467_v30 = vrot.slane %v1101_v20, 4  ;;  %v1137_v31 = vsel %vm806_vm7, %v1129_v18, %v1136_v51 }
 0x265   : > { %v1079_v33 = vsel %vm806_vm7, %v1078_v24, %v1061_v40  ;;  %v1135_v34 = vsel %vm806_vm7, %v1134_v27, %v1117_v39  ;;  %v1145_v35 = vperm.slane %v1137_v31, %v4433_v46  ;;  %v1147_v36 = vsel %vm806_vm7, %v1146_v21, %v4416_v32 }
 0x266   : > { %v4476_v37 = vperm.slane %v1079_v33, %v4433_v46  ;;  %v1104_v38 = vrot.slane %v1089_v28, 4  ;;  %v1106_v41 = vrot.slane %v4465_v29, 4  ;;  %v4481_v43 = vsel %vm806_vm7, 0.0, %v4467_v30 }
 0x267   : > { %v4484_v47 = vperm.slane %v1135_v34, %v4433_v46  ;;  %v4487_v39 = vperm.slane %v1147_v36, %v4433_v46  ;;  %v1157_v40 = vperm.slane %v1149_v22, %v4433_v46  ;;  %v4490_v48 = vrot.slane %v1145_v35, 4 }
 0x268   : > { %v832_v32 = vrot.slane %v4444_v62, 4  ;;  %v1102_v49 = vrot.slane %v4476_v37, 4  ;;  %v1105_v50 = vsel %vm806_vm7, 0.0, %v1104_v38  ;;  %v820_v51 = vrot.slane %v3840_v7, 4 }
 0x269   : > { %v1107_v52 = vsel %vm806_vm7, 0.0, %v1106_v41  ;;  %v4498_v53 = vsel %vm806_vm7, 0.0, %v4490_v48  ;;  %v1162_v55 = vrot.slane %v4487_v39, 4  ;;  %v1182_v57 = vrot.slane %v4481_v43, 4 }
 0x26a   : > { %v1158_v58 = vrot.slane %v4484_v47, 4  ;;  %v4503_v61 = vrot.slane %v1157_v40, 4  ;;  %v877_v0 = vsel %vm806_vm7, %v3851_v59, %v876_v12  ;;  %v881_v1 = vperm.slane %v875_v23, %v4407_v19 }
 0x26b   : > { %v1171_v2 = vrot.slane %v1105_v50, 4  ;;  %v1225_v3 = vrot.slane %v4498_v53, 4  ;;  %v885_v4 = vperm.slane %v877_v0, %v4407_v19  ;;  %v819_v17 = vsel %vm806_vm7, %v818_v11, %v3840_v7 }
 0x26c   : > { %v1163_v5 = vsel %vm806_vm7, 0.0, %v1162_v55  ;;  %v886_v6 = vrot.slane %v881_v1, 4  ;;  %v889_v8 = vsel %vm806_vm7, %v881_v1, %v888_v13  ;;  %v821_v59 = vsel %vm806_vm7, %v3850_v60, %v820_v51 }
 0x26d   : > { %v897_v9 = vperm.slane %v889_v8, %v4433_v46  ;;  %v898_v12 = vrot.slane %v885_v4, 4  ;;  %v901_v14 = vsel %vm806_vm7, %v885_v4, %v900_v54  ;;  %v825_v7 = vperm.slane %v819_v17, %v4407_v19 }
 0x26e   : > { %v1165_v11 = vsel %vm806_vm7, 0.0, %v4503_v61  ;;  %v887_v15 = vsel %vm806_vm7, %v886_v6, %v4428_v44  ;;  %v909_v13 = vperm.slane %v901_v14, %v4433_v46  ;;  %v829_v56 = vperm.slane %v821_v59, %v4407_v19 }
 0x26f   : > { %v4529_v60 = vperm.slane %v887_v15, %v4433_v46  ;;  %v899_v16 = vsel %vm806_vm7, %v898_v12, %v4424_v42  ;;  %v4533_v18 = vrot.slane %v897_v9, 4  ;;  %v830_v54 = vrot.slane %v825_v7, 4 }
 0x270   : > { %v4536_v20 = vperm.slane %v899_v16, %v4433_v46  ;;  %v4538_v21 = vrot.slane %v909_v13, 4  ;;  %v833_v44 = vsel %vm806_vm7, %v825_v7, %v832_v32  ;;  %v842_v22 = vrot.slane %v829_v56, 4 }
 0x271   : > { %v910_v23 = vrot.slane %v4529_v60, 4  ;;  %v4544_v24 = vsel %vm806_vm7, 0.0, %v4533_v18  ;;  %v831_v42 = vsel %vm806_vm7, %v830_v54, %v4444_v62  ;;  %v841_v25 = vperm.slane %v833_v44, %v4433_v46 }
 0x272   : > { %v914_v26 = vrot.slane %v4536_v20, 4  ;;  %v4552_v27 = vsel %vm806_vm7, 0.0, %v4538_v21  ;;  %v4555_v28 = vperm.slane %v831_v42, %v4433_v46  ;;  %v1103_v31 = vsel %vm806_vm7, 0.0, %v1102_v49 }
 0x273   : > { %v1236_v33 = vrot.slane %v1165_v11, 4  ;;  %v977_v34 = vrot.slane %v4544_v24, 4  ;;  %v843_v35 = vsel %vm806_vm7, %v842_v22, %v4431_v45  ;;  %v845_v62 = vsel %vm806_vm7, %v829_v56, %v844_v63 }
 0x274   : > { %v4565_v36 = vsel %vm806_vm7, 0.0, %v910_v23  ;;  %v4568_v41 = vperm.slane %v843_v35, %v4433_v46  ;;  %v853_v43 = vperm.slane %v845_v62, %v4433_v46  ;;  %v854_v40 = vrot.slane %v4555_v28, 4 }
 0x275   : > { %v988_v32 = vrot.slane %v4552_v27, 4  ;;  %v4573_v49 = vrot.slane %v841_v25, 4  ;;  %v1166_v50 = vsel %vm806_vm7, %v1104_v38, %v4476_v37  ;;  %v1172_v45 = vsel %vm806_vm7, %v1171_v2, %v1103_v31 }
 0x276   : > { %v4579_v63 = vsel %vm806_vm7, 0.0, %v914_v26  ;;  %v858_v51 = vrot.slane %v4568_v41, 4  ;;  %v4582_v53 = vrot.slane %v853_v43, 4  ;;  %v1170_v55 = vperm.slane %v1166_v50, %v4407_v19 }
 0x277   : > { %v1159_v0 = vsel %vm806_vm7, 0.0, %v1158_v58  ;;  %v1176_v1 = vperm.slane %v1172_v45, %v4407_v19  ;;  %v1177_v4 = vsel %vm806_vm7, %v4467_v30, %v4465_v29  ;;  %v1183_v37 = vsel %vm806_vm7, %v1182_v57, %v1107_v52 }
 0x278   : > { %v4592_v38 = vsel %vm806_vm7, 0.0, %v854_v40  ;;  %v4596_v2 = vsel %vm806_vm7, 0.0, %v4573_v49  ;;  %v4599_v17 = vsel %vm806_vm7, 0.0, %v858_v51  ;;  %v4603_v58 = vsel %vm806_vm7, 0.0, %v4582_v53 }
 0x279   : > { %v1181_v6 = vperm.slane %v1177_v4, %v4407_v19  ;;  %v1187_v29 = vperm.slane %v1183_v37, %v4407_v19  ;;  %v1188_v30 = vrot.slane %v1176_v1, 4  ;;  %v1190_v52 = vrot.slane %v1170_v55, 4 }
 0x27a   : > { %v1220_v57 = vsel %vm806_vm7, %v4490_v48, %v4484_v47  ;;  %v1226_v8 = vsel %vm806_vm7, %v1225_v3, %v1159_v0  ;;  %v1231_v59 = vsel %vm806_vm7, %v4503_v61, %v4487_v39  ;;  %v1237_v9 = vsel %vm806_vm7, %v1236_v33, %v1163_v5 }
 0x27b   : > { %v1189_v12 = vsel %vm806_vm7, %v1188_v30, %v1170_v55  ;;  %v1200_v14 = vrot.slane %v1187_v29, 4  ;;  %v1224_v7 = vperm.slane %v1220_v57, %v4407_v19  ;;  %v1230_v11 = vperm.slane %v1226_v8, %v4407_v19 }
 0x27c   : > { %v923_v15 = vrot.slane %v4596_v2, 4  ;;  %v1195_v13 = vperm.slane %v1189_v12, %v4433_v46  ;;  %v1235_v47 = vperm.slane %v1231_v59, %v4407_v19  ;;  %v1241_v48 = vperm.slane %v1237_v9, %v4407_v19 }
 0x27d   : > { %v1201_v3 = vsel %vm806_vm7, %v1200_v14, %v1181_v6  ;;  %v1242_v39 = vrot.slane %v1230_v11, 4  ;;  %v1244_v61 = vrot.slane %v1224_v7, 4  ;;  %v1191_v5 = vsel %vm806_vm7, %v1176_v1, %v1190_v52 }
 0x27e   : > { %v1207_v56 = vperm.slane %v1201_v3, %v4433_v46  ;;  %v1254_v16 = vrot.slane %v1241_v48, 4  ;;  %v4626_v54 = vperm.slane %v1191_v5, %v4433_v46  ;;  %v1202_v44 = vrot.slane %v1181_v6, 4 }
 0x27f   : > { %v1243_v22 = vsel %vm806_vm7, %v1242_v39, %v1224_v7  ;;  %v1245_v23 = vsel %vm806_vm7, %v1230_v11, %v1244_v61  ;;  %v1256_v42 = vrot.slane %v1235_v47, 4  ;;  %v1214_v25 = vrot.slane %v1195_v13, 4 }
 0x280   : > { %v1212_v26 = vrot.slane %v1207_v56, 4  ;;  %v1249_v31 = vperm.slane %v1243_v22, %v4433_v46  ;;  %v1255_v33 = vsel %vm806_vm7, %v1254_v16, %v1235_v47  ;;  %v1203_v35 = vsel %vm806_vm7, %v1187_v29, %v1202_v44 }
 0x281   : > { %v1261_v62 = vperm.slane %v1255_v33, %v4433_v46  ;;  %v4635_v43 = vperm.slane %v1203_v35, %v4433_v46  ;;  %v1218_v40 = vrot.slane %v4626_v54, 4  ;;  %v4639_v50 = vperm.slane %v1245_v23, %v4433_v46 }
 0x282   : > { %v1213_v45 = vsel %vm806_vm7, %v1212_v26, %v1195_v13  ;;  %v1257_v51 = vsel %vm806_vm7, %v1241_v48, %v1256_v42  ;;  %v1215_v55 = vsel %vm806_vm7, %v1207_v56, %v1214_v25  ;;  %v1268_v0 = vrot.slane %v1249_v31, 4 }
 0x283   : > { %v934_v1 = vrot.slane %v4603_v58, 4  ;;  %v1266_v4 = vrot.slane %v1261_v62, 4  ;;  %v1274_v37 = vpack.c.bf16 %v1213_v45, %v1213_v45  ;;  %v1219_v2 = vsel %vm806_vm7, %v4635_v43, %v1218_v40 }
 0x284   : > { %v4648_v6 = vperm.slane %v1257_v51, %v4433_v46  ;;  %v1272_v29 = vrot.slane %v4639_v50, 4  ;;  %v1280_v30 = vpack.c.bf16 %v1219_v2, %v1219_v2  ;;  %v1269_v52 = vsel %vm806_vm7, %v1261_v62, %v1268_v0 }
 0x285   : > { %v1267_v57 = vsel %vm806_vm7, %v1266_v4, %v1249_v31  ;;  %v1276_v8 = vpack.c.bf16 %v1215_v55, %v1215_v55  ;;  %v1277_v59 = vpack.c.bf16 %v1269_v52, %v1269_v52  ;;  %v1539_v58 = vunpack.c.l.b16 %v1274_v37 }
 0x286   : > { %v1275_v9 = vpack.c.bf16 %v1267_v57, %v1267_v57  ;;  %v1273_v12 = vsel %vm806_vm7, %v4648_v6, %v1272_v29  ;;  %v1630_v14 = vunpack.c.l.b16 %v1280_v30  ;;  %v918_v47 = vsel %vm806_vm7, %v4573_v49, %v4555_v28 }
 0x287   : > { %v1281_v7 = vpack.c.bf16 %v1273_v12, %v1273_v12  ;;  %v1570_v11 = vunpack.c.l.b16 %v1276_v8  ;;  %v1571_v13 = vunpack.c.l.b16 %v1277_v59  ;;  %v922_v3 = vperm.slane %v918_v47, %v4407_v19 }
 0x288   : > { %v1540_v48 = vunpack.c.l.b16 %v1275_v9  ;;  %v924_v39 = vsel %vm806_vm7, %v923_v15, %v4592_v38  ;;  %v929_v61 = vsel %vm806_vm7, %v4582_v53, %v4568_v41  ;;  %v935_v28 = vsel %vm806_vm7, %v934_v1, %v4599_v17 }
 0x289   : > { %v1631_v5 = vunpack.c.l.b16 %v1281_v7  ;;  %v1572_v56 = vpack.c.b16 %v1571_v13, %v1570_v11  ;;  %v928_v16 = vperm.slane %v924_v39, %v4407_v19  ;;  %v933_v44 = vperm.slane %v929_v61, %v4407_v19 }
 0x28a   : > { %v1541_v22 = vpack.c.b16 %v1540_v48, %v1539_v58  ;;  %v942_v49 = vrot.slane %v922_v3, 4  ;;  %v972_v23 = vsel %vm806_vm7, %v4533_v18, %v4529_v60  ;;  %v939_v41 = vperm.slane %v935_v28, %v4407_v19 }
 0x28b   : > { %v1632_v38 = vpack.c.b16 %v1631_v5, %v1630_v14  ;;  %v1577_v15 = vsel %vm1542_vm8, %v1572_v56, 0  ;;  %v940_v53 = vrot.slane %v928_v16, 4  ;;  %v976_v25 = vperm.slane %v972_v23, %v4407_v19 }
 0x28c   : > { %v1547_v42 = vsel %vm1542_vm8, %v1541_v22, 0  ;;  %v978_v17 = vsel %vm806_vm7, %v977_v34, %v4565_v36  ;;  %v983_v26 = vsel %vm806_vm7, %v4538_v21, %v4536_v20  ;;  %v1216_v60 = vrot.slane %v4635_v43, 4 }
 0x28d   : > { %1556 = vmatpush.bf16.xpose.msra.mxu3 %v1547_v42  ;;  %v1637_v18 = vsel %vm1542_vm8, %v1632_v38, 0  ;;  %v952_v31 = vrot.slane %v939_v41, 4  ;;  %v982_v33 = vperm.slane %v978_v17, %v4407_v19  ;;  %v941_v35 = vsel %vm806_vm7, %v940_v53, %v922_v3 }
 0x28e   : > { %1646 = vmatpush.bf16.xpose.msrb.mxu0 %v1637_v18  ;;  %v987_v24 = vperm.slane %v983_v26, %v4407_v19  ;;  %v989_v34 = vsel %vm806_vm7, %v988_v32, %v4579_v63  ;;  %v996_v20 = vrot.slane %v976_v25, 4  ;;  %v943_v43 = vsel %vm806_vm7, %v928_v16, %v942_v49 }
 0x28f   : > { %v953_v21 = vsel %vm806_vm7, %v952_v31, %v933_v44  ;;  %v993_v36 = vperm.slane %v989_v34, %v4407_v19  ;;  %v994_v62 = vrot.slane %v982_v33, 4  ;;  %v1270_v40 = vrot.slane %v4648_v6, 4 }
 0x290   : > { %v959_v45 = vperm.slane %v953_v21, %v4433_v46  ;;  %v951_v51 = vperm.slane %v943_v43, %v4433_v46  ;;  %v954_v55 = vrot.slane %v933_v44, 4  ;;  %v947_v0 = vperm.slane %v941_v35, %v4433_v46 }
 0x291   : > { %v1006_v27 = vrot.slane %v993_v36, 4  ;;  %v997_v32 = vsel %vm806_vm7, %v982_v33, %v996_v20  ;;  %v1008_v63 = vrot.slane %v987_v24, 4  ;;  %v995_v4 = vsel %vm806_vm7, %v994_v62, %v976_v25 }
 0x292   : > { %v964_v1 = vrot.slane %v959_v45, 4  ;;  %v955_v37 = vsel %vm806_vm7, %v939_v41, %v954_v55  ;;  %v970_v2 = vrot.slane %v951_v51, 4  ;;  %v1005_v30 = vperm.slane %v997_v32, %v4433_v46 }
 0x293   : > { %v1007_v29 = vsel %vm806_vm7, %v1006_v27, %v987_v24  ;;  %v963_v6 = vperm.slane %v955_v37, %v4433_v46  ;;  %v1009_v52 = vsel %vm806_vm7, %v993_v36, %v1008_v63  ;;  %v1001_v14 = vperm.slane %v995_v4, %v4433_v46 }
 0x294   : > { %v965_v57 = vsel %vm806_vm7, %v964_v1, %v947_v0  ;;  %v1013_v8 = vperm.slane %v1007_v29, %v4433_v46  ;;  %v1017_v58 = vperm.slane %v1009_v52, %v4433_v46  ;;  %v1024_v12 = vrot.slane %v1005_v30, 4 }
 0x295   : > { %1586 = vmatpush.bf16.xpose.msrb.mxu3 %v1577_v15  ;;  %v1026_v59 = vpack.c.bf16 %v965_v57, %v965_v57  ;;  %v971_v9 = vsel %vm806_vm7, %v963_v6, %v970_v2  ;;  %v1217_v13 = vsel %vm806_vm7, %v1216_v60, %v4626_v54  ;;  %v1271_v48 = vsel %vm806_vm7, %v1270_v40, %v4639_v50  ;;  %v1530_v40 = vld [vmem:[%s5316_s1] sm:$0xff] }
 0x296   : > { %v1018_v7 = vrot.slane %v1013_v8, 4  ;;  %v1032_v11 = vpack.c.bf16 %v971_v9, %v971_v9  ;;  %v1025_v47 = vsel %vm806_vm7, %v1017_v58, %v1024_v12  ;;  %v1278_v3 = vpack.c.bf16 %v1217_v13, %v1217_v13  ;;  %v522_v12 = vld [vmem:[%s4318_s30 + $0x10] sm:$0xff] }
 0x297   : > { %v1033_v61 = vpack.c.bf16 %v1025_v47, %v1025_v47  ;;  %v1279_v56 = vpack.c.bf16 %v1271_v48, %v1271_v48  ;;  %v1534_v44 = vunpack.c.l.b16 %v1026_v59  ;;  %v966_v41 = vrot.slane %v947_v0, 4  ;;  %v1531_v0 = vld [vmem:[%s5316_s1 + $0x8] sm:$0xff] }
 0x298   : > { %v1019_v39 = vsel %vm806_vm7, %v1018_v7, %v1001_v14  ;;  %v1625_v5 = vunpack.c.l.b16 %v1032_v11  ;;  %v1600_v22 = vunpack.c.l.b16 %v1278_v3  ;;  %v1020_v53 = vrot.slane %v1001_v14, 4 }
 0x299   : > { %v1027_v16 = vpack.c.bf16 %v1019_v39, %v1019_v39  ;;  %v1626_v28 = vunpack.c.l.b16 %v1033_v61  ;;  %v1601_v49 = vunpack.c.l.b16 %v1279_v56  ;;  %v967_v42 = vsel %vm806_vm7, %v959_v45, %v966_v41 }
 0x29a   : > { %v1021_v25 = vsel %vm806_vm7, %v1013_v8, %v1020_v53  ;;  %v1028_v17 = vpack.c.bf16 %v967_v42, %v967_v42  ;;  %v968_v33 = vrot.slane %v963_v6, 4  ;;  %v1022_v35 = vrot.slane %v1017_v58, 4  ;;  %v780_v8 = vpop.f32.mrf.mxu2 }
 0x29b   : > { %v1535_v23 = vunpack.c.l.b16 %v1027_v16  ;;  %v1627_v38 = vpack.c.b16 %v1626_v28, %v1625_v5  ;;  %v1602_v15 = vpack.c.b16 %v1601_v49, %v1600_v22  ;;  %v1029_v26 = vpack.c.bf16 %v1021_v25, %v1021_v25 }
 0x29c   : > { %v1565_v60 = vunpack.c.l.b16 %v1028_v17  ;;  %v969_v24 = vsel %vm806_vm7, %v968_v33, %v951_v51  ;;  %v1023_v34 = vsel %vm806_vm7, %v1022_v35, %v1005_v30  ;;  %v614_v11 = vperm.slane %v522_v12, 2 }
 0x29d   : > { %v1536_v54 = vpack.c.b16 %v1535_v23, %v1534_v44  ;;  %3322 = vmatmul.msk.bf16.vlgmr.msrb.gmra.mxu0 %vm1542_vm8, %v1627_v38  ;;  %v1607_v50 = vsel %vm1542_vm8, %v1602_v15, 0  ;;  %v1566_v18 = vunpack.c.l.b16 %v1029_v26  ;;  %v1030_v20 = vpack.c.bf16 %v969_v24, %v969_v24 }
 0x29e   : > { %v1031_v21 = vpack.c.bf16 %v1023_v34, %v1023_v34  ;;  %v4744_v3 = vadd.f32 %v780_v8, %v614_v11 }
 0x29f   : > { %3319 = vmatmul.msk.bf16.vlgmr.msra.gmra.mxu3 %vm1542_vm8, %v1536_v54  ;;  %v1567_v31 = vpack.c.b16 %v1566_v18, %v1565_v60  ;;  %v1595_v36 = vunpack.c.l.b16 %v1030_v20 }
 0x2a0   : > { %1616 = vmatpush.bf16.xpose.msra.mxu3 %v1607_v50  ;;  %v1596_v62 = vunpack.c.l.b16 %v1031_v21 }
 0x2a2   : > { %v1597_v43 = vpack.c.b16 %v1596_v62, %v1595_v36  ;;  %v782_v14 = vpop.f32.mrf.mxu2 }
 0x2a3   : > { %v4741_v47 = vadd.f32 %v782_v14, %v614_v11 }
 0x2a5   : > { %v3862_v39 = vpack.i.bf16 %v4741_v47, %v4744_v3 }
 0x2af   : > { %3320 = vmatmul.msk.bf16.vlgmr.msrb.gmra.mxu3 %vm1542_vm8, %v1567_v31 }
 0x2bf   : > { %3321 = vmatmul.msk.bf16.vlgmr.msra.gmra.mxu3 %vm1542_vm8, %v1597_v43 }
 0x31a   : > { %v1648_v45 = vpop.f32.mrf.mxu0 }
 0x31b   : > { %v4728_v55 = vadd.f32 %v1648_v45, %v1530_v40 }
 0x31d   : > { %v1672_v51 = vsel %vm1653_vm9, %v4728_v55, -inf }
 0x31e   : > { %1673 = vmax.xlane.f32.xlu1 %v1672_v51 }
 0x322   : > { %v1558_v27 = vpop.f32.mrf.mxu3  ;;  %v1650_v63 = vpop.f32.mrf.mxu0 }
 0x323   : > { %v1559_v32 = vadd.f32 %v1558_v27, %v1530_v40  ;;  %v1651_v1 = vadd.f32 %v1650_v63, %v1531_v0 }
 0x325   : > { %v1654_v4 = vsel %vm1653_vm9, %v1559_v32, -inf  ;;  %v1675_v37 = vsel %vm1653_vm9, %v1651_v1, -inf }
 0x326   : > { %1655 = vmax.xlane.f32.xlu2 %v1654_v4  ;;  %1676 = vmax.xlane.f32.xlu0 %v1675_v37 }
 0x32a   : > { %v1560_v2 = vpop.f32.mrf.mxu3 }
 0x32b   : > { %v1561_v29 = vadd.f32 %v1560_v2, %v1531_v0 }
 0x32d   : > { %v1657_v6 = vsel %vm1653_vm9, %v1561_v29, -inf }
 0x32e   : > { %1658 = vmax.xlane.f32.xlu0 %v1657_v6 }
 0x332   : > { %v1588_v30 = vpop.f32.mrf.mxu3 }
 0x333   : > { %v1589_v52 = vadd.f32 %v1588_v30, %v1530_v40 }
 0x335   : > { %v1660_v57 = vsel %vm1653_vm9, %v1589_v52, -inf }
 0x336   : > { %1661 = vmax.xlane.f32.xlu0 %v1660_v57 }
 0x33a   : > { %v1590_v59 = vpop.f32.mrf.mxu3 }
 0x33b   : > { %v1591_v9 = vadd.f32 %v1590_v59, %v1531_v0 }
 0x33d   : > { %v1663_v58 = vsel %vm1653_vm9, %v1591_v9, -inf }
 0x33e   : > { %1664 = vmax.xlane.f32.xlu2 %v1663_v58 }
 0x342   : > { %v1618_v7 = vpop.f32.mrf.mxu3 }
 0x343   : > { %v1619_v13 = vadd.f32 %v1618_v7, %v1530_v40 }
 0x345   : > { %v1666_v48 = vsel %vm1653_vm9, %v1619_v13, -inf }
 0x346   : > { %1667 = vmax.xlane.f32.xlu1 %v1666_v48 }
 0x34a   : > { %v1620_v61 = vpop.f32.mrf.mxu3  ;;  %3863 = vrot.lane.b32.xlu0 %v3862_v39, %s4136_s8 }
 0x34b   : > { %v1621_v5 = vadd.f32 %v1620_v61, %v1531_v0  ;;  %v1360_v61 = vrot.slane %v4741_v47, 4 }
 0x34d   : > { %v1669_v56 = vsel %vm1653_vm9, %v1621_v5, -inf }
 0x34e   : > { %1670 = vmax.xlane.f32.xlu2 %v1669_v56 }
 0x35f   : > { %3858 = vrot.lane.b32.xlu1 %v3862_v39, %s4138_s18 }
 0x366   : > { %3853 = vrot.lane.b32.xlu2 %v3862_v39, %s4137_s5  ;;  %v1304_v39 = vrot.slane %v4744_v3, 4 }
 0x391   : > { %v1674_v26 = vpop.xlane.xlu1 %1673 }
 0x392   : > { %v1684_v40 = vsub.f32 %v4728_v55, %v1674_v26 }
 0x394   : > { %v1698_v63 = vmul.f32 1.442695, %v1684_v40 }
 0x399   : > { %v1656_v16 = vpop.xlane.xlu2 %1655  ;;  %v1677_v22 = vpop.xlane.xlu0 %1676 }
 0x39a   : > { %v1678_v44 = vsub.f32 %v1559_v32, %v1656_v16  ;;  %v1685_v42 = vsub.f32 %v1651_v1, %v1677_v22 }
 0x39c   : > { %v1686_v28 = vmul.f32 1.442695, %v1678_v44  ;;  %v1700_v60 = vmul.f32 1.442695, %v1685_v42 }
 0x39e   : > { %3888 = vpow2.f32 %v1686_v28 }
 0x3a1   : > { %v1659_v49 = vpop.xlane.xlu0 %1658 }
 0x3a2   : > { %v1679_v23 = vsub.f32 %v1561_v29, %v1659_v49 }
 0x3a4   : > { %v4752_v38 = vpop.eup %3888  ;;  %v1688_v15 = vmul.f32 1.442695, %v1679_v23 }
 0x3a5   : > { %v1702_v54 = vsel %vm1653_vm9, %v4752_v38, 0.0 }
 0x3a6   : > { %1703 = vadd.xlane.f32.xlu2 %v1702_v54  ;;  %3890 = vpow2.f32 %v1688_v15 }
 0x3a9   : > { %v1662_v41 = vpop.xlane.xlu0 %1661 }
 0x3aa   : > { %v1680_v53 = vsub.f32 %v1589_v52, %v1662_v41 }
 0x3ac   : > { %v4756_v50 = vpop.eup %3890  ;;  %v1690_v25 = vmul.f32 1.442695, %v1680_v53 }
 0x3ad   : > { %v1705_v17 = vsel %vm1653_vm9, %v4756_v50, 0.0 }
 0x3ae   : > { %3892 = vpow2.f32 %v1690_v25  ;;  %1706 = vadd.xlane.f32.xlu0 %v1705_v17 }
 0x3af   : > { %3894 = vpow2.f32 %v1700_v60 }
 0x3b1   : > { %v1665_v33 = vpop.xlane.xlu2 %1664 }
 0x3b2   : > { %v1681_v20 = vsub.f32 %v1591_v9, %v1665_v33 }
 0x3b4   : > { %v4760_v18 = vpop.eup %3892  ;;  %v1692_v62 = vmul.f32 1.442695, %v1681_v20 }
 0x3b5   : > { %v1708_v31 = vsel %vm1653_vm9, %v4760_v18, 0.0  ;;  %v4764_v34 = vpop.eup %3894 }
 0x3b6   : > { %1709 = vadd.xlane.f32.xlu0 %v1708_v31  ;;  %v1723_v36 = vsel %vm1653_vm9, %v4764_v34, 0.0 }
 0x3b9   : > { %v1668_v35 = vpop.xlane.xlu1 %1667 }
 0x3ba   : > { %v1682_v24 = vsub.f32 %v1619_v13, %v1668_v35 }
 0x3bc   : > { %v1694_v21 = vmul.f32 1.442695, %v1682_v24  ;;  %v3864_v27 = vpop.permute.xlu0 %3863 }
 0x3bd   : > { %v3866_v1 = vunpack.i.h.bf16 %v3864_v27  ;;  %v3865_v4 = vunpack.i.l.bf16 %v3864_v27 }
 0x3be   : > { %3896 = vpow2.f32 %v1694_v21  ;;  %1724 = vadd.xlane.f32.xlu0 %v1723_v36 }
 0x3bf   : > { %3898 = vpow2.f32 %v1692_v62  ;;  %v1370_v30 = vrot.slane %v3866_v1, 4  ;;  %v1314_v8 = vrot.slane %v3865_v4, 4 }
 0x3c1   : > { %v1671_v43 = vpop.xlane.xlu2 %1670 }
 0x3c2   : > { %v1683_v45 = vsub.f32 %v1621_v5, %v1671_v43 }
 0x3c4   : > { %v4769_v51 = vpop.eup %3896  ;;  %v1696_v0 = vmul.f32 1.442695, %v1683_v45 }
 0x3c5   : > { %v1714_v32 = vsel %vm1653_vm9, %v4769_v51, 0.0  ;;  %v4773_v2 = vpop.eup %3898 }
 0x3c6   : > { %3900 = vpow2.f32 %v1696_v0  ;;  %1715 = vadd.xlane.f32.xlu1 %v1714_v32  ;;  %v1711_v59 = vsel %vm1653_vm9, %v4773_v2, 0.0 }
 0x3c7   : > { %3902 = vpow2.f32 %v1698_v63 }
 0x3c9   : > { %v3854_v37 = vpop.permute.xlu2 %3853 }
 0x3ca   : > { %v3856_v29 = vunpack.i.h.bf16 %v3854_v37  ;;  %v3855_v55 = vunpack.i.l.bf16 %v3854_v37 }
 0x3cc   : > { %v4775_v6 = vpop.eup %3900  ;;  %v1372_v52 = vrot.slane %v3856_v29, 4  ;;  %v1316_v57 = vrot.slane %v3855_v55, 4  ;;  %v1371_v58 = vsel %vm806_vm7, %v1370_v30, %v3856_v29  ;;  %v1315_v7 = vsel %vm806_vm7, %v1314_v8, %v3855_v55 }
 0x3cd   : > { %v1717_v9 = vsel %vm1653_vm9, %v4775_v6, 0.0  ;;  %v4785_v11 = vpop.eup %3902  ;;  %v1377_v13 = vperm.slane %v1371_v58, %v4407_v19  ;;  %v1321_v16 = vperm.slane %v1315_v7, %v4407_v19 }
 0x3ce   : > { %v1317_v12 = vsel %vm806_vm7, %v3865_v4, %v1316_v57  ;;  %1712 = vadd.xlane.f32.xlu1 %v1711_v59  ;;  %1718 = vadd.xlane.f32.xlu2 %v1717_v9  ;;  %v1373_v14 = vsel %vm806_vm7, %v3866_v1, %v1372_v52  ;;  %v1720_v28 = vsel %vm1653_vm9, %v4785_v11, 0.0 }
 0x3cf   : > { %v1325_v48 = vperm.slane %v1317_v12, %v4407_v19  ;;  %v1381_v56 = vperm.slane %v1373_v14, %v4407_v19  ;;  %v1382_v41 = vrot.slane %v1377_v13, 4  ;;  %v1326_v26 = vrot.slane %v1321_v16, 4 }
 0x3d1   : > { %v3859_v5 = vpop.permute.xlu1 %3858  ;;  %v1338_v53 = vrot.slane %v1325_v48, 4  ;;  %v1394_v17 = vrot.slane %v1381_v56, 4 }
 0x3d2   : > { %v3861_v44 = vunpack.i.h.bf16 %v3859_v5  ;;  %v3860_v22 = vunpack.i.l.bf16 %v3859_v5 }
 0x3d4   : > { %v1358_v49 = vrot.slane %v3861_v44, 4  ;;  %v1361_v23 = vsel %vm806_vm7, %v3861_v44, %v1360_v61  ;;  %v1302_v15 = vrot.slane %v3860_v22, 4  ;;  %v1305_v54 = vsel %vm806_vm7, %v3860_v22, %v1304_v39 }
 0x3d5   : > { %v1369_v42 = vperm.slane %v1361_v23, %v4407_v19  ;;  %v1313_v25 = vperm.slane %v1305_v54, %v4407_v19 }
 0x3d6   : > { %v1359_v60 = vsel %vm806_vm7, %v1358_v49, %v4741_v47  ;;  %v1303_v31 = vsel %vm806_vm7, %v1302_v15, %v4744_v3  ;;  %1721 = vadd.xlane.f32.xlu2 %v1720_v28 }
 0x3d7   : > { %v1365_v33 = vperm.slane %v1359_v60, %v4407_v19  ;;  %v1396_v35 = vrot.slane %v1369_v42, 4  ;;  %v1309_v24 = vperm.slane %v1303_v31, %v4407_v19  ;;  %v1339_v20 = vsel %vm806_vm7, %v1338_v53, %v1313_v25 }
 0x3d8   : > { %v1340_v21 = vrot.slane %v1313_v25, 4  ;;  %v1345_v36 = vperm.slane %v1339_v20, %v4433_v46  ;;  %v1395_v62 = vsel %vm806_vm7, %v1394_v17, %v1369_v42 }
 0x3d9   : > { %v1384_v43 = vrot.slane %v1365_v33, 4  ;;  %v1327_v40 = vsel %vm806_vm7, %v1326_v26, %v1309_v24  ;;  %v1328_v47 = vrot.slane %v1309_v24, 4  ;;  %v1383_v45 = vsel %vm806_vm7, %v1382_v41, %v1365_v33 }
 0x3da   : > { %v1333_v3 = vperm.slane %v1327_v40, %v4433_v46  ;;  %v1341_v0 = vsel %vm806_vm7, %v1325_v48, %v1340_v21  ;;  %v1354_v27 = vrot.slane %v1345_v36, 4  ;;  %v1389_v32 = vperm.slane %v1383_v45, %v4433_v46 }
 0x3db   : > { %v1329_v63 = vsel %vm806_vm7, %v1321_v16, %v1328_v47  ;;  %v1349_v1 = vperm.slane %v1341_v0, %v4433_v46  ;;  %v1385_v4 = vsel %vm806_vm7, %v1377_v13, %v1384_v43  ;;  %v1397_v37 = vsel %vm806_vm7, %v1381_v56, %v1396_v35 }
 0x3dc   : > { %v1337_v29 = vperm.slane %v1329_v63, %v4433_v46  ;;  %v1350_v55 = vrot.slane %v1333_v3, 4  ;;  %v1393_v30 = vperm.slane %v1385_v4, %v4433_v46  ;;  %v1401_v57 = vperm.slane %v1395_v62, %v4433_v46 }
 0x3dd   : > { %v1356_v52 = vrot.slane %v1349_v1, 4  ;;  %v1405_v8 = vperm.slane %v1397_v37, %v4433_v46  ;;  %v1406_v59 = vrot.slane %v1389_v32, 4  ;;  %v1355_v12 = vsel %vm806_vm7, 0.0, %v1354_v27 }
 0x3de   : > { %v1351_v9 = vsel %vm806_vm7, 0.0, %v1350_v55  ;;  %v1352_v58 = vrot.slane %v1337_v29, 4  ;;  %v1408_v14 = vrot.slane %v1393_v30, 4  ;;  %v1410_v48 = vrot.slane %v1401_v57, 4 }
 0x3df   : > { %v1357_v7 = vsel %vm806_vm7, 0.0, %v1356_v52  ;;  %v1407_v13 = vsel %vm806_vm7, 0.0, %v1406_v59  ;;  %v1412_v39 = vrot.slane %v1405_v8, 4  ;;  %v1425_v16 = vsel %vm806_vm7, %v1356_v52, %v1345_v36 }
 0x3e0   : > { %v1353_v61 = vsel %vm806_vm7, 0.0, %v1352_v58  ;;  %v1409_v5 = vsel %vm806_vm7, 0.0, %v1408_v14  ;;  %v1414_v56 = vsel %vm806_vm7, %v1352_v58, %v1333_v3  ;;  %v1411_v44 = vsel %vm806_vm7, 0.0, %v1410_v48 }
 0x3e1   : > { %v1413_v22 = vsel %vm806_vm7, 0.0, %v1412_v39  ;;  %v1418_v28 = vperm.slane %v1414_v56, %v4407_v19  ;;  %v1419_v49 = vrot.slane %v1353_v61, 4  ;;  %v1429_v23 = vperm.slane %v1425_v16, %v4407_v19 }
 0x3e2   : > { %v1430_v15 = vrot.slane %v1357_v7, 4  ;;  %v1468_v54 = vsel %vm806_vm7, %v1408_v14, %v1389_v32  ;;  %v1473_v41 = vrot.slane %v1409_v5, 4  ;;  %v1479_v25 = vsel %vm806_vm7, %v1412_v39, %v1401_v57 }
 0x3e3   : > { %v1420_v53 = vsel %vm806_vm7, %v1419_v49, %v1351_v9  ;;  %v1472_v42 = vperm.slane %v1468_v54, %v4407_v19  ;;  %v1484_v17 = vrot.slane %v1413_v22, 4  ;;  %v1450_v60 = vrot.slane %v1429_v23, 4 }
 0x3e4   : > { %v1431_v26 = vsel %vm806_vm7, %v1430_v15, %v1355_v12  ;;  %v1474_v31 = vsel %vm806_vm7, %v1473_v41, %v1407_v13  ;;  %v1483_v33 = vperm.slane %v1479_v25, %v4407_v19  ;;  %v1424_v20 = vperm.slane %v1420_v53, %v4407_v19 }
 0x3e5   : > { %v1435_v35 = vperm.slane %v1431_v26, %v4407_v19  ;;  %v1485_v24 = vsel %vm806_vm7, %v1484_v17, %v1411_v44  ;;  %v1438_v21 = vrot.slane %v1418_v28, 4  ;;  %v1478_v43 = vperm.slane %v1474_v31, %v4407_v19 }
 0x3e6   : > { %v1489_v36 = vperm.slane %v1485_v24, %v4407_v19  ;;  %v1504_v62 = vrot.slane %v1483_v33, 4  ;;  %v1492_v40 = vrot.slane %v1472_v42, 4  ;;  %v1436_v3 = vrot.slane %v1424_v20, 4 }
 0x3e7   : > { %v1439_v47 = vsel %vm806_vm7, %v1424_v20, %v1438_v21  ;;  %v1451_v45 = vsel %vm806_vm7, %v1435_v35, %v1450_v60  ;;  %v1448_v0 = vrot.slane %v1435_v35, 4  ;;  %v1490_v8 = vrot.slane %v1478_v43, 4 }
 0x3e8   : > { %v1447_v27 = vperm.slane %v1439_v47, %v4433_v46  ;;  %v1459_v32 = vperm.slane %v1451_v45, %v4433_v46  ;;  %v1493_v63 = vsel %vm806_vm7, %v1478_v43, %v1492_v40  ;;  %v1505_v1 = vsel %vm806_vm7, %v1489_v36, %v1504_v62 }
 0x3e9   : > { %v1501_v4 = vperm.slane %v1493_v63, %v4433_v46  ;;  %v1513_v37 = vperm.slane %v1505_v1, %v4433_v46  ;;  %v1437_v29 = vsel %vm806_vm7, %v1436_v3, %v1418_v28  ;;  %v1449_v55 = vsel %vm806_vm7, %v1448_v0, %v1429_v23 }
 0x3ea   : > { %v1464_v30 = vrot.slane %v1459_v32, 4  ;;  %v1443_v52 = vperm.slane %v1437_v29, %v4433_v46  ;;  %v1455_v57 = vperm.slane %v1449_v55, %v4433_v46  ;;  %v1502_v9 = vrot.slane %v1489_v36, 4 }
 0x3eb   : > { %v1518_v59 = vrot.slane %v1513_v37, 4  ;;  %v1466_v58 = vrot.slane %v1447_v27, 4  ;;  %v1520_v12 = vrot.slane %v1501_v4, 4  ;;  %v1491_v48 = vsel %vm806_vm7, %v1490_v8, %v1472_v42 }
 0x3ec   : > { %v1465_v14 = vsel %vm806_vm7, %v1464_v30, %v1447_v27  ;;  %v1460_v7 = vrot.slane %v1455_v57, 4  ;;  %v1462_v13 = vrot.slane %v1443_v52, 4  ;;  %v1497_v5 = vperm.slane %v1491_v48, %v4433_v46 }
 0x3ed   : > { %v1519_v39 = vsel %vm806_vm7, %v1518_v59, %v1501_v4  ;;  %v1526_v61 = vpack.c.bf16 %v1465_v14, %v1465_v14  ;;  %v1503_v56 = vsel %vm806_vm7, %v1502_v9, %v1483_v33  ;;  %v1467_v28 = vsel %vm806_vm7, %v1459_v32, %v1466_v58 }
 0x3ee   : > { %v1527_v16 = vpack.c.bf16 %v1519_v39, %v1519_v39  ;;  %v1461_v44 = vsel %vm806_vm7, %v1460_v7, %v1443_v52  ;;  %v1509_v22 = vperm.slane %v1503_v56, %v4433_v46  ;;  %v1516_v23 = vrot.slane %v1497_v5, 4 }
 0x3ef   : > { %v1813_v49 = vunpack.c.l.b16 %v1526_v61  ;;  %v1522_v15 = vpack.c.bf16 %v1461_v44, %v1461_v44  ;;  %v1521_v54 = vsel %vm806_vm7, %v1513_v37, %v1520_v12  ;;  %v1528_v42 = vpack.c.bf16 %v1467_v28, %v1467_v28 }
 0x3f0   : > { %v1814_v41 = vunpack.c.l.b16 %v1527_v16  ;;  %v1514_v53 = vrot.slane %v1509_v22, 4  ;;  %v1529_v25 = vpack.c.bf16 %v1521_v54, %v1521_v54  ;;  %v1463_v17 = vsel %vm806_vm7, %v1455_v57, %v1462_v13 }
 0x3f1   : > { %v1517_v26 = vsel %vm806_vm7, %v1509_v22, %v1516_v23  ;;  %v1841_v33 = vunpack.c.l.b16 %v1528_v42  ;;  %v1757_v20 = vunpack.c.l.b16 %v1522_v15  ;;  %v1524_v21 = vpack.c.bf16 %v1463_v17, %v1463_v17 }
 0x3f2   : > { %v1815_v60 = vpack.c.b16 %v1814_v41, %v1813_v49  ;;  %v1515_v31 = vsel %vm806_vm7, %v1514_v53, %v1497_v5  ;;  %v1842_v35 = vunpack.c.l.b16 %v1529_v25  ;;  %v1525_v36 = vpack.c.bf16 %v1517_v26, %v1517_v26 }
 0x3f3   : > { %v1523_v24 = vpack.c.bf16 %v1515_v31, %v1515_v31  ;;  %v1785_v40 = vunpack.c.l.b16 %v1524_v21 }
 0x3f4   : > { %1827 = vmatpush.bf16.msrb.mxu3 %v1815_v60  ;;  %v1843_v62 = vpack.c.b16 %v1842_v35, %v1841_v33  ;;  %v1786_v47 = vunpack.c.l.b16 %v1525_v36 }
 0x3f5   : > { %v1758_v43 = vunpack.c.l.b16 %v1523_v24 }
 0x3f6   : > { %1855 = vmatpush.bf16.msra.mxu0 %v1843_v62  ;;  %v1787_v3 = vpack.c.b16 %v1786_v47, %v1785_v40 }
 0x3f7   : > { %v1759_v45 = vpack.c.b16 %v1758_v43, %v1757_v20 }
 0x3f9   : > { %1771 = vmatpush.bf16.msrb.mxu2 %v1759_v45 }
 0x3fd   : > { %1799 = vmatpush.bf16.msra.mxu2 %v1787_v3 }
 0x419   : > { %v1704_v0 = vpop.xlane.xlu2 %1703 }
 0x41a   : > { %3904 = vrcp.f32 %v1704_v0 }
 0x420   : > { %v3905_v32 = vpop.eup %3904 }
 0x421   : > { %v1707_v27 = vpop.xlane.xlu0 %1706  ;;  %v1734_v63 = vmul.f32 %v3905_v32, %v4752_v38 }
 0x422   : > { %3906 = vrcp.f32 %v1707_v27 }
 0x423   : > { %v1742_v4 = vpack.c.bf16 %v1734_v63, %v1734_v63 }
 0x425   : > { %v1752_v55 = vunpack.c.l.b16 %v1742_v4 }
 0x428   : > { %v3907_v1 = vpop.eup %3906 }
 0x429   : > { %v1735_v37 = vmul.f32 %v3907_v1, %v4756_v50  ;;  %v1710_v57 = vpop.xlane.xlu0 %1709 }
 0x42a   : > { %3908 = vrcp.f32 %v1710_v57 }
 0x42b   : > { %v1743_v29 = vpack.c.bf16 %v1735_v37, %v1735_v37 }
 0x42d   : > { %v1753_v30 = vunpack.c.l.b16 %v1743_v29 }
 0x42f   : > { %v1754_v52 = vpack.c.b16 %v1753_v30, %v1752_v55 }
 0x430   : > { %v3909_v12 = vpop.eup %3908 }
 0x431   : > { %3323 = vmatmul.msk.bf16.vlgmr.msrb.gmra.mxu2 %vm1653_vm9, %v1754_v52  ;;  %v1725_v59 = vpop.xlane.xlu0 %1724  ;;  %v1736_v50 = vmul.f32 %v3909_v12, %v4760_v18 }
 0x433   : > { %v1744_v48 = vpack.c.bf16 %v1736_v50, %v1736_v50 }
 0x435   : > { %v1780_v28 = vunpack.c.l.b16 %v1744_v48 }
 0x439   : > { %v1716_v8 = vpop.xlane.xlu1 %1715 }
 0x43a   : > { %3910 = vrcp.f32 %v1716_v8 }
 0x440   : > { %v3911_v38 = vpop.eup %3910 }
 0x441   : > { %v1713_v9 = vpop.xlane.xlu1 %1712  ;;  %v1719_v58 = vpop.xlane.xlu2 %1718  ;;  %v1738_v14 = vmul.f32 %v3911_v38, %v4769_v51 }
 0x442   : > { %3912 = vrcp.f32 %v1713_v9 }
 0x443   : > { %3914 = vrcp.f32 %v1719_v58  ;;  %v1746_v56 = vpack.c.bf16 %v1738_v14, %v1738_v14 }
 0x444   : > { %3916 = vrcp.f32 %v1725_v59 }
 0x445   : > { %v1808_v18 = vunpack.c.l.b16 %v1746_v56 }
 0x448   : > { %v3913_v7 = vpop.eup %3912 }
 0x449   : > { %v3915_v13 = vpop.eup %3914  ;;  %v1737_v39 = vmul.f32 %v3913_v7, %v4773_v2  ;;  %v1722_v61 = vpop.xlane.xlu2 %1721 }
 0x44a   : > { %v3917_v5 = vpop.eup %3916  ;;  %v1739_v16 = vmul.f32 %v3915_v13, %v4775_v6  ;;  %3918 = vrcp.f32 %v1722_v61 }
 0x44b   : > { %v1745_v44 = vpack.c.bf16 %v1737_v39, %v1737_v39  ;;  %v1741_v49 = vmul.f32 %v3917_v5, %v4764_v34 }
 0x44c   : > { %v1747_v22 = vpack.c.bf16 %v1739_v16, %v1739_v16 }
 0x44d   : > { %v1781_v23 = vunpack.c.l.b16 %v1745_v44  ;;  %v1749_v53 = vpack.c.bf16 %v1741_v49, %v1741_v49 }
 0x44e   : > { %v1809_v15 = vunpack.c.l.b16 %v1747_v22 }
 0x44f   : > { %v1782_v51 = vpack.c.b16 %v1781_v23, %v1780_v28  ;;  %v1837_v42 = vunpack.c.l.b16 %v1749_v53 }
 0x450   : > { %v3919_v54 = vpop.eup %3918  ;;  %v1810_v41 = vpack.c.b16 %v1809_v15, %v1808_v18 }
 0x451   : > { %v1740_v2 = vmul.f32 %v3919_v54, %v4785_v11  ;;  %3324 = vmatmul.msk.bf16.vlgmr.msra.gmra.mxu2 %vm1653_vm9, %v1782_v51 }
 0x452   : > { %3325 = vmatmul.msk.bf16.vlgmr.msrb.gmra.mxu3 %vm1653_vm9, %v1810_v41 }
 0x453   : > { %v1748_v6 = vpack.c.bf16 %v1740_v2, %v1740_v2 }
 0x455   : > { %v1836_v25 = vunpack.c.l.b16 %v1748_v6 }
 0x457   : > { %v1838_v17 = vpack.c.b16 %v1837_v42, %v1836_v25 }
 0x459   : > { %3326 = vmatmul.msk.bf16.vlgmr.msra.gmra.mxu0 %vm1653_vm9, %v1838_v17 }
 0x4b4   : > { %v1773_v34 = vpop.f32.mrf.mxu2 }
 0x4b5   : > { %v1864_v60 = vrot.slane %v1773_v34, 4 }
 0x4bc   : > { %v1775_v26 = vpop.f32.mrf.mxu2 }
 0x4bd   : > { %v1920_v55 = vrot.slane %v1775_v26, 4 }
 0x4d4   : > { %v1801_v31 = vpop.f32.mrf.mxu2 }
 0x4d5   : > { %v1876_v33 = vrot.slane %v1801_v31, 4  ;;  %v1829_v35 = vpop.f32.mrf.mxu3 }
 0x4d6   : > { %v1862_v24 = vrot.slane %v1829_v35, 4  ;;  %v1865_v20 = vsel %vm806_vm7, %v1829_v35, %v1864_v60  ;;  %v1857_v11 = vpop.f32.mrf.mxu0 }
 0x4d7   : > { %v1873_v21 = vperm.slane %v1865_v20, %v4407_v19  ;;  %v1874_v36 = vrot.slane %v1857_v11, 4  ;;  %v1877_v62 = vsel %vm806_vm7, %v1857_v11, %v1876_v33 }
 0x4d8   : > { %v1863_v43 = vsel %vm806_vm7, %v1862_v24, %v1773_v34  ;;  %v1885_v40 = vperm.slane %v1877_v62, %v4407_v19 }
 0x4d9   : > { %v1869_v47 = vperm.slane %v1863_v43, %v4407_v19  ;;  %v1900_v45 = vrot.slane %v1873_v21, 4  ;;  %v1875_v3 = vsel %vm806_vm7, %v1874_v36, %v1801_v31 }
 0x4da   : > { %v1881_v0 = vperm.slane %v1875_v3, %v4407_v19  ;;  %v1898_v27 = vrot.slane %v1885_v40, 4 }
 0x4db   : > { %v1888_v32 = vrot.slane %v1869_v47, 4  ;;  %v1901_v63 = vsel %vm806_vm7, %v1885_v40, %v1900_v45 }
 0x4dc   : > { %v1886_v1 = vrot.slane %v1881_v0, 4  ;;  %v1899_v4 = vsel %vm806_vm7, %v1898_v27, %v1873_v21  ;;  %v1909_v37 = vperm.slane %v1901_v63, %v4433_v46  ;;  %v1803_v29 = vpop.f32.mrf.mxu2 }
 0x4dd   : > { %v1889_v30 = vsel %vm806_vm7, %v1881_v0, %v1888_v32  ;;  %v1905_v52 = vperm.slane %v1899_v4, %v4433_v46  ;;  %v1932_v57 = vrot.slane %v1803_v29, 4  ;;  %v1831_v8 = vpop.f32.mrf.mxu3 }
 0x4de   : > { %v1887_v59 = vsel %vm806_vm7, %v1886_v1, %v1869_v47  ;;  %v1897_v9 = vperm.slane %v1889_v30, %v4433_v46  ;;  %v1916_v58 = vrot.slane %v1909_v37, 4  ;;  %v1918_v12 = vrot.slane %v1831_v8, 4  ;;  %v1859_v38 = vpop.f32.mrf.mxu0 }
 0x4df   : > { %v1893_v50 = vperm.slane %v1887_v59, %v4433_v46  ;;  %v1914_v14 = vrot.slane %v1905_v52, 4  ;;  %v1921_v7 = vsel %vm806_vm7, %v1831_v8, %v1920_v55  ;;  %v1930_v13 = vrot.slane %v1859_v38, 4 }
 0x4e0   : > { %v1912_v48 = vrot.slane %v1897_v9, 4  ;;  %v1917_v39 = vsel %vm806_vm7, 0.0, %v1916_v58  ;;  %v1985_v61 = vsel %vm806_vm7, %v1916_v58, %v1905_v52  ;;  %v1919_v5 = vsel %vm806_vm7, %v1918_v12, %v1775_v26 }
 0x4e1   : > { %v1910_v56 = vrot.slane %v1893_v50, 4  ;;  %v1915_v16 = vsel %vm806_vm7, 0.0, %v1914_v14  ;;  %v1989_v44 = vperm.slane %v1985_v61, %v4407_v19  ;;  %v1990_v22 = vrot.slane %v1917_v39, 4 }
 0x4e2   : > { %v1913_v28 = vsel %vm806_vm7, 0.0, %v1912_v48  ;;  %v1974_v49 = vsel %vm806_vm7, %v1912_v48, %v1893_v50  ;;  %v1925_v23 = vperm.slane %v1919_v5, %v4407_v19  ;;  %v1929_v18 = vperm.slane %v1921_v7, %v4407_v19 }
 0x4e3   : > { %v1979_v15 = vrot.slane %v1913_v28, 4  ;;  %v1991_v51 = vsel %vm806_vm7, %v1990_v22, %v1915_v16  ;;  %v2010_v54 = vrot.slane %v1989_v44, 4  ;;  %v1931_v41 = vsel %vm806_vm7, %v1930_v13, %v1803_v29 }
 0x4e4   : > { %v1995_v53 = vperm.slane %v1991_v51, %v4407_v19  ;;  %v1944_v2 = vrot.slane %v1925_v23, 4  ;;  %v1956_v6 = vrot.slane %v1929_v18, 4  ;;  %v1933_v42 = vsel %vm806_vm7, %v1859_v38, %v1932_v57 }
 0x4e5   : > { %v1937_v25 = vperm.slane %v1931_v41, %v4407_v19  ;;  %v1941_v17 = vperm.slane %v1933_v42, %v4407_v19  ;;  %v1911_v34 = vsel %vm806_vm7, 0.0, %v1910_v56  ;;  %v1978_v26 = vperm.slane %v1974_v49, %v4407_v19 }
 0x4e6   : > { %v1980_v60 = vsel %vm806_vm7, %v1979_v15, %v1911_v34  ;;  %v2011_v31 = vsel %vm806_vm7, %v1995_v53, %v2010_v54  ;;  %v2008_v33 = vrot.slane %v1995_v53, 4 }
 0x4e7   : > { %v1942_v35 = vrot.slane %v1937_v25, 4  ;;  %v1945_v24 = vsel %vm806_vm7, %v1937_v25, %v1944_v2  ;;  %v1954_v20 = vrot.slane %v1941_v17, 4  ;;  %v1957_v11 = vsel %vm806_vm7, %v1941_v17, %v1956_v6 }
 0x4e8   : > { %v1953_v21 = vperm.slane %v1945_v24, %v4433_v46  ;;  %v1965_v36 = vperm.slane %v1957_v11, %v4433_v46  ;;  %v1984_v62 = vperm.slane %v1980_v60, %v4407_v19  ;;  %v1998_v43 = vrot.slane %v1978_v26, 4 }
 0x4e9   : > { %v1943_v40 = vsel %vm806_vm7, %v1942_v35, %v1925_v23  ;;  %v1955_v47 = vsel %vm806_vm7, %v1954_v20, %v1929_v18  ;;  %v2009_v45 = vsel %vm806_vm7, %v2008_v33, %v1989_v44  ;;  %v2019_v1 = vperm.slane %v2011_v31, %v4433_v46 }
 0x4ea   : > { %v1949_v3 = vperm.slane %v1943_v40, %v4433_v46  ;;  %v1961_v0 = vperm.slane %v1955_v47, %v4433_v46  ;;  %v1968_v27 = vrot.slane %v1953_v21, 4  ;;  %v1972_v32 = vrot.slane %v1965_v36, 4  ;;  %v3659_v40 = vld [vmem:[%s4323_s13 + $0x28] sm:$0xff]  ;;  %v3658_v47 = vld [vmem:[%s4323_s13 + $0x20] sm:$0xff] }
 0x4eb   : > { %v1999_v63 = vsel %vm806_vm7, %v1984_v62, %v1998_v43  ;;  %v1996_v4 = vrot.slane %v1984_v62, 4  ;;  %v2015_v37 = vperm.slane %v2009_v45, %v4433_v46  ;;  %v2024_v23 = vrot.slane %v2019_v1, 4  ;;  %v3661_v62 = vld [vmem:[%s4323_s13 + $0x38] sm:$0xff]  ;;  %v3660_v43 = vld [vmem:[%s4323_s13 + $0x30] sm:$0xff] }
 0x4ec   : > { %v1966_v29 = vrot.slane %v1949_v3, 4  ;;  %v1969_v55 = vsel %vm806_vm7, 0.0, %v1968_v27  ;;  %v1970_v30 = vrot.slane %v1961_v0, 4  ;;  %v1973_v52 = vsel %vm806_vm7, 0.0, %v1972_v32  ;;  %2180 = vmatpush.bf16.msrb.mxu1 %v3661_v62  ;;  %v3657_v45 = vld [vmem:[%s4323_s13 + $0x18] sm:$0xff] }
 0x4ed   : > { %v2028_v57 = vsel %vm806_vm7, %v1968_v27, %v1949_v3  ;;  %v2033_v8 = vrot.slane %v1969_v55, 4  ;;  %v2039_v59 = vsel %vm806_vm7, %v1972_v32, %v1961_v0  ;;  %v2044_v9 = vrot.slane %v1973_v52, 4  ;;  %v3656_v3 = vld [vmem:[%s4323_s13 + $0x10] sm:$0xff]  ;;  %v3655_v0 = vld [vmem:[%s4323_s13 + $0x8] sm:$0xff]  ;;  %v3654_v27 = vld [vmem:[%s4323_s13] sm:$0xff] }
 0x4ee   : > { %v1971_v58 = vsel %vm806_vm7, 0.0, %v1970_v30  ;;  %v2043_v12 = vperm.slane %v2039_v59, %v4407_v19  ;;  %v1967_v38 = vsel %vm806_vm7, 0.0, %v1966_v29  ;;  %v2007_v50 = vperm.slane %v1999_v63, %v4433_v46  ;;  %v3687_v62 = vld [vmem:[%s4303_s7 + $0xcc] sm:$0xf] }
 0x4ef   : > { %v2045_v14 = vsel %vm806_vm7, %v2044_v9, %v1971_v58  ;;  %v2032_v7 = vperm.slane %v2028_v57, %v4407_v19  ;;  %v2034_v13 = vsel %vm806_vm7, %v2033_v8, %v1967_v38  ;;  %v1997_v48 = vsel %vm806_vm7, %v1996_v4, %v1978_v26 }
 0x4f0   : > { %v2049_v39 = vperm.slane %v2045_v14, %v4407_v19  ;;  %v2064_v61 = vrot.slane %v2043_v12, 4  ;;  %v2038_v5 = vperm.slane %v2034_v13, %v4407_v19  ;;  %v2003_v16 = vperm.slane %v1997_v48, %v4433_v46  ;;  %2181 = vmatpush.bf16.msrb.mxu1 %v3660_v43  ;;  %v3957_v48 = vld [vmem:[#allocation2] sm:$0xff]  ;;  %v3467_v43 = vld [vmem:[%s4303_s7 + $0xd8] sm:$0xf0] }
 0x4f1   : > { %v2052_v56 = vrot.slane %v2032_v7, 4  ;;  %v2020_v44 = vrot.slane %v2015_v37, 4  ;;  %v2026_v51 = vrot.slane %v2007_v50, 4  ;;  %v2025_v34 = vsel %vm806_vm7, %v2024_v23, %v2007_v50  ;;  %v4975_v50 = vld [vmem:[%s4318_s30] sm:$0xff] }
 0x4f2   : > { %v2065_v22 = vsel %vm806_vm7, %v2049_v39, %v2064_v61  ;;  %v2050_v28 = vrot.slane %v2038_v5, 4  ;;  %v2062_v49 = vrot.slane %v2049_v39, 4  ;;  %v2022_v6 = vrot.slane %v2003_v16, 4 }
 0x4f3   : > { %v2053_v18 = vsel %vm806_vm7, %v2038_v5, %v2052_v56  ;;  %v2073_v15 = vperm.slane %v2065_v22, %v4433_v46  ;;  %v2021_v53 = vsel %vm806_vm7, %v2020_v44, %v2003_v16  ;;  %v2027_v35 = vsel %vm806_vm7, %v2019_v1, %v2026_v51  ;;  %v3958_v56 = vld [vmem:[#allocation2 + $0x8] sm:$0xff] }
 0x4f4   : > { %v2061_v54 = vperm.slane %v2053_v18, %v4433_v46  ;;  %v2051_v41 = vsel %vm806_vm7, %v2050_v28, %v2032_v7  ;;  %v2063_v19 = vsel %vm806_vm7, %v2062_v49, %v2043_v12  ;;  %2182 = vmatpush.bf16.msrb.mxu1 %v3659_v40  ;;  %v2131_v14 = vperm.slane %v4975_v50, 3 }
 0x4f5   : > { %v2078_v2 = vrot.slane %v2073_v15, 4  ;;  %v2057_v42 = vperm.slane %v2051_v41, %v4433_v46  ;;  %v2069_v25 = vperm.slane %v2063_v19, %v4433_v46  ;;  %v2023_v46 = vsel %vm806_vm7, %v2015_v37, %v2022_v6  ;;  %v3692_v41 = vld [vmem:[%s4303_s7 + $0xec] sm:$0xf0]  ;;  %v3690_v19 = vld [vmem:[%s4303_s7 + $0xe4] sm:$0xf] }
 0x4f6   : > { %v2080_v17 = vrot.slane %v2061_v54, 4  ;;  %v3481_v6 = vld [vmem:[%s4303_s7 + $0xe8] sm:$0xf]  ;;  %v3470_v40 = vor.u32 %v3687_v62, %v3467_v43 }
 0x4f7   : > { %v2079_v26 = vsel %vm806_vm7, %v2078_v2, %v2061_v54  ;;  %v2074_v60 = vrot.slane %v2069_v25, 4  ;;  %v2076_v31 = vrot.slane %v2057_v42, 4  ;;  %v3473_v54 = vld [vmem:[%s4303_s7 + $0xe0] sm:$0xf]  ;;  %v3475_v2 = vld [vmem:[%s4303_s7 + $0xf0] sm:$0xf0] }
 0x4f8   : > { %v3872_v33 = vpack.i.bf16 %v2079_v26, %v2025_v34  ;;  %v2081_v24 = vsel %vm806_vm7, %v2073_v15, %v2080_v17  ;;  %2183 = vmatpush.bf16.msrb.mxu1 %v3658_v47  ;;  %v3691_v34 = vld [vmem:[%s4303_s7 + $0xec] sm:$0xf]  ;;  %v3483_v26 = vld [vmem:[%s4303_s7 + $0xf8] sm:$0xf0]  ;;  %v3441_v47 = vld [vmem:[%s4303_s7 + $0xa0] sm:$0xf] }
 0x4f9   : > { %v3877_v20 = vpack.i.bf16 %v2081_v24, %v2027_v35  ;;  %v2077_v11 = vsel %vm806_vm7, %v2069_v25, %v2076_v31  ;;  %v2075_v21 = vsel %vm806_vm7, %v2074_v60, %v2057_v42  ;;  %v3693_v42 = vld [vmem:[%s4303_s7 + $0xf4] sm:$0xf0]  ;;  %v3478_v25 = vor.u32 %v3690_v19, %v3475_v2  ;;  %v3457_v31 = vld [vmem:[%s4303_s7 + $0xc0] sm:$0xf]  ;;  %v3686_v35 = vld [vmem:[%s4303_s7 + $0xc4] sm:$0xf] }
 0x4fa   : > { %3873 = vrot.lane.b32.xlu2 %v3872_v33, %s4138_s18  ;;  %v3867_v36 = vpack.i.bf16 %v2077_v11, %v2023_v46  ;;  %v3482_v17 = vor.u32 %v3693_v42, %v3481_v6  ;;  %v3486_v60 = vor.u32 %v3691_v34, %v3483_v26  ;;  %v3688_v33 = vld [vmem:[%s4303_s7 + $0xcc] sm:$0xf0]  ;;  %v3465_v46 = vld [vmem:[%s4303_s7 + $0xc8] sm:$0xf]  ;;  %v3689_v11 = vld [vmem:[%s4303_s7 + $0xd4] sm:$0xf0] }
 0x4fb   : > { %3878 = vrot.lane.b32.xlu0 %v3877_v20, %s4137_s5  ;;  %2453 = vmatpush.bf16.msra.mxu3 %v3478_v25  ;;  %v3458_v24 = vor.u32 %v3688_v33, %v3457_v31  ;;  %v3459_v20 = vld [vmem:[%s4303_s7 + $0xd0] sm:$0xf0]  ;;  %v3393_v19 = vld [vmem:[%s4303_s7 + $0x40] sm:$0xf]  ;;  %v3672_v6 = vld [vmem:[%s4303_s7 + $0x4c] sm:$0xf0] }
 0x4fc   : > { %3868 = vrot.lane.b32.xlu1 %v3867_v36, %s4136_s8  ;;  %2184 = vmatpush.bf16.msrb.mxu1 %v3657_v45  ;;  %v3466_v36 = vor.u32 %v3689_v11, %v3465_v46  ;;  %v3684_v45 = vld [vmem:[%s4303_s7 + $0xac] sm:$0xf0]  ;;  %v3670_v42 = vld [vmem:[%s4303_s7 + $0x44] sm:$0xf]  ;;  %v3395_v25 = vld [vmem:[%s4303_s7 + $0x50] sm:$0xf0] }
 0x4fd   : > { %2467 = vmatpush.bf16.msrb.mxu0 %v3482_v17  ;;  %v3394_v17 = vor.u32 %v3672_v6, %v3393_v19  ;;  %v3398_v34 = vor.u32 %v3670_v42, %v3395_v25  ;;  %v3401_v26 = vld [vmem:[%s4303_s7 + $0x48] sm:$0xf]  ;;  %v3671_v31 = vld [vmem:[%s4303_s7 + $0x4c] sm:$0xf]  ;;  %v3668_v11 = vld [vmem:[%s4303_s7 + $0x2c] sm:$0xf0] }
 0x4fe   : > { %v3385_v43 = vld [vmem:[%s4303_s7 + $0x28] sm:$0xf] }
 0x500   : > { %2185 = vmatpush.bf16.msrb.mxu1 %v3656_v3  ;;  %v3682_v3 = vld [vmem:[%s4303_s7 + $0xa4] sm:$0xf] }
 0x501   : > { %2468 = vmatpush.bf16.msrb.mxu0 %v3466_v36  ;;  %v3379_v36 = vld [vmem:[%s4303_s7 + $0x30] sm:$0xf0] }
 0x504   : > { %2186 = vmatpush.bf16.msrb.mxu1 %v3655_v0  ;;  %v3442_v0 = vor.u32 %v3684_v45, %v3441_v47  ;;  %v3667_v47 = vld [vmem:[%s4303_s7 + $0x2c] sm:$0xf] }
 0x508   : > { %2187 = vmatpush.bf16.msrb.mxu1 %v3654_v27  ;;  %v3443_v27 = vld [vmem:[%s4303_s7 + $0xb0] sm:$0xf0] }
 0x50c   : > { %2481 = vmatpush.bf16.msra.mxu1 %v3486_v60  ;;  %v3673_v60 = vld [vmem:[%s4303_s7 + $0x54] sm:$0xf0] }
 0x510   : > { %2482 = vmatpush.bf16.msra.mxu1 %v3470_v40  ;;  %v3669_v40 = vld [vmem:[%s4303_s7 + $0x34] sm:$0xf0] }
 0x554   : > { %v3874_v32 = vpop.permute.xlu2 %3873 }
 0x555   : > { %v3876_v29 = vunpack.i.h.bf16 %v3874_v32  ;;  %v3875_v55 = vunpack.i.l.bf16 %v3874_v32  ;;  %v3449_v32 = vld [vmem:[%s4303_s7 + $0xa8] sm:$0xf] }
 0x56d   : > { %v3879_v63 = vpop.permute.xlu0 %3878 }
 0x56e   : > { %v3869_v1 = vpop.permute.xlu1 %3868  ;;  %v3881_v30 = vunpack.i.h.bf16 %v3879_v63  ;;  %v3880_v52 = vunpack.i.l.bf16 %v3879_v63  ;;  %v3685_v63 = vld [vmem:[%s4303_s7 + $0xb4] sm:$0xf0] }
 0x56f   : > { %v3871_v4 = vunpack.i.h.bf16 %v3869_v1  ;;  %v3870_v37 = vunpack.i.l.bf16 %v3869_v1  ;;  %v3446_v1 = vor.u32 %v3682_v3, %v3443_v27  ;;  %v3386_v3 = vor.u32 %v3669_v40, %v3385_v43  ;;  %v3361_v27 = vld [vmem:[%s4303_s7] sm:$0xf]  ;;  %v5080_v43 = vld [vmem:[%s4318_s30 + $0x8] sm:$0xff] }
 0x570   : > { %v2276_v40 = vperm.slane %v5080_v43, 6  ;;  %v3703_v43 = vld [vmem:[%s4330_s6 + $0x48] sm:$0xff] }
 0x571   : > { %v2106_v57 = vsel %vm1542_vm8, %v2021_v53, %v3870_v37  ;;  %v2107_v8 = vsel %vm1542_vm8, %v2075_v21, %v3871_v4  ;;  %v3474_v53 = vor.u32 %v3692_v41, %v3473_v54  ;;  %v3462_v21 = vor.u32 %v3686_v35, %v3459_v20  ;;  %v3683_v37 = vld [vmem:[%s4303_s7 + $0xac] sm:$0xf]  ;;  %v3419_v41 = vld [vmem:[%s4303_s7 + $0x78] sm:$0xf0]  ;;  %v3377_v20 = vld [vmem:[%s4303_s7 + $0x20] sm:$0xf] }
 0x572   : > { %v2109_v59 = vsel %vm2108_vm10, %v2106_v57, %v3875_v55  ;;  %v2110_v9 = vsel %vm2108_vm10, %v2107_v8, %v3876_v29  ;;  %v3450_v4 = vor.u32 %v3685_v63, %v3449_v32  ;;  %v3451_v29 = vld [vmem:[%s4303_s7 + $0xb8] sm:$0xf0]  ;;  %v3678_v57 = vld [vmem:[%s4303_s7 + $0x84] sm:$0xf]  ;;  %v3675_v54 = vld [vmem:[%s4303_s7 + $0x6c] sm:$0xf]  ;;  %v3402_v35 = vor.u32 %v3673_v60, %v3401_v26 }
 0x573   : > { %v2112_v58 = vsel %vm2111_vm11, %v2109_v59, %v3880_v52  ;;  %v2113_v12 = vsel %vm2111_vm11, %v2110_v9, %v3881_v30  ;;  %2439 = vmatpush.bf16.msrb.mxu2 %v3474_v53  ;;  %2454 = vmatpush.bf16.msra.mxu3 %v3462_v21  ;;  %v3454_v55 = vor.u32 %v3683_v37, %v3451_v29  ;;  %v3425_v30 = vld [vmem:[%s4303_s7 + $0x80] sm:$0xf]  ;;  %v3680_v52 = vld [vmem:[%s4303_s7 + $0x8c] sm:$0xf0]  ;;  %v3427_v59 = vld [vmem:[%s4303_s7 + $0x90] sm:$0xf0] }
 0x574   : > { %v2114_v38 = vpack.c.bf16 %v2113_v12, %v2112_v58  ;;  %2469 = vmatpush.bf16.msrb.mxu0 %v3450_v4  ;;  %v3426_v8 = vor.u32 %v3680_v52, %v3425_v30  ;;  %v3433_v9 = vld [vmem:[%s4303_s7 + $0x88] sm:$0xf]  ;;  %v3681_v58 = vld [vmem:[%s4303_s7 + $0x94] sm:$0xf0]  ;;  %v3430_v12 = vor.u32 %v3678_v57, %v3427_v59  ;;  %v3422_v2 = vor.u32 %v3675_v54, %v3419_v41  ;;  %v3666_v21 = vld [vmem:[%s4303_s7 + $0x24] sm:$0xf] }
 0x575   : > { %2483 = vmatpush.bf16.msra.mxu1 %v3454_v55  ;;  %v3378_v62 = vor.u32 %v3668_v11, %v3377_v20  ;;  %v3382_v45 = vor.u32 %v3666_v21, %v3379_v36  ;;  %v3664_v32 = vld [vmem:[%s4303_s7 + $0xc] sm:$0xf0]  ;;  %v3363_v4 = vld [vmem:[%s4303_s7 + $0x10] sm:$0xf0]  ;;  %v3369_v37 = vld [vmem:[%s4303_s7 + $0x8] sm:$0xf] }
 0x576   : > { %2188 = vmatmul.bf16.vlgmr.msrb.gmra.mxu1 %v2114_v38  ;;  %v3434_v38 = vor.u32 %v3681_v58, %v3433_v9  ;;  %v3665_v55 = vld [vmem:[%s4303_s7 + $0x14] sm:$0xf0]  ;;  %v3663_v30 = vld [vmem:[%s4303_s7 + $0xc] sm:$0xf]  ;;  %v3371_v52 = vld [vmem:[%s4303_s7 + $0x18] sm:$0xf0] }
 0x577   : > { %2440 = vmatpush.bf16.msrb.mxu2 %v3458_v24  ;;  %2455 = vmatpush.bf16.msra.mxu3 %v3446_v1  ;;  %v3403_v24 = vld [vmem:[%s4303_s7 + $0x58] sm:$0xf0]  ;;  %v3662_v1 = vld [vmem:[%s4303_s7 + $0x4] sm:$0xf]  ;;  %v3370_v9 = vor.u32 %v3665_v55, %v3369_v37  ;;  %v3708_v37 = vld [vmem:[%s4330_s6 + $0x70] sm:$0xff] }
 0x578   : > { %2470 = vmatpush.bf16.msrb.mxu0 %v3434_v38  ;;  %v3406_v46 = vor.u32 %v3671_v31, %v3403_v24  ;;  %v3366_v59 = vor.u32 %v3662_v1, %v3363_v4  ;;  %v3374_v38 = vor.u32 %v3663_v30, %v3371_v52  ;;  %v3725_v26 = vld [vmem:[%s4330_s6 + $0xf8] sm:$0xff]  ;;  %v3959_v60 = vld [vmem:[%s4318_s30 + $0x10] sm:$0xff]  ;;  %v3700_v4 = vld [vmem:[%s4330_s6 + $0x30] sm:$0xff] }
 0x579   : > { %v3701_v21 = vld [vmem:[%s4330_s6 + $0x38] sm:$0xff]  ;;  %v3714_v30 = vld [vmem:[%s4330_s6 + $0xa0] sm:$0xff] }
 0x57a   : > { %v3709_v36 = vld [vmem:[%s4330_s6 + $0x78] sm:$0xff]  ;;  %v3722_v52 = vld [vmem:[%s4330_s6 + $0xe0] sm:$0xff] }
 0x57b   : > { %2441 = vmatpush.bf16.msrb.mxu2 %v3442_v0  ;;  %2456 = vmatpush.bf16.msra.mxu3 %v3430_v12  ;;  %v3387_v0 = vld [vmem:[%s4303_s7 + $0x38] sm:$0xf0] }
 0x57c   : > { %v3390_v63 = vor.u32 %v3667_v47, %v3387_v0  ;;  %v3723_v0 = vld [vmem:[%s4330_s6 + $0xe8] sm:$0xff] }
 0x57f   : > { %2442 = vmatpush.bf16.msrb.mxu2 %v3426_v8  ;;  %v3362_v8 = vor.u32 %v3664_v32, %v3361_v27 }
 0x5f3   : > { %v2189_v7 = vpop.f32.mrf.mxu1 }
 0x5f4   : > { %v2190_v13 = vadd.f32 %v2189_v7, %v2131_v14  ;;  %v3435_v7 = vld [vmem:[%s4303_s7 + $0x98] sm:$0xf0] }
 0x5f6   : > { %v4978_v39 = vadd.f32 %v3957_v48, %v2190_v13  ;;  %v3409_v48 = vld [vmem:[%s4303_s7 + $0x60] sm:$0xf] }
 0x5f8   : > { %2196 = vadd.xlane.f32.xlu1 %v4978_v39 }
 0x5fb   : > { %v2191_v61 = vpop.f32.mrf.mxu1 }
 0x5fc   : > { %v2192_v5 = vadd.f32 %v2191_v61, %v2131_v14  ;;  %v3679_v14 = vld [vmem:[%s4303_s7 + $0x8c] sm:$0xf]  ;;  %v3676_v61 = vld [vmem:[%s4303_s7 + $0x6c] sm:$0xf0] }
 0x5fd   : > { %v3438_v13 = vor.u32 %v3679_v14, %v3435_v7 }
 0x5fe   : > { %v4981_v16 = vadd.f32 %v3958_v56, %v2192_v5  ;;  %v3674_v5 = vld [vmem:[%s4303_s7 + $0x64] sm:$0xf]  ;;  %v3410_v56 = vor.u32 %v3676_v61, %v3409_v48 }
 0x5ff   : > { %2484 = vmatpush.bf16.msra.mxu1 %v3438_v13 }
 0x600   : > { %2198 = vadd.xlane.f32.xlu0 %v4981_v16  ;;  %2443 = vmatpush.bf16.msrb.mxu2 %v3410_v56 }
 0x603   : > { %2485 = vmatpush.bf16.msra.mxu1 %v3422_v2  ;;  %v2239_v2 = vperm.slane %v4975_v50, 5 }
 0x604   : > { %2444 = vmatpush.bf16.msrb.mxu2 %v3394_v17  ;;  %v523_v17 = vld [vmem:[%s4318_s30 + $0x18] sm:$0xff] }
 0x605   : > { %v2278_v31 = vperm.slane %v523_v17, 6 }
 0x607   : > { %2486 = vmatpush.bf16.msra.mxu1 %v3406_v46 }
 0x608   : > { %2445 = vmatpush.bf16.msrb.mxu2 %v3378_v62  ;;  %v2275_v62 = vperm.slane %v4975_v50, 6 }
 0x60b   : > { %2487 = vmatpush.bf16.msra.mxu1 %v3390_v63 }
 0x60c   : > { %2446 = vmatpush.bf16.msrb.mxu2 %v3362_v8 }
 0x60f   : > { %2488 = vmatpush.bf16.msra.mxu1 %v3374_v38  ;;  %v3699_v38 = vld [vmem:[%s4330_s6 + $0x28] sm:$0xff] }
 0x610   : > { %2924 = vmatpush.bf16.msra.mxu2 %v3701_v21 }
 0x613   : > { %2966 = vmatpush.bf16.msrb.mxu1 %v3725_v26  ;;  %v3711_v26 = vld [vmem:[%s4330_s6 + $0x88] sm:$0xff] }
 0x614   : > { %2925 = vmatpush.bf16.msra.mxu2 %v3700_v4  ;;  %v3695_v4 = vld [vmem:[%s4330_s6 + $0x8] sm:$0xff] }
 0x618   : > { %2926 = vmatpush.bf16.msra.mxu2 %v3699_v38 }
 0x66b   : > { %v2197_v44 = vpop.xlane.xlu1 %2196 }
 0x66c   : > { %v2200_v22 = vmul.f32 %v2197_v44, %v4333_v10  ;;  %v3411_v44 = vld [vmem:[%s4303_s7 + $0x70] sm:$0xf0] }
 0x66e   : > { %v4986_v28 = vsub.f32 %v4978_v39, %v2200_v22  ;;  %v3417_v22 = vld [vmem:[%s4303_s7 + $0x68] sm:$0xf] }
 0x670   : > { %v2204_v49 = vmul.f32 %v4986_v28, %v4986_v28 }
 0x672   : > { %2206 = vadd.xlane.f32.xlu2 %v2204_v49  ;;  %v3677_v49 = vld [vmem:[%s4303_s7 + $0x74] sm:$0xf0] }
 0x673   : > { %v2199_v23 = vpop.xlane.xlu0 %2198 }
 0x674   : > { %v2201_v18 = vmul.f32 %v2199_v23, %v4333_v10 }
 0x676   : > { %v4992_v15 = vsub.f32 %v4981_v16, %v2201_v18  ;;  %v3414_v18 = vor.u32 %v3674_v5, %v3411_v44 }
 0x678   : > { %v2205_v51 = vmul.f32 %v4992_v15, %v4992_v15  ;;  %2457 = vmatpush.bf16.msra.mxu3 %v3414_v18 }
 0x67a   : > { %2208 = vadd.xlane.f32.xlu1 %v2205_v51  ;;  %v3418_v51 = vor.u32 %v3677_v49, %v3417_v22 }
 0x67c   : > { %2471 = vmatpush.bf16.msrb.mxu0 %v3418_v51  ;;  %2458 = vmatpush.bf16.msra.mxu3 %v3398_v34  ;;  %v2236_v51 = vperm.slane %v4975_v50, 4  ;;  %v3717_v34 = vld [vmem:[%s4330_s6 + $0xb8] sm:$0xff] }
 0x680   : > { %2472 = vmatpush.bf16.msrb.mxu0 %v3402_v35  ;;  %2459 = vmatpush.bf16.msra.mxu3 %v3382_v45  ;;  %v3724_v35 = vld [vmem:[%s4330_s6 + $0xf0] sm:$0xff] }
 0x681   : > { %2967 = vmatpush.bf16.msrb.mxu1 %v3724_v35  ;;  %v3696_v35 = vld [vmem:[%s4330_s6 + $0x10] sm:$0xff] }
 0x684   : > { %2473 = vmatpush.bf16.msrb.mxu0 %v3386_v3  ;;  %2460 = vmatpush.bf16.msra.mxu3 %v3366_v59  ;;  %v3715_v3 = vld [vmem:[%s4330_s6 + $0xa8] sm:$0xff] }
 0x685   : > { %2968 = vmatpush.bf16.msrb.mxu1 %v3723_v0 }
 0x688   : > { %2474 = vmatpush.bf16.msrb.mxu0 %v3370_v9  ;;  %2938 = vmatpush.bf16.msrb.mxu3 %v3709_v36 }
 0x689   : > { %2969 = vmatpush.bf16.msrb.mxu1 %v3722_v52 }
 0x68c   : > { %2952 = vmatpush.bf16.msra.mxu0 %v3717_v34  ;;  %2939 = vmatpush.bf16.msrb.mxu3 %v3708_v37 }
 0x6e5   : > { %v2207_v23 = vpop.xlane.xlu2 %2206 }
 0x6e6   : > { %v2210_v53 = vmul.f32 %v2207_v23, %v4333_v10 }
 0x6e8   : > { %v2212_v33 = vadd.f32 1e-05, %v2210_v53 }
 0x6ea   : > { %3920 = vrsqrt.f32 %v2212_v33  ;;  %vm2220_vm13 = vweird.f32 %v2212_v33 }
 0x6ed   : > { %v2209_v29 = vpop.xlane.xlu1 %2208 }
 0x6ee   : > { %v2211_v57 = vmul.f32 %v2209_v29, %v4333_v10 }
 0x6f0   : > { %v3921_v58 = vpop.eup %3920  ;;  %v2213_v12 = vadd.f32 1e-05, %v2211_v57 }
 0x6f1   : > { %v2215_v14 = vmul.f32 %v3921_v58, %v2212_v33  ;;  %vm2221_vm12 = vweird.f32 %v3921_v58  ;;  %v3716_v33 = vld [vmem:[%s4330_s6 + $0xb0] sm:$0xff] }
 0x6f2   : > { %3922 = vrsqrt.f32 %v2213_v12  ;;  %vm2222_vm14 = vmor %vm2220_vm13, %vm2221_vm12  ;;  %vm2230_vm0 = vweird.f32 %v2213_v12  ;;  %2953 = vmatpush.bf16.msra.mxu0 %v3716_v33 }
 0x6f3   : > { %v2216_v7 = vmul.f32 %v3921_v58, %v2215_v14  ;;  %v3707_v14 = vld [vmem:[%s4330_s6 + $0x68] sm:$0xff] }
 0x6f4   : > { %2940 = vmatpush.bf16.msrb.mxu3 %v3707_v14 }
 0x6f5   : > { %v2217_v13 = vmul.f32 0.5, %v2216_v7 }
 0x6f6   : > { %2954 = vmatpush.bf16.msra.mxu0 %v3715_v3  ;;  %v3718_v3 = vld [vmem:[%s4330_s6 + $0xc0] sm:$0xff] }
 0x6f7   : > { %v2218_v48 = vsub.f32 1.5, %v2217_v13 }
 0x6f8   : > { %v3923_v61 = vpop.eup %3922 }
 0x6f9   : > { %v2219_v5 = vmul.f32 %v3921_v58, %v2218_v48  ;;  %v2225_v56 = vmul.f32 %v3923_v61, %v2213_v12  ;;  %vm2231_vm15 = vweird.f32 %v3923_v61 }
 0x6fa   : > { %vm2232_vm1 = vmor %vm2230_vm0, %vm2231_vm15  ;;  %2955 = vmatpush.bf16.msra.mxu0 %v3714_v30 }
 0x6fb   : > { %v2226_v44 = vmul.f32 %v3923_v61, %v2225_v56  ;;  %v2223_v22 = vsel %vm2222_vm14, %v3921_v58, %v2219_v5  ;;  %v3713_v5 = vld [vmem:[%s4330_s6 + $0x98] sm:$0xff] }
 0x6fc   : > { %v2234_v18 = vmul.f32 %v2223_v22, %v4986_v28  ;;  %v3721_v56 = vld [vmem:[%s4330_s6 + $0xd8] sm:$0xff] }
 0x6fd   : > { %v2227_v49 = vmul.f32 0.5, %v2226_v44  ;;  %2970 = vmatpush.bf16.msrb.mxu1 %v3721_v56 }
 0x6fe   : > { %v2237_v53 = vmul.f32 %v2236_v51, %v2234_v18  ;;  %2956 = vmatpush.bf16.msra.mxu0 %v3713_v5  ;;  %v3706_v18 = vld [vmem:[%s4330_s6 + $0x60] sm:$0xff] }
 0x6ff   : > { %v2228_v23 = vsub.f32 1.5, %v2227_v49  ;;  %2941 = vmatpush.bf16.msrb.mxu3 %v3706_v18 }
 0x700   : > { %v2240_v42 = vadd.f32 %v2239_v2, %v2237_v53 }
 0x701   : > { %v2229_v54 = vmul.f32 %v3923_v61, %v2228_v23  ;;  %v3698_v23 = vld [vmem:[%s4330_s6 + $0x20] sm:$0xff] }
 0x702   : > { %2927 = vmatpush.bf16.msra.mxu2 %v3698_v23 }
 0x703   : > { %v2233_v41 = vsel %vm2232_vm1, %v3923_v61, %v2229_v54 }
 0x704   : > { %v2235_v19 = vmul.f32 %v2233_v41, %v4992_v15  ;;  %v2277_v15 = vperm.slane %v3959_v60, 6 }
 0x706   : > { %v2238_v6 = vmul.f32 %v2236_v51, %v2235_v19 }
 0x708   : > { %v2241_v28 = vadd.f32 %v2239_v2, %v2238_v6  ;;  %v3712_v2 = vld [vmem:[%s4330_s6 + $0x90] sm:$0xff] }
 0x709   : > { %v3720_v6 = vld [vmem:[%s4330_s6 + $0xd0] sm:$0xff]  ;;  %2957 = vmatpush.bf16.msra.mxu0 %v3712_v2 }
 0x70a   : > { %v2242_v25 = vpack.c.bf16 %v2241_v28, %v2240_v42  ;;  %2971 = vmatpush.bf16.msrb.mxu1 %v3720_v6  ;;  %v3697_v42 = vld [vmem:[%s4330_s6 + $0x18] sm:$0xff] }
 0x70b   : > { %v3705_v28 = vld [vmem:[%s4330_s6 + $0x58] sm:$0xff]  ;;  %2928 = vmatpush.bf16.msra.mxu2 %v3697_v42 }
 0x70c   : > { %2447 = vmatmul.bf16.vlgmr.msrb.gmra.mxu2 %v2242_v25  ;;  %2461 = vmatmul.bf16.vlgmr.msra.gmra.mxu3 %v2242_v25 }
 0x70d   : > { %2475 = vmatmul.bf16.vlgmr.msrb.gmra.mxu0 %v2242_v25  ;;  %2489 = vmatmul.bf16.vlgmr.msra.gmra.mxu1 %v2242_v25 }
 0x70e   : > { %2942 = vmatpush.bf16.msrb.mxu3 %v3705_v28  ;;  %2958 = vmatpush.bf16.msra.mxu0 %v3711_v26 }
 0x70f   : > { %2929 = vmatpush.bf16.msra.mxu2 %v3696_v35 }
 0x713   : > { %2930 = vmatpush.bf16.msra.mxu2 %v3695_v4 }
 0x78a   : > { %v2476_v24 = vpop.f32.mrf.mxu0  ;;  %v2490_v20 = vpop.f32.mrf.mxu1 }
 0x78b   : > { %v5072_v46 = vadd.f32 %v2476_v24, %v2277_v15  ;;  %v5074_v11 = vadd.f32 %v2490_v20, %v2278_v31  ;;  %v3704_v24 = vld [vmem:[%s4330_s6 + $0x50] sm:$0xff] }
 0x78c   : > { %2943 = vmatpush.bf16.msrb.mxu3 %v3704_v24 }
 0x78d   : > { %v3489_v47 = vmul.f32 -1.702, %v5072_v46  ;;  %v3490_v45 = vmul.f32 -1.702, %v5074_v11 }
 0x78f   : > { %v2515_v27 = vmul.f32 1.442695, %v3489_v47  ;;  %v2517_v32 = vmul.f32 1.442695, %v3490_v45  ;;  %v2448_v63 = vpop.f32.mrf.mxu2  ;;  %v2462_v1 = vpop.f32.mrf.mxu3  ;;  %v3710_v45 = vld [vmem:[%s4330_s6 + $0x80] sm:$0xff] }
 0x790   : > { %v5089_v29 = vadd.f32 %v2448_v63, %v2275_v62  ;;  %v5093_v55 = vadd.f32 %v2462_v1, %v2276_v40  ;;  %2959 = vmatpush.bf16.msra.mxu0 %v3710_v45  ;;  %2944 = vmatpush.bf16.msrb.mxu3 %v3703_v43 }
 0x791   : > { %3924 = vpow2.f32 %v2515_v27 }
 0x792   : > { %3926 = vpow2.f32 %v2517_v32  ;;  %v3487_v57 = vmul.f32 -1.702, %v5089_v29  ;;  %v3488_v8 = vmul.f32 -1.702, %v5093_v55  ;;  %v2478_v59 = vpop.f32.mrf.mxu0  ;;  %v2492_v9 = vpop.f32.mrf.mxu1 }
 0x793   : > { %v5099_v58 = vadd.f32 %v2478_v59, %v2277_v15  ;;  %v5101_v12 = vadd.f32 %v2492_v9, %v2278_v31  ;;  %v3719_v31 = vld [vmem:[%s4330_s6 + $0xc8] sm:$0xff]  ;;  %v3694_v59 = vld [vmem:[%s4330_s6] sm:$0xff] }
 0x794   : > { %v2511_v7 = vmul.f32 1.442695, %v3487_v57  ;;  %v2513_v13 = vmul.f32 1.442695, %v3488_v8  ;;  %2972 = vmatpush.bf16.msrb.mxu1 %v3719_v31  ;;  %v3702_v9 = vld [vmem:[%s4330_s6 + $0x40] sm:$0xff]  ;;  %2931 = vmatpush.bf16.msra.mxu2 %v3694_v59 }
 0x795   : > { %v3493_v48 = vmul.f32 -1.702, %v5099_v58  ;;  %v3494_v61 = vmul.f32 -1.702, %v5101_v12  ;;  %2945 = vmatpush.bf16.msrb.mxu3 %v3702_v9 }
 0x796   : > { %3928 = vpow2.f32 %v2511_v7 }
 0x797   : > { %v3925_v44 = vpop.eup %3924  ;;  %v2523_v22 = vmul.f32 1.442695, %v3493_v48  ;;  %v2450_v49 = vpop.f32.mrf.mxu2  ;;  %3930 = vpow2.f32 %v2513_v13  ;;  %v2525_v41 = vmul.f32 1.442695, %v3494_v61 }
 0x798   : > { %v3927_v51 = vpop.eup %3926  ;;  %v5111_v54 = vadd.f32 1.0, %v3925_v44  ;;  %v5113_v19 = vadd.f32 %v2450_v49, %v2275_v62  ;;  %v2464_v15 = vpop.f32.mrf.mxu3  ;;  %2973 = vmatpush.bf16.msrb.mxu1 %v3718_v3 }
 0x799   : > { %v5115_v53 = vadd.f32 1.0, %v3927_v51  ;;  %3932 = vpow2.f32 %v2523_v22  ;;  %v5139_v47 = vadd.f32 %v2464_v15, %v2276_v40 }
 0x79a   : > { %3934 = vrcp.f32 %v5111_v54  ;;  %v3491_v17 = vmul.f32 -1.702, %v5113_v19  ;;  %v2574_v8 = vand.u32 2147483647, %v5111_v54  ;;  %v2576_v38 = vand.u32 2147483648, %v5111_v54 }
 0x79b   : > { %3936 = vrcp.f32 %v5115_v53  ;;  %v3492_v37 = vmul.f32 -1.702, %v5139_v47  ;;  %v2589_v14 = vand.u32 2147483647, %v5115_v53  ;;  %v2591_v7 = vand.u32 2147483648, %v5115_v53 }
 0x79c   : > { %v3929_v25 = vpop.eup %3928  ;;  %3938 = vpow2.f32 %v2525_v41  ;;  %v2519_v21 = vmul.f32 1.442695, %v3491_v17  ;;  %vm2570_vm3 = vweird.f32 %v5111_v54  ;;  %vm5172_vm4 = vcmp.eq.f32.partialorder %v2574_v8, 8.507059e+37 }
 0x79d   : > { %v5124_v34 = vadd.f32 1.0, %v3929_v25  ;;  %v3931_v60 = vpop.eup %3930  ;;  %v2521_v13 = vmul.f32 1.442695, %v3492_v37  ;;  %vm2585_vm5 = vweird.f32 %v5115_v53  ;;  %v2577_v49 = vor.u32 1.1754944e-38, %v2576_v38 }
 0x79e   : > { %v5145_v63 = vadd.f32 1.0, %v3931_v60  ;;  %vm5177_vm6 = vcmp.eq.f32.partialorder %v2589_v14, 8.507059e+37  ;;  %v2592_v18 = vor.u32 1.1754944e-38, %v2591_v7 }
 0x79f   : > { %v3933_v33 = vpop.eup %3932  ;;  %3940 = vrcp.f32 %v5124_v34  ;;  %v2546_v60 = vand.u32 2147483648, %v5124_v34 }
 0x7a0   : > { %v5130_v20 = vpop.eup %3934  ;;  %v5147_v1 = vadd.f32 1.0, %v3933_v33  ;;  %3942 = vpow2.f32 %v2519_v21 }
 0x7a1   : > { %v5132_v36 = vpop.eup %3936  ;;  %v2566_v62 = vmul.f32 %v5130_v20, %v5111_v54  ;;  %vm2571_vm2 = vweird.f32 %v5130_v20 }
 0x7a2   : > { %v3939_v0 = vpop.eup %3938  ;;  %v2581_v27 = vmul.f32 %v5132_v36, %v5115_v53  ;;  %3944 = vrcp.f32 %v5147_v1  ;;  %vm5184_vm7 = vmor %vm2570_vm3, %vm2571_vm2  ;;  %vm2586_vm8 = vweird.f32 %v5132_v36  ;;  %v2634_v54 = vand.u32 2147483647, %v5147_v1 }
 0x7a3   : > { %v2567_v32 = vsub.f32 1.0, %v2566_v62  ;;  %v5151_v40 = vadd.f32 1.0, %v3939_v0  ;;  %3946 = vrcp.f32 %v5145_v63  ;;  %vm2630_vm9 = vweird.f32 %v5147_v1  ;;  %vm5209_vm11 = vmor %vm2585_vm5, %vm2586_vm8 }
 0x7a4   : > { %v2582_v52 = vsub.f32 1.0, %v2581_v27  ;;  %v2636_v15 = vand.u32 2147483648, %v5147_v1  ;;  %vm5214_vm13 = vcmp.eq.f32.partialorder %v2634_v54, 8.507059e+37  ;;  %vm2540_vm2 = vweird.f32 %v5124_v34 }
 0x7a5   : > { %v2568_v30 = vmul.f32 %v5130_v20, %v2567_v32  ;;  %v5156_v57 = vpop.eup %3940  ;;  %3948 = vrcp.f32 %v5151_v40  ;;  %v2651_v53 = vand.u32 2147483648, %v5151_v40  ;;  %v2649_v43 = vand.u32 2147483647, %v5151_v40 }
 0x7a6   : > { %v3943_v48 = vpop.eup %3942  ;;  %v2583_v5 = vmul.f32 %v5132_v36, %v2582_v52  ;;  %v2536_v56 = vmul.f32 %v5156_v57, %v5124_v34  ;;  %3950 = vpow2.f32 %v2521_v13  ;;  %vm2541_vm12 = vweird.f32 %v5156_v57 }
 0x7a7   : > { %v2569_v61 = vadd.f32 %v5130_v20, %v2568_v30  ;;  %v5190_v6 = vadd.f32 1.0, %v3943_v48  ;;  %v2637_v32 = vor.u32 1.1754944e-38, %v2636_v15  ;;  %vm2645_vm0 = vweird.f32 %v5151_v40 }
 0x7a8   : > { %v3945_v44 = vpop.eup %3944  ;;  %v2584_v25 = vadd.f32 %v5132_v36, %v2583_v5  ;;  %v2537_v17 = vsub.f32 1.0, %v2536_v56  ;;  %v2652_v7 = vor.u32 1.1754944e-38, %v2651_v53  ;;  %vm2650_vm3 = vcmp.eq.f32.partialorder %v2649_v43, 8.507059e+37 }
 0x7a9   : > { %v2626_v51 = vmul.f32 %v3945_v44, %v5147_v1  ;;  %v5182_v41 = vpop.eup %3946  ;;  %v2573_v28 = vsel %vm5184_vm7, %v5130_v20, %v2569_v61  ;;  %vm2631_vm10 = vweird.f32 %v3945_v44  ;;  %3952 = vrcp.f32 %v5190_v6 }
 0x7aa   : > { %v2551_v33 = vmul.f32 %v5182_v41, %v5145_v63  ;;  %v2578_v24 = vsel %vm5172_vm4, %v2577_v49, %v2573_v28  ;;  %v2588_v45 = vsel %vm5209_vm11, %v5132_v36, %v2584_v25  ;;  %v2538_v3 = vmul.f32 %v5156_v57, %v2537_v17  ;;  %vm2632_vm14 = vmor %vm2630_vm9, %vm2631_vm10 }
 0x7ab   : > { %v3949_v42 = vpop.eup %3948  ;;  %v2627_v26 = vsub.f32 1.0, %v2626_v51  ;;  %v2657_v36 = vmul.f32 %v2578_v24, %v5072_v46  ;;  %v2593_v8 = vsel %vm5177_vm6, %v2592_v18, %v2588_v45  ;;  %v2544_v13 = vand.u32 2147483647, %v5124_v34  ;;  %vm5244_vm4 = vmor %vm2540_vm2, %vm2541_vm12 }
 0x7ac   : > { %v2641_v31 = vmul.f32 %v3949_v42, %v5151_v40  ;;  %v3951_v27 = vpop.eup %3950  ;;  %vm2646_vm15 = vweird.f32 %v3949_v42  ;;  %v2552_v37 = vsub.f32 1.0, %v2551_v33  ;;  %v2539_v38 = vadd.f32 %v5156_v57, %v2538_v3 }
 0x7ad   : > { %v2628_v35 = vmul.f32 %v3945_v44, %v2627_v26  ;;  %v5227_v52 = vadd.f32 1.0, %v3951_v27  ;;  %vm2647_vm1 = vmor %vm2645_vm0, %vm2646_vm15  ;;  %v2658_v56 = vmul.f32 %v2593_v8, %v5074_v11  ;;  %v2547_v34 = vor.u32 1.1754944e-38, %v2546_v60 }
 0x7ae   : > { %v2642_v62 = vsub.f32 1.0, %v2641_v31  ;;  %v2553_v48 = vmul.f32 %v5182_v41, %v2552_v37  ;;  %v2543_v49 = vsel %vm5244_vm4, %v5156_v57, %v2539_v38  ;;  %v2606_v23 = vand.u32 2147483648, %v5190_v6 }
 0x7af   : > { %v2629_v0 = vadd.f32 %v3945_v44, %v2628_v35  ;;  %v3953_v9 = vpop.eup %3952  ;;  %3954 = vrcp.f32 %v5227_v52  ;;  %v2604_v11 = vand.u32 2147483647, %v5190_v6  ;;  %vm2545_vm6 = vcmp.eq.f32.partialorder %v2544_v13, 8.507059e+37 }
 0x7b0   : > { %v2643_v4 = vmul.f32 %v3949_v42, %v2642_v62  ;;  %v2596_v46 = vmul.f32 %v3953_v9, %v5190_v6  ;;  %vm2601_vm5 = vweird.f32 %v3953_v9  ;;  %v2554_v54 = vadd.f32 %v5182_v41, %v2553_v48 }
 0x7b1   : > { %v2633_v30 = vsel %vm2632_vm14, %v3945_v44, %v2629_v0  ;;  %vm2556_vm7 = vweird.f32 %v5182_v41  ;;  %vm2600_vm8 = vweird.f32 %v5190_v6  ;;  %vm2555_vm9 = vweird.f32 %v5145_v63 }
 0x7b2   : > { %v2638_v1 = vsel %vm5214_vm13, %v2637_v32, %v2633_v30  ;;  %v2644_v59 = vadd.f32 %v3949_v42, %v2643_v4  ;;  %v2597_v22 = vsub.f32 1.0, %v2596_v46  ;;  %v2561_v28 = vand.u32 2147483648, %v5145_v63  ;;  %vm2602_vm10 = vmor %vm2600_vm8, %vm2601_vm5 }
 0x7b3   : > { %v2661_v14 = vmul.f32 %v2638_v1, %v5099_v58  ;;  %v2607_v25 = vor.u32 1.1754944e-38, %v2606_v23  ;;  %vm5260_vm11 = vmor %vm2555_vm9, %vm2556_vm7  ;;  %v2559_v26 = vand.u32 2147483647, %v5145_v63  ;;  %vm2605_vm12 = vcmp.eq.f32.partialorder %v2604_v11, 8.507059e+37 }
 0x7b4   : > { %v2648_v40 = vsel %vm2647_vm1, %v3949_v42, %v2644_v59  ;;  %v2598_v51 = vmul.f32 %v3953_v9, %v2597_v22  ;;  %v2558_v31 = vsel %vm5260_vm11, %v5182_v41, %v2554_v54  ;;  %v2621_v35 = vand.u32 2147483648, %v5227_v52 }
 0x7b5   : > { %v2665_v61 = vpack.c.bf16 %v2661_v14, %v2657_v36  ;;  %v2653_v5 = vsel %vm2650_vm3, %v2652_v7, %v2648_v40  ;;  %v3955_v2 = vpop.eup %3954  ;;  %v2619_v21 = vand.u32 2147483647, %v5227_v52  ;;  %v2562_v62 = vor.u32 1.1754944e-38, %v2561_v28 }
 0x7b6   : > { %v2662_v44 = vmul.f32 %v2653_v5, %v5101_v12  ;;  %v2548_v12 = vsel %vm2545_vm6, %v2547_v34, %v2543_v49  ;;  %v2599_v42 = vadd.f32 %v3953_v9, %v2598_v51  ;;  %v2611_v57 = vmul.f32 %v3955_v2, %v5227_v52 }
 0x7b7   : > { %2960 = vmatmul.bf16.vlgmr.msra.gmra.mxu0 %v2665_v61  ;;  %v2655_v6 = vmul.f32 %v2548_v12, %v5089_v29  ;;  %vm2616_vm13 = vweird.f32 %v3955_v2  ;;  %vm2560_vm14 = vcmp.eq.f32.partialorder %v2559_v26, 8.507059e+37  ;;  %vm2615_vm15 = vweird.f32 %v5227_v52 }
 0x7b8   : > { %v2666_v18 = vpack.c.bf16 %v2662_v44, %v2658_v56  ;;  %v2603_v60 = vsel %vm2602_vm10, %v3953_v9, %v2599_v42  ;;  %v2612_v15 = vsub.f32 1.0, %v2611_v57  ;;  %v2563_v29 = vsel %vm2560_vm14, %v2562_v62, %v2558_v31  ;;  %vm2617_vm0 = vmor %vm2615_vm15, %vm2616_vm13 }
 0x7b9   : > { %v2608_v33 = vsel %vm2605_vm12, %v2607_v25, %v2603_v60  ;;  %v2622_v3 = vor.u32 1.1754944e-38, %v2621_v35  ;;  %vm2620_vm1 = vcmp.eq.f32.partialorder %v2619_v21, 8.507059e+37  ;;  %v2656_v53 = vmul.f32 %v2563_v29, %v5093_v55 }
 0x7ba   : > { %2974 = vmatmul.bf16.vlgmr.msrb.gmra.mxu1 %v2666_v18  ;;  %v2659_v24 = vmul.f32 %v2608_v33, %v5113_v19  ;;  %v2613_v20 = vmul.f32 %v3955_v2, %v2612_v15  ;;  %v2731_v32 = vperm.slane %v4975_v50, 7 }
 0x7bc   : > { %v2663_v63 = vpack.c.bf16 %v2659_v24, %v2655_v6  ;;  %v2614_v45 = vadd.f32 %v3955_v2, %v2613_v20 }
 0x7be   : > { %v2618_v0 = vsel %vm2617_vm0, %v3955_v2, %v2614_v45  ;;  %2932 = vmatmul.bf16.vlgmr.msra.gmra.mxu2 %v2663_v63 }
 0x7bf   : > { %v2623_v41 = vsel %vm2620_vm1, %v2622_v3, %v2618_v0 }
 0x7c0   : > { %v2660_v19 = vmul.f32 %v2623_v41, %v5139_v47 }
 0x7c2   : > { %v2664_v27 = vpack.c.bf16 %v2660_v19, %v2656_v53 }
 0x7c4   : > { %2946 = vmatmul.bf16.vlgmr.msrb.gmra.mxu3 %v2664_v27 }
 0x834   : > { %v2961_v37 = vpop.f32.mrf.mxu0 }
 0x837   : > { %v2975_v36 = vpop.f32.mrf.mxu1 }
 0x83c   : > { %v2963_v47 = vpop.f32.mrf.mxu0 }
 0x83f   : > { %v2977_v40 = vpop.f32.mrf.mxu1 }
 0x841   : > { %v2933_v4 = vpop.f32.mrf.mxu2 }
 0x842   : > { %v2934_v43 = vadd.f32 %v2933_v4, %v2731_v32 }
 0x847   : > { %v2947_v30 = vpop.f32.mrf.mxu3 }
 0x848   : > { %v2948_v52 = vadd.f32 %v2947_v30, %v2934_v43 }
 0x849   : > { %v2935_v8 = vpop.f32.mrf.mxu2 }
 0x84a   : > { %v2962_v1 = vadd.f32 %v2961_v37, %v2948_v52  ;;  %v2936_v9 = vadd.f32 %v2935_v8, %v2731_v32 }
 0x84c   : > { %v2976_v59 = vadd.f32 %v2975_v36, %v2962_v1 }
 0x84e   : > { %v2980_v38 = vadd.f32 %v2976_v59, %v4978_v39 }
 0x84f   : > { %v2949_v14 = vpop.f32.mrf.mxu3 }
 0x850   : > { %2982 = vst [vmem:[#allocation2] sm:$0xff] %v2980_v38  ;;  %v2950_v55 = vadd.f32 %v2949_v14, %v2936_v9 }
 0x852   : > { %v2964_v7 = vadd.f32 %v2963_v47, %v2950_v55 }
 0x854   : > { %v2978_v46 = vadd.f32 %v2977_v40, %v2964_v7  ;;  %2987 = sbr.rel (%p3623_p3) target bundleno = 2412 (0x96c), region = 76 }
 0x856   : > { %v2981_v50 = vadd.f32 %v2978_v46, %v4981_v16 }
 0x858   : > { %2983 = vst [vmem:[#allocation2 + $0x8] sm:$0xff] %v2981_v50 }
 0x859   : > { %2990 = vadd.xlane.f32.xlu0 %v2980_v38  ;;  %v3961_v25 = vld [vmem:[%s5358_s27] ss:$0 sm:$0xff] }
 0x85a   : > { %v3962_v60 = vld [vmem:[%s5359_s29] ss:$0 sm:$0xff] }
 0x861   : > { %2992 = vadd.xlane.f32.xlu0 %v2981_v50 }
 0x8cc   : > { %v2991_v13 = vpop.xlane.xlu0 %2990 }
 0x8cd   : > { %v2994_v48 = vmul.f32 %v2991_v13, %v4333_v10 }
 0x8cf   : > { %v2996_v61 = vsub.f32 %v2980_v38, %v2994_v48 }
 0x8d1   : > { %v2998_v39 = vmul.f32 %v2996_v61, %v2996_v61 }
 0x8d3   : > { %3000 = vadd.xlane.f32.xlu1 %v2998_v39 }
 0x8d4   : > { %v2993_v5 = vpop.xlane.xlu0 %2992 }
 0x8d5   : > { %v2995_v56 = vmul.f32 %v2993_v5, %v4333_v10 }
 0x8d7   : > { %v2997_v58 = vsub.f32 %v2981_v50, %v2995_v56 }
 0x8d9   : > { %v2999_v44 = vmul.f32 %v2997_v58, %v2997_v58 }
 0x8db   : > { %3002 = vadd.xlane.f32.xlu1 %v2999_v44 }
 0x946   : > { %v3001_v22 = vpop.xlane.xlu1 %3000 }
 0x947   : > { %v3004_v16 = vmul.f32 %v3001_v22, %v4333_v10 }
 0x949   : > { %v3006_v49 = vadd.f32 1e-05, %v3004_v16 }
 0x94b   : > { %3963 = vrsqrt.f32 %v3006_v49  ;;  %vm3014_vm3 = vweird.f32 %v3006_v49 }
 0x94e   : > { %v3003_v34 = vpop.xlane.xlu1 %3002 }
 0x94f   : > { %v3005_v23 = vmul.f32 %v3003_v34, %v4333_v10 }
 0x951   : > { %v3964_v18 = vpop.eup %3963  ;;  %v3007_v51 = vadd.f32 1e-05, %v3005_v23 }
 0x952   : > { %v3009_v11 = vmul.f32 %v3964_v18, %v3006_v49  ;;  %vm3015_vm2 = vweird.f32 %v3964_v18 }
 0x953   : > { %3965 = vrsqrt.f32 %v3007_v51  ;;  %vm3016_vm4 = vmor %vm3014_vm3, %vm3015_vm2  ;;  %vm3024_vm6 = vweird.f32 %v3007_v51 }
 0x954   : > { %v3010_v2 = vmul.f32 %v3964_v18, %v3009_v11 }
 0x956   : > { %v3011_v54 = vmul.f32 0.5, %v3010_v2 }
 0x958   : > { %v3012_v12 = vsub.f32 1.5, %v3011_v54 }
 0x959   : > { %v3966_v42 = vpop.eup %3965 }
 0x95a   : > { %v3013_v57 = vmul.f32 %v3964_v18, %v3012_v12  ;;  %v3019_v28 = vmul.f32 %v3966_v42, %v3007_v51  ;;  %vm3025_vm5 = vweird.f32 %v3966_v42 }
 0x95b   : > { %vm3026_vm7 = vmor %vm3024_vm6, %vm3025_vm5 }
 0x95c   : > { %v3017_v17 = vsel %vm3016_vm4, %v3964_v18, %v3013_v57  ;;  %v3020_v10 = vmul.f32 %v3966_v42, %v3019_v28 }
 0x95d   : > { %v3028_v26 = vmul.f32 %v3017_v17, %v2996_v61 }
 0x95e   : > { %v3021_v15 = vmul.f32 0.5, %v3020_v10 }
 0x95f   : > { %v3033_v6 = vmul.f32 %v3961_v25, %v3028_v26 }
 0x960   : > { %v3022_v31 = vsub.f32 1.5, %v3021_v15 }
 0x961   : > { %v3038_v33 = vadd.f32 %v3962_v60, %v3033_v6 }
 0x962   : > { %v3023_v35 = vmul.f32 %v3966_v42, %v3022_v31 }
 0x963   : > { %3040 = vst [vmem:[%s4328_s26] sm:$0xff] %v3038_v33 }
 0x964   : > { %v3027_v24 = vsel %vm3026_vm7, %v3966_v42, %v3023_v35 }
 0x965   : > { %v3029_v20 = vmul.f32 %v3027_v24, %v2997_v58 }
 0x967   : > { %v3034_v21 = vmul.f32 %v3961_v25, %v3029_v20 }
 0x969   : > { %v3039_v62 = vadd.f32 %v3962_v60, %v3034_v21 }
 0x96b   : > { %3041 = vst [vmem:[%s4328_s26 + $0x8] sm:$0xff] %v3039_v62 }
 0x96c PF: > { %s25_s16 = sadd.s32 1, %s4127_s16   ;;  %s5360_s24 = sld [smem:[#allocation10_spill]] }
 0x96d   : > { %p22_p4 = scmp.ge.s32.totalorder %s25_s16, 6   ;;  %s5361_s11 = sld [smem:[#allocation14_spill]] }
 0x96e   : > { %s5362_s13 = sld [smem:[#allocation11_spill]]  ;;  %s5365_s30 = smov %s4103_s10 }
 0x96f   : > { %s5363_s17 = sld [smem:[#allocation12_spill]]  ;;  %s5367_s12 = smov %s4119_s14 }
 0x970   : > { %s5364_s15 = sld [smem:[#allocation13_spill]] }
 0x971   :  { %24 = sbr.rel (!%p22_p4) target bundleno = 12 (0xc), region = 137 }
 0x972   : > { %s5366_s10 = smov %s5360_s24 }
 0x975   : > { %s5368_s14 = smov %s5363_s17 }
 0x976   :  { %3064 = vsyncpa [#allocation4], 1 }
 0x977   :  { %3066 = vsyncpa [#allocation4 + $0x1], 1 }
 0x978   :  { %3067 = vsyncpa [#allocation6], 1 }
 0x979   :  { %3069 = vsyncpa [#allocation6 + $0x1], 1 }

</bundles_post_ra>
